<compile_context>
chip_gen: v7x
topology: tpu7x:2x2x1
jax: 0.10.0
libtpu: 0.0.40
codegen_flags: <defaults>
</compile_context>

<pallas_src>
import functools
import math

import jax
import jax.numpy as jnp
import numpy as np
from jax import lax
from jax.experimental import pallas as pl
from jax.experimental.pallas import tpu as pltpu


def _mha_kernel(q_ref, k_ref, v_ref,
                wq_ref, bq_ref, wk_ref, bk_ref, wv_ref, bv_ref,
                wd_ref, bd_ref,
                o_ref,
                kh_cache, vh_cache, ctx_ref,
                *, num_heads):
    # Block views:
    #   q_ref [1, TQ, D] bf16, k_ref/v_ref [1, S, D] bf16
    #   wq/wk/wv/wd_ref [D, D] bf16 (pre-transposed to [in, out])
    #   bq/bk/bv/bd_ref [1, D] f32 (scale pre-folded into wq/bq)
    #   o_ref [1, TQ, D] f32
    #   kh_cache/vh_cache [S, D] bf16 scratch, ctx_ref [TQ, D] f32 scratch
    i = pl.program_id(1)
    D = q_ref.shape[-1]
    depth = D // num_heads

    # --- K/V projection: full-width GEMMs, computed once per batch and cached.
    @pl.when(i == 0)
    def _():
        kh = jnp.dot(k_ref[0], wk_ref[...],
                     preferred_element_type=jnp.float32) + bk_ref[...]   # [S, D]
        vh = jnp.dot(v_ref[0], wv_ref[...],
                     preferred_element_type=jnp.float32) + bv_ref[...]   # [S, D]
        kh_cache[...] = kh.astype(kh_cache.dtype)
        vh_cache[...] = vh.astype(vh_cache.dtype)

    # --- Q projection: one dense [TQ,D]@[D,D] GEMM (scale already folded in).
    qh_all = (jnp.dot(q_ref[0], wq_ref[...],
                      preferred_element_type=jnp.float32)
              + bq_ref[...]).astype(jnp.bfloat16)                        # [TQ, D]

    kh_all = kh_cache[...]                                               # [S, D] bf16
    vh_all = vh_cache[...]                                               # [S, D] bf16

    # --- Per-head attention: short static unrolled loop (H is tiny).
    for h in range(num_heads):
        lo = h * depth
        qh = qh_all[:, lo:lo + depth]                                    # [TQ, depth]
        kh = kh_all[:, lo:lo + depth]                                    # [S, depth]
        vh = vh_all[:, lo:lo + depth]                                    # [S, depth]

        # Scores in NT form (contract last axes) — no transposes in-kernel.
        scores = lax.dot_general(qh, kh, (((1,), (1,)), ((), ())),
                                 preferred_element_type=jnp.float32)     # [TQ, S]

        # Numerically-stable softmax; statistics kept in f32.
        m = jnp.max(scores, axis=-1, keepdims=True)
        e = jnp.exp(scores - m)
        l = jnp.sum(e, axis=-1, keepdims=True)

        pv = jnp.dot(e.astype(jnp.bfloat16), vh,
                     preferred_element_type=jnp.float32)                 # [TQ, depth]
        ctx_ref[:, lo:lo + depth] = pv / l   # exact normalize (tiny tile)

    # --- Output projection: one dense [TQ,D]@[D,D] GEMM, lane-dense store.
    context = ctx_ref[...].astype(jnp.bfloat16)                          # [TQ, D]
    out = jnp.dot(context, wd_ref[...],
                  preferred_element_type=jnp.float32) + bd_ref[...]      # [TQ, D]
    o_ref[0] = out.astype(o_ref.dtype)


def multi_head_attention(q, k, v, params, *, num_heads, q_tile=None):
    """q: [B, Sq, D], k/v: [B, Skv, D] float32. params: wq,bq,wk,bk,wv,bv,wd,bd."""
    B, Sq, D = q.shape
    _, Skv, _ = k.shape
    depth = D // num_heads
    scale = 1.0 / math.sqrt(depth)

    TQ = Sq if q_tile is None else q_tile
    assert Sq % TQ == 0, "q_tile must divide the query sequence length"
    num_q_tiles = Sq // TQ

    compute_dtype = jnp.bfloat16

    # One-time wrapper-side prep: transpose to [in, out], fold the attention
    # scale into Wq/bq, cast MXU inputs to bf16 (biases stay f32).
    wq_t = (params["wq"].T * scale).astype(compute_dtype)
    wk_t = params["wk"].T.astype(compute_dtype)
    wv_t = params["wv"].T.astype(compute_dtype)
    wd_t = params["wd"].T.astype(compute_dtype)
    bq = (params["bq"] * scale).reshape(1, D).astype(jnp.float32)
    bk = params["bk"].reshape(1, D).astype(jnp.float32)
    bv = params["bv"].reshape(1, D).astype(jnp.float32)
    bd = params["bd"].reshape(1, D).astype(jnp.float32)

    q_bf = q.astype(compute_dtype)
    k_bf = k.astype(compute_dtype)
    v_bf = v.astype(compute_dtype)

    grid = (B, num_q_tiles)

    q_spec = pl.BlockSpec((1, TQ, D), lambda b, i: (b, i, 0))
    kv_spec = pl.BlockSpec((1, Skv, D), lambda b, i: (b, 0, 0))
    w_spec = pl.BlockSpec((D, D), lambda b, i: (0, 0))      # constant -> resident
    b_spec = pl.BlockSpec((1, D), lambda b, i: (0, 0))      # constant -> resident
    out_spec = pl.BlockSpec((1, TQ, D), lambda b, i: (b, i, 0))

    kernel = functools.partial(_mha_kernel, num_heads=num_heads)

    return pl.pallas_call(
        kernel,
        out_shape=jax.ShapeDtypeStruct((B, Sq, D), q.dtype),
        grid_spec=pltpu.PrefetchScalarGridSpec(
            num_scalar_prefetch=0,
            grid=grid,
            in_specs=[q_spec, kv_spec, kv_spec,
                      w_spec, b_spec,
                      w_spec, b_spec,
                      w_spec, b_spec,
                      w_spec, b_spec],
            out_specs=out_spec,
            scratch_shapes=[pltpu.VMEM((Skv, D), compute_dtype),   # kh cache
                            pltpu.VMEM((Skv, D), compute_dtype),   # vh cache
                            pltpu.VMEM((TQ, D), jnp.float32)],     # ctx slab
        ),
        compiler_params=pltpu.CompilerParams(
            # batch axis parallel (megacore); q-tile axis must stay sequential
            # so the per-batch K/V cache is written (i==0) before it is read.
            dimension_semantics=("parallel", "arbitrary")),
    )(q_bf, k_bf, v_bf, wq_t, bq, wk_t, bk, wv_t, bv, wd_t, bd)


def _reference(q, k, v, params, *, num_heads):
    """Plain-JAX f32 reference mirroring the PyTorch forward (mask=None)."""
    B, S, D = q.shape
    depth = D // num_heads

    def lin(x, w, b):
        return x @ w.T + b

    qp = lin(q, params["wq"], params["bq"]).reshape(B, S, num_heads, depth).transpose(0, 2, 1, 3)
    kp = lin(k, params["wk"], params["bk"]).reshape(B, -1, num_heads, depth).transpose(0, 2, 1, 3)
    vp = lin(v, params["wv"], params["bv"]).reshape(B, -1, num_heads, depth).transpose(0, 2, 1, 3)

    scores = jnp.einsum("bhqd,bhkd->bhqk", qp, kp) / math.sqrt(depth)
    attn = jax.nn.softmax(scores, axis=-1)
    o = jnp.einsum("bhqk,bhkd->bhqd", attn, vp)
    o = o.transpose(0, 2, 1, 3).reshape(B, S, D)
    return lin(o, params["wd"], params["bd"])


if __name__ == "__main__":
    # batch=2, seq=256, d_model=128, heads=4 (depth=32): small but lane-dense.
    B, S, D, H = 2, 256, 128, 4
    TQ = 128  # grid (2, 2): batch axis parallel -> both v7x TCs get work.

    key = jax.random.PRNGKey(0)
    keys = jax.random.split(key, 11)
    q = jax.random.normal(keys[0], (B, S, D), dtype=jnp.float32)
    k = jax.random.normal(keys[1], (B, S, D), dtype=jnp.float32)
    v = jax.random.normal(keys[2], (B, S, D), dtype=jnp.float32)

    bound = 1.0 / math.sqrt(D)  # PyTorch default Linear init range
    params = {
        "wq": jax.random.uniform(keys[3], (D, D), jnp.float32, -bound, bound),
        "bq": jax.random.uniform(keys[4], (D,), jnp.float32, -bound, bound),
        "wk": jax.random.uniform(keys[5], (D, D), jnp.float32, -bound, bound),
        "bk": jax.random.uniform(keys[6], (D,), jnp.float32, -bound, bound),
        "wv": jax.random.uniform(keys[7], (D, D), jnp.float32, -bound, bound),
        "bv": jax.random.uniform(keys[8], (D,), jnp.float32, -bound, bound),
        "wd": jax.random.uniform(keys[9], (D, D), jnp.float32, -bound, bound),
        "bd": jax.random.uniform(keys[10], (D,), jnp.float32, -bound, bound),
    }

    out = multi_head_attention(q, k, v, params, num_heads=H, q_tile=TQ)
    out = jax.block_until_ready(out)

    ref = _reference(q, k, v, params, num_heads=H)
    # Tolerance reflects bf16 MXU inputs (f32 accumulation, f32 softmax
    # statistics, exact softmax normalization); structural errors would be
    # orders of magnitude larger.
    np.testing.assert_allclose(np.asarray(out), np.asarray(ref), rtol=2e-2, atol=2e-2)

    print("KERNEL_OK")
</pallas_src>

<mosaic_0001>
module attributes {stable_mosaic.version = 11 : i64} {
  func.func @_mha_kernel(%arg0: i32, %arg1: i32, %arg2: memref<1x128x128xbf16, #tpu.memory_space<vmem>>, %arg3: memref<1x256x128xbf16, #tpu.memory_space<vmem>>, %arg4: memref<1x256x128xbf16, #tpu.memory_space<vmem>>, %arg5: memref<128x128xbf16, #tpu.memory_space<vmem>>, %arg6: memref<1x128xf32, #tpu.memory_space<vmem>>, %arg7: memref<128x128xbf16, #tpu.memory_space<vmem>>, %arg8: memref<1x128xf32, #tpu.memory_space<vmem>>, %arg9: memref<128x128xbf16, #tpu.memory_space<vmem>>, %arg10: memref<1x128xf32, #tpu.memory_space<vmem>>, %arg11: memref<128x128xbf16, #tpu.memory_space<vmem>>, %arg12: memref<1x128xf32, #tpu.memory_space<vmem>>, %arg13: memref<1x128x128xf32, #tpu.memory_space<vmem>>, %arg14: memref<256x128xbf16, #tpu.memory_space<vmem>>, %arg15: memref<256x128xbf16, #tpu.memory_space<vmem>>, %arg16: memref<128x128xf32, #tpu.memory_space<vmem>>) attributes {dimension_semantics = [#tpu.dimension_semantics<parallel>, #tpu.dimension_semantics<arbitrary>], iteration_bounds = array<i64: 2, 2>, scalar_prefetch = 0 : i64, scratch_operands = 3 : i64, tpu.core_type = #tpu.core_type<tc>, window_params = [{transform_indices = @transform_0, window_bounds = array<i64: 1, 128, 128>}, {transform_indices = @transform_1, window_bounds = array<i64: 1, 256, 128>}, {transform_indices = @transform_2, window_bounds = array<i64: 1, 256, 128>}, {pipeline_mode = #tpu.pipeline_mode<synchronous>, transform_indices = @transform_3, window_bounds = array<i64: 128, 128>}, {pipeline_mode = #tpu.pipeline_mode<synchronous>, transform_indices = @transform_4, window_bounds = array<i64: 1, 128>}, {pipeline_mode = #tpu.pipeline_mode<synchronous>, transform_indices = @transform_5, window_bounds = array<i64: 128, 128>}, {pipeline_mode = #tpu.pipeline_mode<synchronous>, transform_indices = @transform_6, window_bounds = array<i64: 1, 128>}, {pipeline_mode = #tpu.pipeline_mode<synchronous>, transform_indices = @transform_7, window_bounds = array<i64: 128, 128>}, {pipeline_mode = #tpu.pipeline_mode<synchronous>, transform_indices = @transform_8, window_bounds = array<i64: 1, 128>}, {pipeline_mode = #tpu.pipeline_mode<synchronous>, transform_indices = @transform_9, window_bounds = array<i64: 128, 128>}, {pipeline_mode = #tpu.pipeline_mode<synchronous>, transform_indices = @transform_10, window_bounds = array<i64: 1, 128>}, {transform_indices = @transform_11, window_bounds = array<i64: 1, 128, 128>}]} {
    %c0_i32 = arith.constant 0 : i32
    %0 = arith.cmpi eq, %arg1, %c0_i32 : i32
    %1 = arith.extui %0 : i1 to i32
    %c0_i32_0 = arith.constant 0 : i32
    %2 = arith.cmpi ne, %1, %c0_i32_0 : i32
    scf.if %2 {
      %c0_42 = arith.constant 0 : index
      %c0_43 = arith.constant 0 : index
      %c0_44 = arith.constant 0 : index
      %87 = vector.load %arg3[%c0_42, %c0_43, %c0_44] : memref<1x256x128xbf16, #tpu.memory_space<vmem>>, vector<1x256x128xbf16>
      %88 = vector.shape_cast %87 : vector<1x256x128xbf16> to vector<256x128xbf16>
      %c0_45 = arith.constant 0 : index
      %c0_46 = arith.constant 0 : index
      %89 = vector.load %arg7[%c0_45, %c0_46] : memref<128x128xbf16, #tpu.memory_space<vmem>>, vector<128x128xbf16>
      %cst_47 = arith.constant dense<0.000000e+00> : vector<256x128xf32>
      %90 = tpu.matmul %88, %89, %cst_47 {dimension_numbers = #tpu.dot_dimension_numbers<[1], [0], [0], [1], [0, 0, 1, 1], [], []>} : vector<256x128xbf16>, vector<128x128xbf16>, vector<256x128xf32> -> vector<256x128xf32>
      %c0_48 = arith.constant 0 : index
      %c0_49 = arith.constant 0 : index
      %91 = vector.load %arg8[%c0_48, %c0_49] : memref<1x128xf32, #tpu.memory_space<vmem>>, vector<1x128xf32>
      %92 = vector.broadcast %91 : vector<1x128xf32> to vector<256x128xf32>
      %93 = arith.addf %90, %92 : vector<256x128xf32>
      %c0_50 = arith.constant 0 : index
      %c0_51 = arith.constant 0 : index
      %c0_52 = arith.constant 0 : index
      %94 = vector.load %arg4[%c0_50, %c0_51, %c0_52] : memref<1x256x128xbf16, #tpu.memory_space<vmem>>, vector<1x256x128xbf16>
      %95 = vector.shape_cast %94 : vector<1x256x128xbf16> to vector<256x128xbf16>
      %c0_53 = arith.constant 0 : index
      %c0_54 = arith.constant 0 : index
      %96 = vector.load %arg9[%c0_53, %c0_54] : memref<128x128xbf16, #tpu.memory_space<vmem>>, vector<128x128xbf16>
      %cst_55 = arith.constant dense<0.000000e+00> : vector<256x128xf32>
      %97 = tpu.matmul %95, %96, %cst_55 {dimension_numbers = #tpu.dot_dimension_numbers<[1], [0], [0], [1], [0, 0, 1, 1], [], []>} : vector<256x128xbf16>, vector<128x128xbf16>, vector<256x128xf32> -> vector<256x128xf32>
      %c0_56 = arith.constant 0 : index
      %c0_57 = arith.constant 0 : index
      %98 = vector.load %arg10[%c0_56, %c0_57] : memref<1x128xf32, #tpu.memory_space<vmem>>, vector<1x128xf32>
      %99 = vector.broadcast %98 : vector<1x128xf32> to vector<256x128xf32>
      %100 = arith.addf %97, %99 : vector<256x128xf32>
      %101 = arith.truncf %93 : vector<256x128xf32> to vector<256x128xbf16>
      %c0_58 = arith.constant 0 : index
      %c0_59 = arith.constant 0 : index
      %102 = vector.load %arg14[%c0_58, %c0_59] : memref<256x128xbf16, #tpu.memory_space<vmem>>, vector<256x128xbf16>
      tpu.vector_store %arg14[%c0_58, %c0_59], %101 {strides = array<i32>} : memref<256x128xbf16, #tpu.memory_space<vmem>>, vector<256x128xbf16>,
      %103 = arith.truncf %100 : vector<256x128xf32> to vector<256x128xbf16>
      %c0_60 = arith.constant 0 : index
      %c0_61 = arith.constant 0 : index
      %104 = vector.load %arg15[%c0_60, %c0_61] : memref<256x128xbf16, #tpu.memory_space<vmem>>, vector<256x128xbf16>
      tpu.vector_store %arg15[%c0_60, %c0_61], %103 {strides = array<i32>} : memref<256x128xbf16, #tpu.memory_space<vmem>>, vector<256x128xbf16>,
    } else {
    }
    %c0 = arith.constant 0 : index
    %c0_1 = arith.constant 0 : index
    %c0_2 = arith.constant 0 : index
    %3 = vector.load %arg2[%c0, %c0_1, %c0_2] : memref<1x128x128xbf16, #tpu.memory_space<vmem>>, vector<1x128x128xbf16>
    %4 = vector.shape_cast %3 : vector<1x128x128xbf16> to vector<128x128xbf16>
    %c0_3 = arith.constant 0 : index
    %c0_4 = arith.constant 0 : index
    %5 = vector.load %arg5[%c0_3, %c0_4] : memref<128x128xbf16, #tpu.memory_space<vmem>>, vector<128x128xbf16>
    %cst = arith.constant dense<0.000000e+00> : vector<128x128xf32>
    %6 = tpu.matmul %4, %5, %cst {dimension_numbers = #tpu.dot_dimension_numbers<[1], [0], [0], [1], [0, 0, 1, 1], [], []>} : vector<128x128xbf16>, vector<128x128xbf16>, vector<128x128xf32> -> vector<128x128xf32>
    %c0_5 = arith.constant 0 : index
    %c0_6 = arith.constant 0 : index
    %7 = vector.load %arg6[%c0_5, %c0_6] : memref<1x128xf32, #tpu.memory_space<vmem>>, vector<1x128xf32>
    %8 = vector.broadcast %7 : vector<1x128xf32> to vector<128x128xf32>
    %9 = arith.addf %6, %8 : vector<128x128xf32>
    %10 = arith.truncf %9 : vector<128x128xf32> to vector<128x128xbf16>
    %c0_7 = arith.constant 0 : index
    %c0_8 = arith.constant 0 : index
    %11 = vector.load %arg14[%c0_7, %c0_8] : memref<256x128xbf16, #tpu.memory_space<vmem>>, vector<256x128xbf16>
    %c0_9 = arith.constant 0 : index
    %c0_10 = arith.constant 0 : index
    %12 = vector.load %arg15[%c0_9, %c0_10] : memref<256x128xbf16, #tpu.memory_space<vmem>>, vector<256x128xbf16>
    %13 = vector.extract_strided_slice %10 {offsets = [0, 0], sizes = [128, 32], strides = [1, 1]} : vector<128x128xbf16> to vector<128x32xbf16>
    %14 = vector.extract_strided_slice %11 {offsets = [0, 0], sizes = [256, 32], strides = [1, 1]} : vector<256x128xbf16> to vector<256x32xbf16>
    %15 = vector.extract_strided_slice %12 {offsets = [0, 0], sizes = [256, 32], strides = [1, 1]} : vector<256x128xbf16> to vector<256x32xbf16>
    %cst_11 = arith.constant dense<0.000000e+00> : vector<128x256xf32>
    %16 = tpu.matmul %13, %14, %cst_11 {dimension_numbers = #tpu.dot_dimension_numbers<[1], [1], [0], [0], [0, 0, 1, 0], [], []>} : vector<128x32xbf16>, vector<256x32xbf16>, vector<128x256xf32> -> vector<128x256xf32>
    %cst_12 = arith.constant dense<0xFF800000> : vector<128xf32>
    %17 = vector.multi_reduction <maximumf>, %16, %cst_12 [1] : vector<128x256xf32> to vector<128xf32>
    %18 = vector.shape_cast %17 : vector<128xf32> to vector<128x1xf32>
    %19 = vector.broadcast %18 : vector<128x1xf32> to vector<128x256xf32>
    %20 = arith.subf %16, %19 : vector<128x256xf32>
    %21 = math.exp %20 : vector<128x256xf32>
    %cst_13 = arith.constant dense<0.000000e+00> : vector<128xf32>
    %22 = vector.multi_reduction <add>, %21, %cst_13 [1] : vector<128x256xf32> to vector<128xf32>
    %23 = vector.shape_cast %22 : vector<128xf32> to vector<128x1xf32>
    %24 = arith.truncf %21 : vector<128x256xf32> to vector<128x256xbf16>
    %cst_14 = arith.constant dense<0.000000e+00> : vector<128x32xf32>
    %25 = tpu.matmul %24, %15, %cst_14 {dimension_numbers = #tpu.dot_dimension_numbers<[1], [0], [0], [1], [0, 0, 1, 1], [], []>} : vector<128x256xbf16>, vector<256x32xbf16>, vector<128x32xf32> -> vector<128x32xf32>
    %26 = vector.broadcast %23 : vector<128x1xf32> to vector<128x32xf32>
    %27 = arith.divf %25, %26 : vector<128x32xf32>
    %c0_15 = arith.constant 0 : index
    %c0_16 = arith.constant 0 : index
    %28 = vector.load %arg16[%c0_15, %c0_16] : memref<128x128xf32, #tpu.memory_space<vmem>>, vector<128x32xf32>
    tpu.vector_store %arg16[%c0_15, %c0_16], %27 {strides = array<i32>} : memref<128x128xf32, #tpu.memory_space<vmem>>, vector<128x32xf32>,
    %29 = vector.extract_strided_slice %10 {offsets = [0, 32], sizes = [128, 32], strides = [1, 1]} : vector<128x128xbf16> to vector<128x32xbf16>
    %30 = vector.extract_strided_slice %11 {offsets = [0, 32], sizes = [256, 32], strides = [1, 1]} : vector<256x128xbf16> to vector<256x32xbf16>
    %31 = vector.extract_strided_slice %12 {offsets = [0, 32], sizes = [256, 32], strides = [1, 1]} : vector<256x128xbf16> to vector<256x32xbf16>
    %cst_17 = arith.constant dense<0.000000e+00> : vector<128x256xf32>
    %32 = tpu.matmul %29, %30, %cst_17 {dimension_numbers = #tpu.dot_dimension_numbers<[1], [1], [0], [0], [0, 0, 1, 0], [], []>} : vector<128x32xbf16>, vector<256x32xbf16>, vector<128x256xf32> -> vector<128x256xf32>
    %cst_18 = arith.constant dense<0xFF800000> : vector<128xf32>
    %33 = vector.multi_reduction <maximumf>, %32, %cst_18 [1] : vector<128x256xf32> to vector<128xf32>
    %34 = vector.shape_cast %33 : vector<128xf32> to vector<128x1xf32>
    %35 = vector.broadcast %34 : vector<128x1xf32> to vector<128x256xf32>
    %36 = arith.subf %32, %35 : vector<128x256xf32>
    %37 = math.exp %36 : vector<128x256xf32>
    %cst_19 = arith.constant dense<0.000000e+00> : vector<128xf32>
    %38 = vector.multi_reduction <add>, %37, %cst_19 [1] : vector<128x256xf32> to vector<128xf32>
    %39 = vector.shape_cast %38 : vector<128xf32> to vector<128x1xf32>
    %40 = arith.truncf %37 : vector<128x256xf32> to vector<128x256xbf16>
    %cst_20 = arith.constant dense<0.000000e+00> : vector<128x32xf32>
    %41 = tpu.matmul %40, %31, %cst_20 {dimension_numbers = #tpu.dot_dimension_numbers<[1], [0], [0], [1], [0, 0, 1, 1], [], []>} : vector<128x256xbf16>, vector<256x32xbf16>, vector<128x32xf32> -> vector<128x32xf32>
    %42 = vector.broadcast %39 : vector<128x1xf32> to vector<128x32xf32>
    %43 = arith.divf %41, %42 : vector<128x32xf32>
    %c0_21 = arith.constant 0 : index
    %c32 = arith.constant 32 : index
    %44 = vector.load %arg16[%c0_21, %c32] : memref<128x128xf32, #tpu.memory_space<vmem>>, vector<128x32xf32>
    tpu.vector_store %arg16[%c0_21, %c32], %43 {strides = array<i32>} : memref<128x128xf32, #tpu.memory_space<vmem>>, vector<128x32xf32>,
    %45 = vector.extract_strided_slice %10 {offsets = [0, 64], sizes = [128, 32], strides = [1, 1]} : vector<128x128xbf16> to vector<128x32xbf16>
    %46 = vector.extract_strided_slice %11 {offsets = [0, 64], sizes = [256, 32], strides = [1, 1]} : vector<256x128xbf16> to vector<256x32xbf16>
    %47 = vector.extract_strided_slice %12 {offsets = [0, 64], sizes = [256, 32], strides = [1, 1]} : vector<256x128xbf16> to vector<256x32xbf16>
    %cst_22 = arith.constant dense<0.000000e+00> : vector<128x256xf32>
    %48 = tpu.matmul %45, %46, %cst_22 {dimension_numbers = #tpu.dot_dimension_numbers<[1], [1], [0], [0], [0, 0, 1, 0], [], []>} : vector<128x32xbf16>, vector<256x32xbf16>, vector<128x256xf32> -> vector<128x256xf32>
    %cst_23 = arith.constant dense<0xFF800000> : vector<128xf32>
    %49 = vector.multi_reduction <maximumf>, %48, %cst_23 [1] : vector<128x256xf32> to vector<128xf32>
    %50 = vector.shape_cast %49 : vector<128xf32> to vector<128x1xf32>
    %51 = vector.broadcast %50 : vector<128x1xf32> to vector<128x256xf32>
    %52 = arith.subf %48, %51 : vector<128x256xf32>
    %53 = math.exp %52 : vector<128x256xf32>
    %cst_24 = arith.constant dense<0.000000e+00> : vector<128xf32>
    %54 = vector.multi_reduction <add>, %53, %cst_24 [1] : vector<128x256xf32> to vector<128xf32>
    %55 = vector.shape_cast %54 : vector<128xf32> to vector<128x1xf32>
    %56 = arith.truncf %53 : vector<128x256xf32> to vector<128x256xbf16>
    %cst_25 = arith.constant dense<0.000000e+00> : vector<128x32xf32>
    %57 = tpu.matmul %56, %47, %cst_25 {dimension_numbers = #tpu.dot_dimension_numbers<[1], [0], [0], [1], [0, 0, 1, 1], [], []>} : vector<128x256xbf16>, vector<256x32xbf16>, vector<128x32xf32> -> vector<128x32xf32>
    %58 = vector.broadcast %55 : vector<128x1xf32> to vector<128x32xf32>
    %59 = arith.divf %57, %58 : vector<128x32xf32>
    %c0_26 = arith.constant 0 : index
    %c64 = arith.constant 64 : index
    %60 = vector.load %arg16[%c0_26, %c64] : memref<128x128xf32, #tpu.memory_space<vmem>>, vector<128x32xf32>
    tpu.vector_store %arg16[%c0_26, %c64], %59 {strides = array<i32>} : memref<128x128xf32, #tpu.memory_space<vmem>>, vector<128x32xf32>,
    %61 = vector.extract_strided_slice %10 {offsets = [0, 96], sizes = [128, 32], strides = [1, 1]} : vector<128x128xbf16> to vector<128x32xbf16>
    %62 = vector.extract_strided_slice %11 {offsets = [0, 96], sizes = [256, 32], strides = [1, 1]} : vector<256x128xbf16> to vector<256x32xbf16>
    %63 = vector.extract_strided_slice %12 {offsets = [0, 96], sizes = [256, 32], strides = [1, 1]} : vector<256x128xbf16> to vector<256x32xbf16>
    %cst_27 = arith.constant dense<0.000000e+00> : vector<128x256xf32>
    %64 = tpu.matmul %61, %62, %cst_27 {dimension_numbers = #tpu.dot_dimension_numbers<[1], [1], [0], [0], [0, 0, 1, 0], [], []>} : vector<128x32xbf16>, vector<256x32xbf16>, vector<128x256xf32> -> vector<128x256xf32>
    %cst_28 = arith.constant dense<0xFF800000> : vector<128xf32>
    %65 = vector.multi_reduction <maximumf>, %64, %cst_28 [1] : vector<128x256xf32> to vector<128xf32>
    %66 = vector.shape_cast %65 : vector<128xf32> to vector<128x1xf32>
    %67 = vector.broadcast %66 : vector<128x1xf32> to vector<128x256xf32>
    %68 = arith.subf %64, %67 : vector<128x256xf32>
    %69 = math.exp %68 : vector<128x256xf32>
    %cst_29 = arith.constant dense<0.000000e+00> : vector<128xf32>
    %70 = vector.multi_reduction <add>, %69, %cst_29 [1] : vector<128x256xf32> to vector<128xf32>
    %71 = vector.shape_cast %70 : vector<128xf32> to vector<128x1xf32>
    %72 = arith.truncf %69 : vector<128x256xf32> to vector<128x256xbf16>
    %cst_30 = arith.constant dense<0.000000e+00> : vector<128x32xf32>
    %73 = tpu.matmul %72, %63, %cst_30 {dimension_numbers = #tpu.dot_dimension_numbers<[1], [0], [0], [1], [0, 0, 1, 1], [], []>} : vector<128x256xbf16>, vector<256x32xbf16>, vector<128x32xf32> -> vector<128x32xf32>
    %74 = vector.broadcast %71 : vector<128x1xf32> to vector<128x32xf32>
    %75 = arith.divf %73, %74 : vector<128x32xf32>
    %c0_31 = arith.constant 0 : index
    %c96 = arith.constant 96 : index
    %76 = vector.load %arg16[%c0_31, %c96] : memref<128x128xf32, #tpu.memory_space<vmem>>, vector<128x32xf32>
    tpu.vector_store %arg16[%c0_31, %c96], %75 {strides = array<i32>} : memref<128x128xf32, #tpu.memory_space<vmem>>, vector<128x32xf32>,
    %c0_32 = arith.constant 0 : index
    %c0_33 = arith.constant 0 : index
    %77 = vector.load %arg16[%c0_32, %c0_33] : memref<128x128xf32, #tpu.memory_space<vmem>>, vector<128x128xf32>
    %78 = arith.truncf %77 : vector<128x128xf32> to vector<128x128xbf16>
    %c0_34 = arith.constant 0 : index
    %c0_35 = arith.constant 0 : index
    %79 = vector.load %arg11[%c0_34, %c0_35] : memref<128x128xbf16, #tpu.memory_space<vmem>>, vector<128x128xbf16>
    %cst_36 = arith.constant dense<0.000000e+00> : vector<128x128xf32>
    %80 = tpu.matmul %78, %79, %cst_36 {dimension_numbers = #tpu.dot_dimension_numbers<[1], [0], [0], [1], [0, 0, 1, 1], [], []>} : vector<128x128xbf16>, vector<128x128xbf16>, vector<128x128xf32> -> vector<128x128xf32>
    %c0_37 = arith.constant 0 : index
    %c0_38 = arith.constant 0 : index
    %81 = vector.load %arg12[%c0_37, %c0_38] : memref<1x128xf32, #tpu.memory_space<vmem>>, vector<1x128xf32>
    %82 = vector.broadcast %81 : vector<1x128xf32> to vector<128x128xf32>
    %83 = arith.addf %80, %82 : vector<128x128xf32>
    %c0_39 = arith.constant 0 : index
    %c0_40 = arith.constant 0 : index
    %c0_41 = arith.constant 0 : index
    %84 = vector.load %arg13[%c0_39, %c0_40, %c0_41] : memref<1x128x128xf32, #tpu.memory_space<vmem>>, vector<1x128x128xf32>
    %85 = vector.shape_cast %84 : vector<1x128x128xf32> to vector<128x128xf32>
    %86 = vector.shape_cast %83 : vector<128x128xf32> to vector<1x128x128xf32>
    tpu.vector_store %arg13[%c0_39, %c0_40, %c0_41], %86 {strides = array<i32>} : memref<1x128x128xf32, #tpu.memory_space<vmem>>, vector<1x128x128xf32>,
    return
  }
  func.func @transform_0(%arg0: i32, %arg1: i32) -> (i32, i32, i32) {
    %c0_i32 = arith.constant 0 : i32
    %c0_i32_0 = arith.constant 0 : i32
    return %arg0, %arg1, %c0_i32 : i32, i32, i32
  }
  func.func @transform_1(%arg0: i32, %arg1: i32) -> (i32, i32, i32) {
    %c0_i32 = arith.constant 0 : i32
    %c0_i32_0 = arith.constant 0 : i32
    %c0_i32_1 = arith.constant 0 : i32
    return %arg0, %c0_i32, %c0_i32_0 : i32, i32, i32
  }
  func.func @transform_2(%arg0: i32, %arg1: i32) -> (i32, i32, i32) {
    %c0_i32 = arith.constant 0 : i32
    %c0_i32_0 = arith.constant 0 : i32
    %c0_i32_1 = arith.constant 0 : i32
    return %arg0, %c0_i32, %c0_i32_0 : i32, i32, i32
  }
  func.func @transform_3(%arg0: i32, %arg1: i32) -> (i32, i32) {
    %c0_i32 = arith.constant 0 : i32
    %c0_i32_0 = arith.constant 0 : i32
    %c0_i32_1 = arith.constant 0 : i32
    return %c0_i32, %c0_i32_0 : i32, i32
  }
  func.func @transform_4(%arg0: i32, %arg1: i32) -> (i32, i32) {
    %c0_i32 = arith.constant 0 : i32
    %c0_i32_0 = arith.constant 0 : i32
    %c0_i32_1 = arith.constant 0 : i32
    return %c0_i32, %c0_i32_0 : i32, i32
  }
  func.func @transform_5(%arg0: i32, %arg1: i32) -> (i32, i32) {
    %c0_i32 = arith.constant 0 : i32
    %c0_i32_0 = arith.constant 0 : i32
    %c0_i32_1 = arith.constant 0 : i32
    return %c0_i32, %c0_i32_0 : i32, i32
  }
  func.func @transform_6(%arg0: i32, %arg1: i32) -> (i32, i32) {
    %c0_i32 = arith.constant 0 : i32
    %c0_i32_0 = arith.constant 0 : i32
    %c0_i32_1 = arith.constant 0 : i32
    return %c0_i32, %c0_i32_0 : i32, i32
  }
  func.func @transform_7(%arg0: i32, %arg1: i32) -> (i32, i32) {
    %c0_i32 = arith.constant 0 : i32
    %c0_i32_0 = arith.constant 0 : i32
    %c0_i32_1 = arith.constant 0 : i32
    return %c0_i32, %c0_i32_0 : i32, i32
  }
  func.func @transform_8(%arg0: i32, %arg1: i32) -> (i32, i32) {
    %c0_i32 = arith.constant 0 : i32
    %c0_i32_0 = arith.constant 0 : i32
    %c0_i32_1 = arith.constant 0 : i32
    return %c0_i32, %c0_i32_0 : i32, i32
  }
  func.func @transform_9(%arg0: i32, %arg1: i32) -> (i32, i32) {
    %c0_i32 = arith.constant 0 : i32
    %c0_i32_0 = arith.constant 0 : i32
    %c0_i32_1 = arith.constant 0 : i32
    return %c0_i32, %c0_i32_0 : i32, i32
  }
  func.func @transform_10(%arg0: i32, %arg1: i32) -> (i32, i32) {
    %c0_i32 = arith.constant 0 : i32
    %c0_i32_0 = arith.constant 0 : i32
    %c0_i32_1 = arith.constant 0 : i32
    return %c0_i32, %c0_i32_0 : i32, i32
  }
  func.func @transform_11(%arg0: i32, %arg1: i32) -> (i32, i32, i32) {
    %c0_i32 = arith.constant 0 : i32
    %c0_i32_0 = arith.constant 0 : i32
    return %arg0, %arg1, %c0_i32 : i32, i32, i32
  }
}

</mosaic_0001>

<bundles_post_ra>
// kernel: tpu_custom_call.1
= control target key start
LH: loop header
LB: loop body
LE: loop exit
PB: predicated region body
PF: predicated region fallthrough
CT: control target
= control target key end

     0   :  { %s8898_s0 = inlined_call_operand.hbm [shape: bf16[2,256,128], index: 0, kind: input, shape index: {}]   ;;  %s8899_s1 = inlined_call_operand.hbm [shape: bf16[2,256,128], index: 1, kind: input, shape index: {}]   ;;  %s8900_s2 = inlined_call_operand.hbm [shape: bf16[2,256,128], index: 2, kind: input, shape index: {}]   ;;  %s8901_s3 = inlined_call_operand.hbm [shape: bf16[128,128], index: 3, kind: input, shape index: {}]   ;;  %s8902_s4 = inlined_call_operand.vmem [shape: f32[1,128], index: 4, kind: input, shape index: {}]   ;;  %s8903_s5 = inlined_call_operand.hbm [shape: bf16[128,128], index: 5, kind: input, shape index: {}]   ;;  %s8904_s6 = inlined_call_operand.vmem [shape: f32[1,128], index: 6, kind: input, shape index: {}]   ;;  %s8905_s7 = inlined_call_operand.hbm [shape: bf16[128,128], index: 7, kind: input, shape index: {}]   ;;  %s8906_s8 = inlined_call_operand.vmem [shape: f32[1,128], index: 8, kind: input, shape index: {}]   ;;  %s8907_s9 = inlined_call_operand.hbm [shape: bf16[128,128], index: 9, kind: input, shape index: {}]   ;;  %s8908_s10 = inlined_call_operand.vmem [shape: f32[1,128], index: 10, kind: input, shape index: {}]   ;;  %s8909_s11 = inlined_call_operand.hbm [shape: f32[2,256,128], index: 11, kind: output, shape index: {}]  }
   0x1   :  { %9027 = sst [smem:[#allocation121_spill]] %s8898_s0 }
   0x2   :  { %9028 = sst [smem:[#allocation122_spill]] %s8899_s1 }
   0x3   :  { %9029 = sst [smem:[#allocation123_spill]] %s8901_s3 }
   0x4   :  { %9030 = sst [smem:[#allocation124_spill]] %s8902_s4 }
   0x5   :  { %9031 = sst [smem:[#allocation125_spill]] %s8903_s5 }
   0x6   :  { %9032 = sst [smem:[#allocation126_spill]] %s8904_s6 }
   0x7   :  { %9033 = sst [smem:[#allocation127_spill]] %s8905_s7 }
   0x8   :  { %9034 = sst [smem:[#allocation128_spill]] %s8906_s8 }
   0x9   :  { %9035 = sst [smem:[#allocation129_spill]] %s8907_s9 }
   0xa   :  { %9036 = sst [smem:[#allocation130_spill]] %s8908_s10 }
   0xb   :  { %9037 = sst [smem:[#allocation131_spill]] %s8909_s11 }
   0xc   :  { %16 = vsyncpa [#allocation6], 0 }
   0xd   :  { %18 = vsyncpa [#allocation6 + $0x1], 0 }
   0xe   :  { %19 = vsyncpa [#allocation9], 0 }
   0xf   :  { %21 = vsyncpa [#allocation9 + $0x1], 0 }
  0x10   :  { %22 = vsyncpa [#allocation12], 0 }
  0x11   :  { %23 = vsyncpa [#allocation15], 0 }
  0x12   :  { %24 = vsyncpa [#allocation7], 0 }
  0x13   :  { %26 = vsyncpa [#allocation7 + $0x1], 0  ;;  %s6541_s17 = smov 0   ;;  %s6543_s18 = smov 0  }
  0x14   :  { %s6545_s19 = smov 0   ;;  %s6547_s20 = smov 0  }
  0x15   :  { %s6549_s21 = smov 0   ;;  %s6551_s22 = smov 0  }
  0x16   :  { %s6553_s23 = smov 0   ;;  %s6555_s24 = smov 0  }
  0x17   :  { %s6557_s25 = smov 0   ;;  %s6559_s26 = smov 0  }
  0x18   :  { %s6561_s27 = smov 0  }
  0x19 LB: > { %9038 = sst [smem:[#allocation23_spill]] %s6428_s18  ;;  %s6597_s28 = sadd.s32 4294967295, %s6464_s27   ;;  %s6464_s27 = sphi %s6561_s27, %s32_s27   ;;  %s6460_s26 = sphi %s6559_s26, %s9341_s26   ;;  %s6456_s25 = sphi %s6557_s25, %s9340_s25   ;;  %s6452_s24 = sphi %s6555_s24, %s9339_s24   ;;  %s6448_s23 = sphi %s6553_s23, %s9338_s23   ;;  %s6444_s22 = sphi %s6551_s22, %s9337_s22   ;;  %s6440_s21 = sphi %s6549_s21, %s9336_s21   ;;  %s6436_s20 = sphi %s6547_s20, %s9335_s20   ;;  %s6432_s19 = sphi %s6545_s19, %s9334_s19   ;;  %s6428_s18 = sphi %s6543_s18, %s9333_s18   ;;  %s6424_s17 = sphi %s6541_s17, %s9329_s17  }
  0x1a   : > { %9039 = sst [smem:[#allocation24_spill]] %s6432_s19  ;;  %p4694_p0 = scmp.ge.s32.totalorder %s6464_s27, 1 }
  0x1b   : > { %9040 = sst [smem:[#allocation25_spill]] %s6436_s20  ;;  %p8911_p1 = scmp.eq.s32.totalorder %s6597_s28, 0 }
  0x1c   : > { %9041 = sst [smem:[#allocation26_spill]] %s6448_s23  ;;  %p325_p2 = scmp.lt.s32.totalorder %s6464_s27, 5 }
  0x1d   : > { %9042 = sst [smem:[#allocation27_spill]] %s6452_s24  ;;  %s6466_s30 = smov [#allocation11]  }
  0x1e   : > { %p6602_p3 = pnand %p4694_p0, %p325_p2  ;;  %s337_s12 = sshll.u32 %s6466_s30, 4  ;;  %s338_s12 = int_to_ptr.vmem [resolvable:$true] %s337_s12 }
  0x1f   : > { %s6467_s14 = smov [#allocation14]   ;;  %s9046_s3 = sld [smem:[#allocation123_spill]] }
  0x20   : > { %s9043_s29 = scalar_select %p6602_p3, 1, 0 }
  0x21   : > { %p5532_p4 = pneg %p6602_p3  ;;  %s369_s15 = sshll.u32 %s6467_s14, 4  ;;  %s6614_s15 = int_to_ptr.vmem [resolvable:$true] %s369_s15 }
  0x22   : > { %9044 = sst [smem:[#allocation28_spill]] %s9043_s29 }
  0x23   : > { %p6610_p5 = pnand %p5532_p4, %p8911_p1 }
  0x25   : > { %s9045_s13 = scalar_select %p6610_p5, 1, 0 }
  0x26   : > { %s6128_s24 = scalar_lea.hbm %s9046_s3, 1024  ;;  %p6624_p7 = pneg %p6610_p5 }
  0x27   : > { %p6129_p6 = scmp.ne.s32.totalorder %s9046_s3, %s6128_s24  ;;  %p6135_p10 = scmp.lt.u32.totalorder %s6128_s24, %s9046_s3 }
  0x29   : > { %p6131_p8 = pnand %p6624_p7, %p6129_p6 }
  0x2b   : > { %p6132_p9 = pneg %p6131_p8 }
  0x2d   : > { %p6137_p11 = pnand %p6135_p10, %p6132_p9 }
  0x2f   : > { %6140 = shalt.err (!%p6137_p11)
}
  0x30   : > { %s6141_s11 = scalar_lea.vmem %s338_s12, 1024  ;;  %p6149_p2 = scmp.lt.s32.totalorder %s338_s12, %s338_s12 }
  0x31   : > { %p6142_p12 = scmp.ne.s32.totalorder %s338_s12, %s6141_s11  ;;  %p6150_p4 = scmp.lt.s32.totalorder %s6141_s11, %s6141_s11 }
  0x33   : > { %p6144_p13 = pnand %p6142_p12, %p6624_p7  ;;  %p6151_p1 = por %p6150_p4, %p6149_p2 }
  0x35   : > { %p6145_p0 = pneg %p6144_p13 }
  0x37   : > { %p6152_p3 = pnand %p6151_p1, %p6145_p0 }
  0x39   : > { %6155 = shalt.err (!%p6152_p3)
}
  0x3a   : > { %s8916_s4 = smov 64   ;;  %s8918_s10 = smov 4  }
  0x3b   : > { %5535 = dma.hbm_to_vmem [thread:$0]  (!%p6610_p5), %s9046_s3, 1024, %s338_s12, [#allocation12], %s8916_s4, %s8916_s4, %s8918_s10  }
  0x3c   : > { %s9048_s7 = sld [smem:[#allocation127_spill]] }
  0x42   : > { %s6156_s6 = scalar_lea.hbm %s9048_s7, 1024 }
  0x43   : > { %p6157_p1 = scmp.ne.s32.totalorder %s9048_s7, %s6156_s6  ;;  %p6163_p8 = scmp.lt.u32.totalorder %s6156_s6, %s9048_s7 }
  0x45   : > { %p6159_p3 = pnand %p6157_p1, %p6624_p7 }
  0x47   : > { %p6160_p6 = pneg %p6159_p3 }
  0x49   : > { %p6165_p9 = pnand %p6163_p8, %p6160_p6 }
  0x4b   : > { %6168 = shalt.err (!%p6165_p9)
}
  0x4c   : > { %s6169_s12 = scalar_lea.vmem %s6614_s15, 1024  ;;  %p6177_p13 = scmp.lt.s32.totalorder %s6614_s15, %s6614_s15 }
  0x4d   : > { %p6170_p10 = scmp.ne.s32.totalorder %s6614_s15, %s6169_s12  ;;  %p6178_p0 = scmp.lt.s32.totalorder %s6169_s12, %s6169_s12 }
  0x4f   : > { %p6172_p11 = pnand %p6170_p10, %p6624_p7  ;;  %p6179_p2 = por %p6178_p0, %p6177_p13 }
  0x51   : > { %p6173_p12 = pneg %p6172_p11 }
  0x53   : > { %p6180_p4 = pnand %p6179_p2, %p6173_p12 }
  0x55   : > { %6183 = shalt.err (!%p6180_p4)
}
  0x56   : > { %5541 = dma.hbm_to_vmem [thread:$0]  (!%p6610_p5), %s9048_s7, 1024, %s6614_s15, [#allocation15], %s8916_s4, %s8916_s4, %s8918_s10  }
  0x57   : > { %p8921_p3 = scmp.eq.s32.totalorder %s6464_s27, 0  ;;  %p86_p6 = scmp.ne.s32.totalorder %s6432_s19, %s6428_s18 }
  0x58   : > { %p92_p8 = scmp.ne.s32.totalorder %s6428_s18, %s6424_s17  ;;  %p8920_p9 = scmp.lt.s32.totalorder %s6464_s27, 4 }
  0x59   : > { %s425_s29 = sand.u32 1, %s6464_s27   ;;  %p88_p10 = por %p86_p6, %p8921_p3 }
  0x5a   : > { %p9049_p11 = scmp.eq.s32.totalorder %s6597_s28, 0  ;;  %s427_s24 = sand.u32 1, %s6432_s19  }
  0x5b   : > { %s6687_s16 = sshll.u32 %s427_s24, 7  ;;  %s8915_s15 = sshll.u32 %s6460_s26, 11 }
  0x5c   : > { %p6682_p12 = por %p92_p8, %p9049_p11  ;;  %s9052_s1 = sld [smem:[#allocation122_spill]] }
  0x5d   : > { %s429_s17 = scalar_lea.vmem [#allocation8], %s6687_s16  ;;  %p6700_p13 = pnand %p8920_p9, %p88_p10 }
  0x5e   : > { %s9050_s8 = scalar_select %p6682_p12, 1, 0 }
  0x5f   : > { %s436_s0 = sshll.u32 %s429_s17, 4  ;;  %s6707_s23 = scalar_lea.sflag [#allocation9], %s425_s29  ;;  %s6705_s0 = int_to_ptr.vmem [resolvable:$true] %s436_s0 }
  0x60   : > { %9051 = sst [smem:[#allocation29_spill]] %s9050_s8  ;;  %p8932_p2 = pneg %p6700_p13 }
  0x61   : > { %s9053_s6 = scalar_select %p6700_p13, 1, 0 }
  0x62   : > { %s6695_s12 = scalar_lea.hbm %s9052_s1, %s8915_s15  ;;  %s6189_s15 = scalar_lea.hbm %s9052_s1, 4096 }
  0x63   : > { %9054 = sst [smem:[#allocation30_spill]] %s9053_s6  ;;  %s6184_s14 = scalar_lea.hbm %s6695_s12, 2048 }
  0x64   : > { %p6185_p0 = scmp.ne.s32.totalorder %s6695_s12, %s6184_s14  ;;  %p6190_p8 = scmp.lt.u32.totalorder %s6695_s12, %s9052_s1 }
  0x65   : > { %p6191_p10 = scmp.lt.u32.totalorder %s6189_s15, %s6184_s14  ;;  %p6193_p9 = scmp.lt.u32.totalorder %s6184_s14, %s6695_s12 }
  0x66   : > { %p6187_p4 = pnand %p8932_p2, %p6185_p0 }
  0x67   : > { %p6192_p11 = por %p6191_p10, %p6190_p8 }
  0x68   : > { %p6188_p6 = pneg %p6187_p4 }
  0x69   : > { %p6194_p1 = por %p6193_p9, %p6192_p11 }
  0x6b   : > { %p6195_p3 = pnand %p6194_p1, %p6188_p6 }
  0x6d   : > { %6198 = shalt.err (!%p6195_p3)
}
  0x6e   : > { %s6199_s29 = scalar_lea.vmem %s6705_s0, 2048  ;;  %s6470_s11 = smov [#allocation8]  }
  0x6f   : > { %p6200_p0 = scmp.ne.s32.totalorder %s6705_s0, %s6199_s29  ;;  %s6204_s17 = sshll.u32 %s6470_s11, 4  ;;  %s6205_s17 = int_to_ptr.vmem [resolvable:$false] %s6204_s17 }
  0x70   : > { %s6206_s4 = scalar_lea.vmem %s6205_s17, 4096  ;;  %p6207_p5 = scmp.lt.s32.totalorder %s6705_s0, %s6205_s17 }
  0x71   : > { %p6202_p4 = pnand %p6200_p0, %p8932_p2  ;;  %p6208_p8 = scmp.lt.s32.totalorder %s6206_s4, %s6199_s29 }
  0x73   : > { %p6203_p12 = pneg %p6202_p4  ;;  %p6209_p10 = por %p6208_p8, %p6207_p5 }
  0x75   : > { %p6210_p9 = pnand %p6209_p10, %p6203_p12 }
  0x77   : > { %6213 = shalt.err (!%p6210_p9)
}
  0x78   : > { %s9055_s10 = smov 4   ;;  %s9056_s15 = smov 64  }
  0x79   : > { %5551 = dma.hbm_to_vmem [thread:$0]  (!%p6700_p13), %s6695_s12, 2048, %s6705_s0, %s6707_s23, %s9056_s15, %s9056_s15, %s9055_s10  }
  0x7a   : > { %s9057_s14 = sshll.u32 %s6460_s26, 11  ;;  %s450_s17 = scalar_lea.vmem [#allocation10], %s6687_s16 }
  0x7b   : > { %s6743_s29 = scalar_lea.hbm %s8900_s2, %s9057_s14  ;;  %s6746_s4 = sshll.u32 %s450_s17, 4  ;;  %s6852_s4 = int_to_ptr.vmem [resolvable:$true] %s6746_s4 }
  0x7c   : > { %s6471_s1 = smov [#allocation13]   ;;  %s9058_s5 = sld [smem:[#allocation125_spill]] }
  0x7d   : > { %s353_s3 = sshll.u32 %s6471_s1, 4  ;;  %s354_s3 = int_to_ptr.vmem [resolvable:$true] %s353_s3 }
  0x82   : > { %s6214_s18 = scalar_lea.hbm %s9058_s5, 1024 }
  0x83   : > { %p6215_p5 = scmp.ne.s32.totalorder %s9058_s5, %s6214_s18  ;;  %p6221_p12 = scmp.lt.u32.totalorder %s6214_s18, %s9058_s5 }
  0x85   : > { %p6217_p1 = pnand %p6215_p5, %p6624_p7 }
  0x87   : > { %p6218_p3 = pneg %p6217_p1 }
  0x89   : > { %p6223_p6 = pnand %p6221_p12, %p6218_p3 }
  0x8b   : > { %6226 = shalt.err (!%p6223_p6)
}
  0x8c   : > { %s6227_s16 = scalar_lea.vmem %s354_s3, 1024  ;;  %p6235_p8 = scmp.lt.s32.totalorder %s354_s3, %s354_s3 }
  0x8d   : > { %p6228_p11 = scmp.ne.s32.totalorder %s354_s3, %s6227_s16  ;;  %p6236_p10 = scmp.lt.s32.totalorder %s6227_s16, %s6227_s16 }
  0x8f   : > { %p6230_p0 = pnand %p6228_p11, %p6624_p7  ;;  %p6237_p9 = por %p6236_p10, %p6235_p8 }
  0x91   : > { %p6231_p4 = pneg %p6230_p0 }
  0x93   : > { %p6238_p2 = pnand %p6237_p9, %p6231_p4 }
  0x95   : > { %6241 = shalt.err (!%p6238_p2)
}
  0x96   : > { %p9059_p5 = scmp.ne.s32.totalorder %s9045_s13, 0  ;;  %s6472_s18 = smov [#allocation16]  }
  0x97   : > { %s385_s19 = sshll.u32 %s6472_s18, 4  ;;  %s9060_s9 = sld [smem:[#allocation129_spill]]  ;;  %s386_s19 = int_to_ptr.vmem [resolvable:$true] %s385_s19 }
  0x98   : > { %5538 = dma.hbm_to_vmem [thread:$0]  (!%p9059_p5), %s9058_s5, 1024, %s354_s3, [#allocation12], %s9056_s15, %s9056_s15, %s9055_s10  }
  0x9d   : > { %s6242_s24 = scalar_lea.hbm %s9060_s9, 1024 }
  0x9e   : > { %p6243_p2 = scmp.ne.s32.totalorder %s9060_s9, %s6242_s24  ;;  %p6249_p12 = scmp.lt.u32.totalorder %s6242_s24, %s9060_s9 }
  0xa0   : > { %p6245_p1 = pnand %p6243_p2, %p6624_p7 }
  0xa2   : > { %p6246_p3 = pneg %p6245_p1 }
  0xa4   : > { %p6251_p6 = pnand %p6249_p12, %p6246_p3 }
  0xa6   : > { %6254 = shalt.err (!%p6251_p6)
}
  0xa7   : > { %s6255_s3 = scalar_lea.vmem %s386_s19, 1024  ;;  %p6263_p8 = scmp.lt.s32.totalorder %s386_s19, %s386_s19 }
  0xa8   : > { %p6256_p11 = scmp.ne.s32.totalorder %s386_s19, %s6255_s3  ;;  %p6264_p10 = scmp.lt.s32.totalorder %s6255_s3, %s6255_s3 }
  0xaa   : > { %p6258_p0 = pnand %p6256_p11, %p6624_p7  ;;  %p6265_p9 = por %p6264_p10, %p6263_p8 }
  0xac   : > { %p6259_p4 = pneg %p6258_p0 }
  0xae   : > { %p6266_p13 = pnand %p6265_p9, %p6259_p4 }
  0xb0   : > { %6269 = shalt.err (!%p6266_p13)
}
  0xb1   : > { %5544 = dma.hbm_to_vmem [thread:$0]  (!%p9059_p5), %s9060_s9, 1024, %s386_s19, [#allocation15], %s9056_s15, %s9056_s15, %s9055_s10  }
  0xb2   : > { %s4693_s13 = sadd.s32 4294967294, %s6464_s27   ;;  %s41_s30 = sadd.s32 1, %s6456_s25 }
  0xb3   : > { %p42_p7 = scmp.ge.s32.totalorder %s41_s30, 2  ;;  %s53_s1 = sadd.s32 1, %s6444_s22 }
  0xb4   : > { %p60_p13 = scmp.ne.s32.totalorder %s6444_s22, %s6440_s21  ;;  %p66_p2 = scmp.ne.s32.totalorder %s6440_s21, %s6436_s20 }
  0xb5   : > { %s9343_s30 = smov (%p42_p7, %s41_s30), 0  ;;  %s9062_s7 = sadd.s32 1, %s6460_s26 }
  0xb6   : > { %9061 = sst [smem:[#allocation31_spill]] %s9343_s30  ;;  %s9063_s18 = sld [smem:[#allocation24_spill]] }
  0xb7   : > { %s9345_s7 = smov (!%p42_p7, %s9062_s7), %s6460_s26  ;;  %s49_s8 = ssub.s32 %s6456_s25, %s9343_s30 }
  0xb8   : > { %p9064_p1 = scmp.eq.s32.totalorder %s6464_s27, 0  ;;  %p46_p3 = scmp.ge.s32.totalorder %s9345_s7, 2 }
  0xb9   : > { %p9066_p12 = scmp.eq.s32.totalorder %s6597_s28, 0  ;;  %p9068_p11 = scmp.eq.s32.totalorder %s6597_s28, 3 }
  0xba   : > { %p6806_p5 = por %p9064_p1, %p60_p13  ;;  %p318_p4 = scmp.eq.s32.totalorder %s4693_s13, 3 }
  0xbb   : > { %p6812_p6 = por %p9066_p12, %p66_p2  ;;  %p6818_p0 = por %p9068_p11, %p60_p13 }
  0xbc   : > { %s9347_s7 = smov (%p46_p3, %s9345_s7), 0  ;;  %p6824_p8 = por %p318_p4, %p66_p2 }
  0xbd   : > { %s9069_s24 = scalar_select %p6818_p0, 1, 0 }
  0xbe   : > { %s9070_s14 = scalar_select %p6824_p8, 1, 0 }
  0xbf   : > { %s402_s11 = sand.u32 1, %s6444_s22   ;;  %s48_s17 = ssub.s32 %s6460_s26, %s9347_s7 }
  0xc0   : > { %9071 = sst [smem:[#allocation32_spill]] %s9070_s14  ;;  %s50_s12 = sor.u32 %s49_s8, %s48_s17 }
  0xc1   : > { %p77_p10 = scmp.eq.s32.totalorder %s48_s17, 0  ;;  %p51_p9 = scmp.eq.s32.totalorder %s50_s12, 0 }
  0xc2   : > { %s4700_s3 = sshll.u32 %s402_s11, 6  ;;  %s9072_s0 = sadd.s32 1, %s9063_s18 }
  0xc3   : > { %s9349_s18 = smov (!%p77_p10, %s9063_s18), %s9072_s0  ;;  %s4701_s13 = sshll.u32 %s6456_s25, 4 }
  0xc4   : > { %s6837_s16 = scalar_select %p51_p9, %s6444_s22, %s53_s1  }
  0xc5   : > { %s4702_s5 = sshll.u32 %s6460_s26, 5  ;;  %s406_s9 = scalar_lea.vmem [#allocation5], %s4700_s3 }
  0xc6   : > { %s415_s30 = sshll.u32 %s406_s9, 4  ;;  %s412_s20 = sadd.s32 %s4702_s5, %s4701_s13  ;;  %s6841_s30 = int_to_ptr.vmem [resolvable:$true] %s415_s30 }
  0xc7   : > { %s4703_s14 = sshll.u32 %s412_s20, 6  ;;  %p9073_p7 = scmp.lt.s32.totalorder %s6464_s27, 4 }
  0xc8   : > { %s9075_s12 = sld [smem:[#allocation121_spill]]  ;;  %s6859_s5 = scalar_lea.sflag [#allocation6], %s402_s11 }
  0xc9   : > { %p6847_p13 = pnand %p9073_p7, %p6806_p5 }
  0xcb   : > { %p6272_p1 = pneg %p6847_p13 }
  0xce   : > { %s6857_s0 = scalar_lea.hbm %s9075_s12, %s4703_s14  ;;  %s6275_s3 = scalar_lea.hbm %s9075_s12, 4096 }
  0xcf   : > { %s6270_s9 = scalar_lea.hbm %s6857_s0, 1024  ;;  %p6276_p12 = scmp.lt.u32.totalorder %s6857_s0, %s9075_s12 }
  0xd0   : > { %p6271_p2 = scmp.ne.s32.totalorder %s6857_s0, %s6270_s9  ;;  %p6277_p11 = scmp.lt.u32.totalorder %s6275_s3, %s6270_s9 }
  0xd1   : > { %p6279_p10 = scmp.lt.u32.totalorder %s6270_s9, %s6857_s0 }
  0xd2   : > { %p6273_p5 = pnand %p6272_p1, %p6271_p2  ;;  %p6278_p4 = por %p6277_p11, %p6276_p12 }
  0xd4   : > { %p6274_p3 = pneg %p6273_p5  ;;  %p6280_p9 = por %p6279_p10, %p6278_p4 }
  0xd6   : > { %p6281_p7 = pnand %p6280_p9, %p6274_p3 }
  0xd8   : > { %6284 = shalt.err (!%p6281_p7)
}
  0xd9   : > { %s6285_s11 = scalar_lea.vmem %s6841_s30, 1024  ;;  %s6473_s1 = smov [#allocation5]  }
  0xda   : > { %p6286_p2 = scmp.ne.s32.totalorder %s6841_s30, %s6285_s11  ;;  %s6290_s17 = sshll.u32 %s6473_s1, 4  ;;  %s6291_s17 = int_to_ptr.vmem [resolvable:$false] %s6290_s17 }
  0xdb   : > { %s6292_s20 = scalar_lea.vmem %s6291_s17, 2048  ;;  %p6293_p0 = scmp.lt.s32.totalorder %s6841_s30, %s6291_s17 }
  0xdc   : > { %p6288_p5 = pnand %p6286_p2, %p6272_p1  ;;  %p6294_p12 = scmp.lt.s32.totalorder %s6292_s20, %s6285_s11 }
  0xde   : > { %p6289_p8 = pneg %p6288_p5  ;;  %p6295_p11 = por %p6294_p12, %p6293_p0 }
  0xe0   : > { %p6296_p4 = pnand %p6295_p11, %p6289_p8 }
  0xe2   : > { %6299 = shalt.err (!%p6296_p4)
}
  0xe3   : > { %s9076_s9 = sld [smem:[#allocation30_spill]]  ;;  %s6300_s19 = scalar_lea.hbm %s6743_s29, 2048 }
  0xe4   : > { %5548 = dma.hbm_to_vmem [thread:$0]  (!%p6847_p13), %s6857_s0, 1024, %s6841_s30, %s6859_s5, %s9056_s15, %s9056_s15, %s9055_s10  }
  0xe5   : > { %p6301_p1 = scmp.ne.s32.totalorder %s6743_s29, %s6300_s19  ;;  %s6305_s14 = scalar_lea.hbm %s8900_s2, 4096 }
  0xe6   : > { %p6306_p9 = scmp.lt.u32.totalorder %s6743_s29, %s8900_s2  ;;  %p6307_p7 = scmp.lt.u32.totalorder %s6305_s14, %s6300_s19 }
  0xe7   : > { %p6309_p5 = scmp.lt.u32.totalorder %s6300_s19, %s6743_s29 }
  0xe8   : > { %p6308_p2 = por %p6307_p7, %p6306_p9 }
  0xe9   : > { %p9077_p3 = scmp.ne.s32.totalorder %s9076_s9, 0 }
  0xea   : > { %p6310_p12 = por %p6309_p5, %p6308_p2 }
  0xeb   : > { %p9078_p0 = pneg %p9077_p3 }
  0xed   : > { %p6303_p8 = pnand %p6301_p1, %p9078_p0 }
  0xef   : > { %p6304_p10 = pneg %p6303_p8 }
  0xf1   : > { %p6311_p11 = pnand %p6310_p12, %p6304_p10 }
  0xf3   : > { %6314 = shalt.err (!%p6311_p11)
}
  0xf4   : > { %s6315_s30 = scalar_lea.vmem %s6852_s4, 2048  ;;  %p9079_p4 = pmov %p9078_p0 }
  0xf5   : > { %p6316_p13 = scmp.ne.s32.totalorder %s6852_s4, %s6315_s30  ;;  %s6474_s0 = smov [#allocation10]  }
  0xf6   : > { %s6320_s5 = sshll.u32 %s6474_s0, 4  ;;  %s6321_s5 = int_to_ptr.vmem [resolvable:$false] %s6320_s5 }
  0xf7   : > { %p6318_p1 = pnand %p6316_p13, %p9079_p4  ;;  %s6322_s1 = scalar_lea.vmem %s6321_s5, 4096 }
  0xf8   : > { %p6323_p8 = scmp.lt.s32.totalorder %s6852_s4, %s6321_s5  ;;  %p6324_p9 = scmp.lt.s32.totalorder %s6322_s1, %s6315_s30 }
  0xf9   : > { %p6319_p0 = pneg %p6318_p1 }
  0xfa   : > { %p6325_p7 = por %p6324_p9, %p6323_p8 }
  0xfc   : > { %p6326_p2 = pnand %p6325_p7, %p6319_p0 }
  0xfe   : > { %6329 = shalt.err (!%p6326_p2)
}
  0xff   : > { %5554 = dma.hbm_to_vmem [thread:$0]  (!%p9077_p3), %s6743_s29, 2048, %s6852_s4, %s6707_s23, %s9056_s15, %s9056_s15, %s9055_s10  }
 0x100   : > { %s9080_s17 = sld [smem:[#allocation28_spill]] }
 0x106   : > { %p9081_p10 = scmp.ne.s32.totalorder %s9080_s17, 0 }
 0x108   : > { %469 = sbr.rel (%p9081_p10) target bundleno = 2532 (0x9e4), region = 64 }
 0x10f   : > { %s6920_s20 = sand.u32 1, %s6440_s21  }
 0x110   : > { %s4711_s19 = sshll.u32 %s6920_s20, 6  ;;  %s472_s3 = scalar_lea.sflag [#allocation6], %s6920_s20 }
 0x111   : > { %s6924_s8 = scalar_lea.vmem [#allocation5], %s4711_s19 }
 0x112   : > { %6403 = dma.done.wait (%p6812_p6), %s472_s3, 1024  }
 0x113   : > { %6405 = vsyncadd (%p6812_p6), %s472_s3, 4294966272  ;;  %s9082_s23 = sld [smem:[#allocation23_spill]]  ;;  %s9083_s10 = sld [smem:[#allocation29_spill]] }
 0x114   : > { %s480_s15 = sand.u32 1, %s6597_s28  }
 0x115   : > { %s481_s9 = scalar_lea.sflag [#allocation9], %s480_s15 }
 0x119   : > { %s482_s29 = sand.u32 1, %s9082_s23   ;;  %p9084_p3 = scmp.ne.s32.totalorder %s9083_s10, 0 }
 0x11a   : > { %s4712_s4 = sshll.u32 %s482_s29, 7 }
 0x11b   : > { %s6932_s14 = scalar_lea.vmem [#allocation8], %s4712_s4 }
 0x11c   : > { %6407 = dma.done.wait (%p9084_p3), %s481_s9, 4096  }
 0x11d   : > { %6409 = vsyncadd (%p9084_p3), %s481_s9, 4294963200  ;;  %s6938_s13 = scalar_lea.vmem [#allocation10], %s4712_s4  ;;  %p9085_p5 = scmp.eq.s32.totalorder %s6597_s28, 0 }
 0x11f   : > { %6411 = dma.done.wait (%p9085_p5), [#allocation12], 2048   ;;  %p9086_p6 = pmov %p9085_p5 }
 0x120   : > { %p9087_p12 = pmov %p9085_p5 }
 0x121   : > { %6413 = vsyncadd (%p9086_p6), [#allocation12], 4294965248 }
 0x122   : > { %6415 = dma.done.wait (%p9087_p12), [#allocation15], 2048   ;;  %p9088_p11 = pmov %p9085_p5 }
 0x123   : > { %s4718_s6 = sshll.u32 %s6920_s20, 7  ;;  %s9089_s30 = sld [smem:[#allocation26_spill]] }
 0x124   : > { %6417 = vsyncadd (%p9088_p11), [#allocation15], 4294965248  ;;  %s6949_s11 = scalar_lea.vmem [#allocation17], %s4718_s6 }
 0x129   : > { %p4719_p13 = scmp.ne.s32.totalorder %s9089_s30, 0 }
 0x12a   : > { %v5668_v0 = vld [vmem:[#allocation13] sm:$0xff] (!%p4719_p13)   ;;  %v5670_v2 = vld [vmem:[#allocation13 + $0x8] sm:$0xff] (!%p4719_p13)   ;;  %v5672_v4 = vld [vmem:[#allocation13 + $0x10] sm:$0xff] (!%p4719_p13)   ;;  %s9090_s5 = sld [smem:[#allocation126_spill]] (!%p4719_p13)  ;;  %s9091_s19 = sld [smem:[#allocation128_spill]] (!%p4719_p13) }
 0x12b   : > { %564 = sbr.rel (%p4719_p13) target bundleno = 608 (0x260), region = 96  ;;  %v5669_v1 = vld [vmem:[#allocation14] sm:$0xff] (!%p4719_p13)   ;;  %5300 = vmatprep.subr.bf16.mxu0 (!%p4719_p13), %v5668_v0  ;;  %v5671_v3 = vld [vmem:[#allocation14 + $0x8] sm:$0xff] (!%p4719_p13)   ;;  %v5673_v5 = vld [vmem:[#allocation14 + $0x10] sm:$0xff] (!%p4719_p13)  }
 0x12c   : > { %5348 = vmatprep.subr.bf16.mxu1 (!%p4719_p13), %v5669_v1  ;;  %5301 = vmatpush3.bf16.msra.mxu0 (!%p4719_p13), %v5668_v0  ;;  %v5674_v6 = vld [vmem:[#allocation13 + $0x18] sm:$0xff] (!%p4719_p13)   ;;  %v5676_v8 = vld [vmem:[#allocation13 + $0x20] sm:$0xff] (!%p4719_p13)   ;;  %v5678_v10 = vld [vmem:[#allocation13 + $0x28] sm:$0xff] (!%p4719_p13)  }
 0x12d   : > { %5349 = vmatpush3.bf16.msra.mxu1 (!%p4719_p13), %v5669_v1  ;;  %5302 = vmatprep.subr.bf16.mxu0 (!%p4719_p13), %v5670_v2  ;;  %v5675_v7 = vld [vmem:[#allocation14 + $0x18] sm:$0xff] (!%p4719_p13)   ;;  %v5677_v9 = vld [vmem:[#allocation14 + $0x20] sm:$0xff] (!%p4719_p13)   ;;  %v5679_v11 = vld [vmem:[#allocation14 + $0x28] sm:$0xff] (!%p4719_p13)  }
 0x12e   : > { %5350 = vmatprep.subr.bf16.mxu1 (!%p4719_p13), %v5671_v3  ;;  %v5684_v12 = vld [vmem:[%s6932_s14] sm:$0xff] (!%p4719_p13)   ;;  %v5680_v14 = vld [vmem:[#allocation13 + $0x30] sm:$0xff] (!%p4719_p13)   ;;  %v5682_v16 = vld [vmem:[#allocation13 + $0x38] sm:$0xff] (!%p4719_p13)  }
 0x12f   : > { %v5685_v13 = vld [vmem:[%s6938_s13] sm:$0xff] (!%p4719_p13)   ;;  %5316 = vmatprep.mubr.bf16.mxu0 (!%p4719_p13), %v5684_v12  ;;  %v5681_v15 = vld [vmem:[#allocation14 + $0x30] sm:$0xff] (!%p4719_p13)   ;;  %v5683_v17 = vld [vmem:[#allocation14 + $0x38] sm:$0xff] (!%p4719_p13)  }
 0x130   : > { %5303 = vmatpush3.bf16.msra.mxu0 (!%p4719_p13), %v5670_v2  ;;  %5364 = vmatprep.mubr.bf16.mxu1 (!%p4719_p13), %v5685_v13  ;;  %v5686_v18 = vld [vmem:[%s6932_s14 + $0x8] sm:$0xff] (!%p4719_p13)   ;;  %v5688_v20 = vld [vmem:[%s6932_s14 + $0x10] sm:$0xff] (!%p4719_p13)   ;;  %v5690_v22 = vld [vmem:[%s6932_s14 + $0x18] sm:$0xff] (!%p4719_p13)  }
 0x131   : > { %5351 = vmatpush3.bf16.msra.mxu1 (!%p4719_p13), %v5671_v3  ;;  %5304 = vmatprep.subr.bf16.mxu0 (!%p4719_p13), %v5672_v4  ;;  %v5687_v19 = vld [vmem:[%s6938_s13 + $0x8] sm:$0xff] (!%p4719_p13)   ;;  %v5689_v21 = vld [vmem:[%s6938_s13 + $0x10] sm:$0xff] (!%p4719_p13)   ;;  %v5691_v23 = vld [vmem:[%s6938_s13 + $0x18] sm:$0xff] (!%p4719_p13)  }
 0x132   : > { %5352 = vmatprep.subr.bf16.mxu1 %v5673_v5  ;;  %v5692_v24 = vld [vmem:[%s6932_s14 + $0x20] sm:$0xff]   ;;  %v5694_v26 = vld [vmem:[%s6932_s14 + $0x28] sm:$0xff]   ;;  %v5696_v28 = vld [vmem:[%s6932_s14 + $0x30] sm:$0xff]  }
 0x133   : > { %v5693_v25 = vld [vmem:[%s6938_s13 + $0x20] sm:$0xff]   ;;  %v5695_v27 = vld [vmem:[%s6938_s13 + $0x28] sm:$0xff]   ;;  %v5697_v29 = vld [vmem:[%s6938_s13 + $0x30] sm:$0xff]  }
 0x134   : > { %5305 = vmatpush3.bf16.msra.mxu0 %v5672_v4  ;;  %v5698_v30 = vld [vmem:[%s6932_s14 + $0x38] sm:$0xff]   ;;  %v5700_v32 = vld [vmem:[%s6932_s14 + $0x40] sm:$0xff]   ;;  %v5702_v34 = vld [vmem:[%s6932_s14 + $0x48] sm:$0xff]  }
 0x135   : > { %5353 = vmatpush3.bf16.msra.mxu1 %v5673_v5  ;;  %5306 = vmatprep.subr.bf16.mxu0 %v5674_v6  ;;  %v5699_v31 = vld [vmem:[%s6938_s13 + $0x38] sm:$0xff]   ;;  %v5701_v33 = vld [vmem:[%s6938_s13 + $0x40] sm:$0xff]   ;;  %v5703_v35 = vld [vmem:[%s6938_s13 + $0x48] sm:$0xff]  }
 0x136   : > { %5354 = vmatprep.subr.bf16.mxu1 %v5675_v7  ;;  %v5704_v36 = vld [vmem:[%s6932_s14 + $0x50] sm:$0xff]   ;;  %v5706_v38 = vld [vmem:[%s6932_s14 + $0x58] sm:$0xff]   ;;  %v5708_v40 = vld [vmem:[%s6932_s14 + $0x60] sm:$0xff]  }
 0x137   : > { %v5705_v37 = vld [vmem:[%s6938_s13 + $0x50] sm:$0xff]   ;;  %v5707_v39 = vld [vmem:[%s6938_s13 + $0x58] sm:$0xff]   ;;  %v5709_v41 = vld [vmem:[%s6938_s13 + $0x60] sm:$0xff]  }
 0x138   : > { %5307 = vmatpush3.bf16.msra.mxu0 %v5674_v6  ;;  %v5710_v42 = vld [vmem:[%s6932_s14 + $0x68] sm:$0xff]   ;;  %v5712_v44 = vld [vmem:[%s6932_s14 + $0x70] sm:$0xff]   ;;  %v5714_v46 = vld [vmem:[%s6932_s14 + $0x78] sm:$0xff]  }
 0x139   : > { %5355 = vmatpush3.bf16.msra.mxu1 %v5675_v7  ;;  %5308 = vmatprep.subr.bf16.mxu0 %v5676_v8  ;;  %v5711_v43 = vld [vmem:[%s6938_s13 + $0x68] sm:$0xff]   ;;  %v5713_v45 = vld [vmem:[%s6938_s13 + $0x70] sm:$0xff]   ;;  %v5715_v47 = vld [vmem:[%s6938_s13 + $0x78] sm:$0xff]  }
 0x13a   : > { %5356 = vmatprep.subr.bf16.mxu1 %v5677_v9  ;;  %v6987_v49 = vld [vmem:[%s9090_s5] ss:$0 sm:$0xff] }
 0x13b   : > { %v6992_v51 = vld [vmem:[%s9091_s19] ss:$0 sm:$0xff] }
 0x13c   : > { %5309 = vmatpush3.bf16.msra.mxu0 %v5676_v8 }
 0x13d   : > { %5357 = vmatpush3.bf16.msra.mxu1 %v5677_v9  ;;  %5310 = vmatprep.subr.bf16.mxu0 %v5678_v10 }
 0x13e   : > { %5358 = vmatprep.subr.bf16.mxu1 %v5679_v11 }
 0x140   : > { %5311 = vmatpush3.bf16.msra.mxu0 %v5678_v10 }
 0x141   : > { %5359 = vmatpush3.bf16.msra.mxu1 %v5679_v11  ;;  %5312 = vmatprep.subr.bf16.mxu0 %v5680_v14 }
 0x142   : > { %5360 = vmatprep.subr.bf16.mxu1 %v5681_v15 }
 0x144   : > { %5313 = vmatpush3.bf16.msra.mxu0 %v5680_v14 }
 0x145   : > { %5361 = vmatpush3.bf16.msra.mxu1 %v5681_v15  ;;  %5314 = vmatprep.subr.bf16.mxu0 %v5682_v16 }
 0x146   : > { %5362 = vmatprep.subr.bf16.mxu1 %v5683_v17 }
 0x148   : > { %5315 = vmatpush3.bf16.msra.mxu0 %v5682_v16 }
 0x149   : > { %5363 = vmatpush3.bf16.msra.mxu1 %v5683_v17 }
 0x14b   : > { %5317 = vmatmul.mubr.bf16.vlgmr.msra.gmra.mrb[0].mxu0 %v5686_v18 }
 0x14c   : > { %5365 = vmatmul.mubr.bf16.vlgmr.msra.gmra.mrb[0].mxu1 %v5687_v19  ;;  %5320 = vmatprep.mubr.bf16.mxu0 %v5688_v20 }
 0x14d   : > { %5368 = vmatprep.mubr.bf16.mxu1 %v5689_v21 }
 0x153   : > { %5321 = vmatmul.mubr.bf16.gmra.mrb[4].mxu0 %v5690_v22 }
 0x154   : > { %5369 = vmatmul.mubr.bf16.gmra.mrb[4].mxu1 %v5691_v23  ;;  %5324 = vmatprep.mubr.bf16.mxu0 %v5692_v24 }
 0x155   : > { %5372 = vmatprep.mubr.bf16.mxu1 %v5693_v25 }
 0x15b   : > { %5325 = vmatmul.mubr.bf16.gmra.mrb[8].mxu0 %v5694_v26 }
 0x15c   : > { %5373 = vmatmul.mubr.bf16.gmra.mrb[8].mxu1 %v5695_v27  ;;  %5328 = vmatprep.mubr.bf16.mxu0 %v5696_v28 }
 0x15d   : > { %5376 = vmatprep.mubr.bf16.mxu1 %v5697_v29 }
 0x163   : > { %5329 = vmatmul.mubr.bf16.gmra.mrb[12].mxu0 %v5698_v30 }
 0x164   : > { %5377 = vmatmul.mubr.bf16.gmra.mrb[12].mxu1 %v5699_v31  ;;  %5332 = vmatprep.mubr.bf16.mxu0 %v5700_v32 }
 0x165   : > { %5380 = vmatprep.mubr.bf16.mxu1 %v5701_v33 }
 0x16b   : > { %5333 = vmatmul.mubr.bf16.gmra.mrb[16].mxu0 %v5702_v34 }
 0x16c   : > { %5381 = vmatmul.mubr.bf16.gmra.mrb[16].mxu1 %v5703_v35  ;;  %5336 = vmatprep.mubr.bf16.mxu0 %v5704_v36 }
 0x16d   : > { %5384 = vmatprep.mubr.bf16.mxu1 %v5705_v37 }
 0x173   : > { %5337 = vmatmul.mubr.bf16.gmra.mrb[20].mxu0 %v5706_v38 }
 0x174   : > { %5385 = vmatmul.mubr.bf16.gmra.mrb[20].mxu1 %v5707_v39  ;;  %5340 = vmatprep.mubr.bf16.mxu0 %v5708_v40 }
 0x175   : > { %5388 = vmatprep.mubr.bf16.mxu1 %v5709_v41 }
 0x17b   : > { %5341 = vmatmul.mubr.bf16.gmra.mrb[24].mxu0 %v5710_v42 }
 0x17c   : > { %5389 = vmatmul.mubr.bf16.gmra.mrb[24].mxu1 %v5711_v43  ;;  %5344 = vmatprep.mubr.bf16.mxu0 %v5712_v44 }
 0x17d   : > { %5392 = vmatprep.mubr.bf16.mxu1 %v5713_v45 }
 0x183   : > { %5345 = vmatmul.mubr.bf16.gmra.mrb[28].mxu0 %v5714_v46 }
 0x184   : > { %5393 = vmatmul.mubr.bf16.gmra.mrb[28].mxu1 %v5715_v47 }
 0x21e   : > { %v5318_v48 = vpop.f32.mrb[0].mxu0 }
 0x21f   : > { %v5366_v50 = vpop.f32.mrb[0].mxu1  ;;  %v798_v52 = vpop.f32.mrb[1].mxu0  ;;  %v807_v55 = vadd.f32 %v5318_v48, %v6987_v49 }
 0x220   : > { %v1158_v53 = vpop.f32.mrb[1].mxu1  ;;  %v5319_v54 = vpop.f32.mrb[2].mxu0  ;;  %v1167_v59 = vadd.f32 %v5366_v50, %v6992_v51  ;;  %v799_v60 = vadd.f32 %v6987_v49, %v798_v52 }
 0x221   : > { %v810_v56 = vadd.f32 %v5319_v54, %v6987_v49  ;;  %v5367_v57 = vpop.f32.mrb[2].mxu1  ;;  %v801_v58 = vpop.f32.mrb[3].mxu0  ;;  %v1159_v0 = vadd.f32 %v6992_v51, %v1158_v53 }
 0x222   : > { %v1170_v61 = vadd.f32 %v5367_v57, %v6992_v51  ;;  %v802_v62 = vadd.f32 %v6987_v49, %v801_v58  ;;  %v1161_v63 = vpop.f32.mrb[3].mxu1 }
 0x223   : > { %v1286_v1 = vpack.c.bf16 %v810_v56, %v807_v55  ;;  %v1162_v2 = vadd.f32 %v6992_v51, %v1161_v63 }
 0x224   : > { %v1318_v3 = vpack.c.bf16 %v1170_v61, %v1167_v59  ;;  %v1285_v4 = vpack.c.bf16 %v802_v62, %v799_v60 }
 0x225   : > { %1302 = vst [vmem:[#allocation2 + $0x8] sm:$0xff] %v1286_v1  ;;  %v1317_v5 = vpack.c.bf16 %v1162_v2, %v1159_v0 }
 0x226   : > { %1334 = vst [vmem:[#allocation3 + $0x8] sm:$0xff] %v1318_v3  ;;  %1301 = vst [vmem:[#allocation2] sm:$0xff] %v1285_v4  ;;  %v5322_v6 = vpop.f32.mrb[4].mxu0 }
 0x227   : > { %1333 = vst [vmem:[#allocation3] sm:$0xff] %v1317_v5  ;;  %v5370_v7 = vpop.f32.mrb[4].mxu1  ;;  %v814_v8 = vpop.f32.mrb[5].mxu0  ;;  %v823_v11 = vadd.f32 %v5322_v6, %v6987_v49 }
 0x228   : > { %v1174_v9 = vpop.f32.mrb[5].mxu1  ;;  %v5323_v10 = vpop.f32.mrb[6].mxu0  ;;  %v1183_v15 = vadd.f32 %v5370_v7, %v6992_v51  ;;  %v815_v16 = vadd.f32 %v6987_v49, %v814_v8 }
 0x229   : > { %v826_v12 = vadd.f32 %v5323_v10, %v6987_v49  ;;  %v5371_v13 = vpop.f32.mrb[6].mxu1  ;;  %v817_v14 = vpop.f32.mrb[7].mxu0  ;;  %v1175_v20 = vadd.f32 %v6992_v51, %v1174_v9 }
 0x22a   : > { %v1186_v17 = vadd.f32 %v5371_v13, %v6992_v51  ;;  %v818_v18 = vadd.f32 %v6987_v49, %v817_v14  ;;  %v1177_v19 = vpop.f32.mrb[7].mxu1 }
 0x22b   : > { %v1288_v21 = vpack.c.bf16 %v826_v12, %v823_v11  ;;  %v1178_v22 = vadd.f32 %v6992_v51, %v1177_v19 }
 0x22c   : > { %v1320_v23 = vpack.c.bf16 %v1186_v17, %v1183_v15  ;;  %v1287_v24 = vpack.c.bf16 %v818_v18, %v815_v16 }
 0x22d   : > { %1304 = vst [vmem:[#allocation2 + $0x18] sm:$0xff] %v1288_v21  ;;  %v1319_v25 = vpack.c.bf16 %v1178_v22, %v1175_v20 }
 0x22e   : > { %1336 = vst [vmem:[#allocation3 + $0x18] sm:$0xff] %v1320_v23  ;;  %1303 = vst [vmem:[#allocation2 + $0x10] sm:$0xff] %v1287_v24  ;;  %v5326_v26 = vpop.f32.mrb[8].mxu0 }
 0x22f   : > { %1335 = vst [vmem:[#allocation3 + $0x10] sm:$0xff] %v1319_v25  ;;  %v5374_v27 = vpop.f32.mrb[8].mxu1  ;;  %v830_v28 = vpop.f32.mrb[9].mxu0  ;;  %v839_v31 = vadd.f32 %v5326_v26, %v6987_v49 }
 0x230   : > { %v1190_v29 = vpop.f32.mrb[9].mxu1  ;;  %v5327_v30 = vpop.f32.mrb[10].mxu0  ;;  %v1199_v35 = vadd.f32 %v5374_v27, %v6992_v51  ;;  %v831_v36 = vadd.f32 %v6987_v49, %v830_v28 }
 0x231   : > { %v842_v32 = vadd.f32 %v5327_v30, %v6987_v49  ;;  %v5375_v33 = vpop.f32.mrb[10].mxu1  ;;  %v833_v34 = vpop.f32.mrb[11].mxu0  ;;  %v1191_v40 = vadd.f32 %v6992_v51, %v1190_v29 }
 0x232   : > { %v1202_v37 = vadd.f32 %v5375_v33, %v6992_v51  ;;  %v834_v38 = vadd.f32 %v6987_v49, %v833_v34  ;;  %v1193_v39 = vpop.f32.mrb[11].mxu1 }
 0x233   : > { %v1290_v41 = vpack.c.bf16 %v842_v32, %v839_v31  ;;  %v1194_v42 = vadd.f32 %v6992_v51, %v1193_v39 }
 0x234   : > { %v1322_v43 = vpack.c.bf16 %v1202_v37, %v1199_v35  ;;  %v1289_v44 = vpack.c.bf16 %v834_v38, %v831_v36 }
 0x235   : > { %1306 = vst [vmem:[#allocation2 + $0x28] sm:$0xff] %v1290_v41  ;;  %v1321_v45 = vpack.c.bf16 %v1194_v42, %v1191_v40 }
 0x236   : > { %1338 = vst [vmem:[#allocation3 + $0x28] sm:$0xff] %v1322_v43  ;;  %1305 = vst [vmem:[#allocation2 + $0x20] sm:$0xff] %v1289_v44  ;;  %v5330_v46 = vpop.f32.mrb[12].mxu0 }
 0x237   : > { %1337 = vst [vmem:[#allocation3 + $0x20] sm:$0xff] %v1321_v45  ;;  %v5378_v47 = vpop.f32.mrb[12].mxu1  ;;  %v846_v48 = vpop.f32.mrb[13].mxu0  ;;  %v855_v53 = vadd.f32 %v5330_v46, %v6987_v49 }
 0x238   : > { %v1206_v50 = vpop.f32.mrb[13].mxu1  ;;  %v5331_v52 = vpop.f32.mrb[14].mxu0  ;;  %v1215_v57 = vadd.f32 %v5378_v47, %v6992_v51  ;;  %v847_v58 = vadd.f32 %v6987_v49, %v846_v48 }
 0x239   : > { %v858_v54 = vadd.f32 %v5331_v52, %v6987_v49  ;;  %v5379_v55 = vpop.f32.mrb[14].mxu1  ;;  %v849_v56 = vpop.f32.mrb[15].mxu0  ;;  %v1207_v62 = vadd.f32 %v6992_v51, %v1206_v50 }
 0x23a   : > { %v1218_v59 = vadd.f32 %v5379_v55, %v6992_v51  ;;  %v850_v60 = vadd.f32 %v6987_v49, %v849_v56  ;;  %v1209_v61 = vpop.f32.mrb[15].mxu1 }
 0x23b   : > { %v1292_v63 = vpack.c.bf16 %v858_v54, %v855_v53  ;;  %v1210_v0 = vadd.f32 %v6992_v51, %v1209_v61 }
 0x23c   : > { %v1324_v1 = vpack.c.bf16 %v1218_v59, %v1215_v57  ;;  %v1291_v2 = vpack.c.bf16 %v850_v60, %v847_v58 }
 0x23d   : > { %1308 = vst [vmem:[#allocation2 + $0x38] sm:$0xff] %v1292_v63  ;;  %v1323_v3 = vpack.c.bf16 %v1210_v0, %v1207_v62 }
 0x23e   : > { %1340 = vst [vmem:[#allocation3 + $0x38] sm:$0xff] %v1324_v1  ;;  %1307 = vst [vmem:[#allocation2 + $0x30] sm:$0xff] %v1291_v2  ;;  %v5334_v4 = vpop.f32.mrb[16].mxu0 }
 0x23f   : > { %1339 = vst [vmem:[#allocation3 + $0x30] sm:$0xff] %v1323_v3  ;;  %v5382_v5 = vpop.f32.mrb[16].mxu1  ;;  %v862_v6 = vpop.f32.mrb[17].mxu0  ;;  %v871_v9 = vadd.f32 %v5334_v4, %v6987_v49 }
 0x240   : > { %v1222_v7 = vpop.f32.mrb[17].mxu1  ;;  %v5335_v8 = vpop.f32.mrb[18].mxu0  ;;  %v1231_v13 = vadd.f32 %v5382_v5, %v6992_v51  ;;  %v863_v14 = vadd.f32 %v6987_v49, %v862_v6 }
 0x241   : > { %v874_v10 = vadd.f32 %v5335_v8, %v6987_v49  ;;  %v5383_v11 = vpop.f32.mrb[18].mxu1  ;;  %v865_v12 = vpop.f32.mrb[19].mxu0  ;;  %v1223_v18 = vadd.f32 %v6992_v51, %v1222_v7 }
 0x242   : > { %v1234_v15 = vadd.f32 %v5383_v11, %v6992_v51  ;;  %v866_v16 = vadd.f32 %v6987_v49, %v865_v12  ;;  %v1225_v17 = vpop.f32.mrb[19].mxu1 }
 0x243   : > { %v1294_v19 = vpack.c.bf16 %v874_v10, %v871_v9  ;;  %v1226_v20 = vadd.f32 %v6992_v51, %v1225_v17 }
 0x244   : > { %v1326_v21 = vpack.c.bf16 %v1234_v15, %v1231_v13  ;;  %v1293_v22 = vpack.c.bf16 %v866_v16, %v863_v14 }
 0x245   : > { %1310 = vst [vmem:[#allocation2 + $0x48] sm:$0xff] %v1294_v19  ;;  %v1325_v23 = vpack.c.bf16 %v1226_v20, %v1223_v18 }
 0x246   : > { %1342 = vst [vmem:[#allocation3 + $0x48] sm:$0xff] %v1326_v21  ;;  %1309 = vst [vmem:[#allocation2 + $0x40] sm:$0xff] %v1293_v22  ;;  %v5338_v24 = vpop.f32.mrb[20].mxu0 }
 0x247   : > { %1341 = vst [vmem:[#allocation3 + $0x40] sm:$0xff] %v1325_v23  ;;  %v5386_v25 = vpop.f32.mrb[20].mxu1  ;;  %v878_v26 = vpop.f32.mrb[21].mxu0  ;;  %v887_v29 = vadd.f32 %v5338_v24, %v6987_v49 }
 0x248   : > { %v1238_v27 = vpop.f32.mrb[21].mxu1  ;;  %v5339_v28 = vpop.f32.mrb[22].mxu0  ;;  %v1247_v33 = vadd.f32 %v5386_v25, %v6992_v51  ;;  %v879_v34 = vadd.f32 %v6987_v49, %v878_v26 }
 0x249   : > { %v890_v30 = vadd.f32 %v5339_v28, %v6987_v49  ;;  %v5387_v31 = vpop.f32.mrb[22].mxu1  ;;  %v881_v32 = vpop.f32.mrb[23].mxu0  ;;  %v1239_v38 = vadd.f32 %v6992_v51, %v1238_v27 }
 0x24a   : > { %v1250_v35 = vadd.f32 %v5387_v31, %v6992_v51  ;;  %v882_v36 = vadd.f32 %v6987_v49, %v881_v32  ;;  %v1241_v37 = vpop.f32.mrb[23].mxu1 }
 0x24b   : > { %v1296_v39 = vpack.c.bf16 %v890_v30, %v887_v29  ;;  %v1242_v40 = vadd.f32 %v6992_v51, %v1241_v37 }
 0x24c   : > { %v1328_v41 = vpack.c.bf16 %v1250_v35, %v1247_v33  ;;  %v1295_v42 = vpack.c.bf16 %v882_v36, %v879_v34 }
 0x24d   : > { %1312 = vst [vmem:[#allocation2 + $0x58] sm:$0xff] %v1296_v39  ;;  %v1327_v43 = vpack.c.bf16 %v1242_v40, %v1239_v38 }
 0x24e   : > { %1344 = vst [vmem:[#allocation3 + $0x58] sm:$0xff] %v1328_v41  ;;  %1311 = vst [vmem:[#allocation2 + $0x50] sm:$0xff] %v1295_v42  ;;  %v5342_v44 = vpop.f32.mrb[24].mxu0 }
 0x24f   : > { %1343 = vst [vmem:[#allocation3 + $0x50] sm:$0xff] %v1327_v43  ;;  %v5390_v45 = vpop.f32.mrb[24].mxu1  ;;  %v894_v46 = vpop.f32.mrb[25].mxu0  ;;  %v903_v50 = vadd.f32 %v5342_v44, %v6987_v49 }
 0x250   : > { %v1254_v47 = vpop.f32.mrb[25].mxu1  ;;  %v5343_v48 = vpop.f32.mrb[26].mxu0  ;;  %v1263_v55 = vadd.f32 %v5390_v45, %v6992_v51  ;;  %v895_v56 = vadd.f32 %v6987_v49, %v894_v46 }
 0x251   : > { %v906_v52 = vadd.f32 %v5343_v48, %v6987_v49  ;;  %v5391_v53 = vpop.f32.mrb[26].mxu1  ;;  %v897_v54 = vpop.f32.mrb[27].mxu0  ;;  %v1255_v60 = vadd.f32 %v6992_v51, %v1254_v47 }
 0x252   : > { %v1266_v57 = vadd.f32 %v5391_v53, %v6992_v51  ;;  %v898_v58 = vadd.f32 %v6987_v49, %v897_v54  ;;  %v1257_v59 = vpop.f32.mrb[27].mxu1 }
 0x253   : > { %v1298_v61 = vpack.c.bf16 %v906_v52, %v903_v50  ;;  %v1258_v62 = vadd.f32 %v6992_v51, %v1257_v59 }
 0x254   : > { %v1330_v63 = vpack.c.bf16 %v1266_v57, %v1263_v55  ;;  %v1297_v0 = vpack.c.bf16 %v898_v58, %v895_v56 }
 0x255   : > { %1314 = vst [vmem:[#allocation2 + $0x68] sm:$0xff] %v1298_v61  ;;  %v1329_v1 = vpack.c.bf16 %v1258_v62, %v1255_v60 }
 0x256   : > { %1346 = vst [vmem:[#allocation3 + $0x68] sm:$0xff] %v1330_v63  ;;  %1313 = vst [vmem:[#allocation2 + $0x60] sm:$0xff] %v1297_v0  ;;  %v5346_v2 = vpop.f32.mrb[28].mxu0 }
 0x257   : > { %1345 = vst [vmem:[#allocation3 + $0x60] sm:$0xff] %v1329_v1  ;;  %v5394_v3 = vpop.f32.mrb[28].mxu1  ;;  %v910_v4 = vpop.f32.mrb[29].mxu0  ;;  %v919_v7 = vadd.f32 %v5346_v2, %v6987_v49 }
 0x258   : > { %v1270_v5 = vpop.f32.mrb[29].mxu1  ;;  %v5347_v6 = vpop.f32.mrb[30].mxu0  ;;  %v1279_v11 = vadd.f32 %v5394_v3, %v6992_v51  ;;  %v911_v12 = vadd.f32 %v6987_v49, %v910_v4 }
 0x259   : > { %v922_v8 = vadd.f32 %v5347_v6, %v6987_v49  ;;  %v5395_v9 = vpop.f32.mrb[30].mxu1  ;;  %v913_v10 = vpop.f32.mrb[31].mxu0  ;;  %v1271_v16 = vadd.f32 %v6992_v51, %v1270_v5 }
 0x25a   : > { %v1282_v13 = vadd.f32 %v5395_v9, %v6992_v51  ;;  %v914_v14 = vadd.f32 %v6987_v49, %v913_v10  ;;  %v1273_v15 = vpop.f32.mrb[31].mxu1 }
 0x25b   : > { %v1300_v17 = vpack.c.bf16 %v922_v8, %v919_v7  ;;  %v1274_v18 = vadd.f32 %v6992_v51, %v1273_v15 }
 0x25c   : > { %v1332_v19 = vpack.c.bf16 %v1282_v13, %v1279_v11  ;;  %v1299_v20 = vpack.c.bf16 %v914_v14, %v911_v12 }
 0x25d   : > { %1316 = vst [vmem:[#allocation2 + $0x78] sm:$0xff] %v1300_v17  ;;  %v1331_v21 = vpack.c.bf16 %v1274_v18, %v1271_v16 }
 0x25e   : > { %1348 = vst [vmem:[#allocation3 + $0x78] sm:$0xff] %v1332_v19  ;;  %1315 = vst [vmem:[#allocation2 + $0x70] sm:$0xff] %v1299_v20 }
 0x25f   : > { %1347 = vst [vmem:[#allocation3 + $0x70] sm:$0xff] %v1331_v21 }
 0x260 PF: > { %v5716_v22 = vld [vmem:[#allocation11] sm:$0xff]   ;;  %v5717_v23 = vld [vmem:[#allocation11 + $0x8] sm:$0xff]   ;;  %v5718_v49 = vld [vmem:[#allocation11 + $0x10] sm:$0xff]   ;;  %vm1621_vm0 = vcmask 261120   ;;  %s6475_s3 = smov 96   ;;  %s9092_s10 = sld [smem:[#allocation124_spill]] }
 0x261   : > { %5396 = vmatprep.subr.bf16.mxu0 %v5716_v22  ;;  %v5719_v24 = vld [vmem:[#allocation11 + $0x18] sm:$0xff]   ;;  %v5724_v25 = vld [vmem:[%s6924_s8] sm:$0xff]   ;;  %v5721_v26 = vld [vmem:[#allocation11 + $0x28] sm:$0xff]   ;;  %s6476_s15 = smov 64   ;;  %s6477_s29 = smov 32   ;;  %vm2882_vm1 = vcmask 523520  }
 0x262   : > { %5397 = vmatpush3.bf16.msra.mxu0 %v5716_v22  ;;  %5412 = vmatprep.mubr.bf16.mxu0 %v5724_v25  ;;  %v5720_v51 = vld [vmem:[#allocation11 + $0x20] sm:$0xff]   ;;  %v7063_v29 = vld [vmem:[#allocation2 + $0x48] sm:$0xff]  ;;  %v5722_v32 = vld [vmem:[#allocation11 + $0x30] sm:$0xff]   ;;  %vm3581_vm2 = vcmask 785920   ;;  %vm4280_vm3 = vcmask 1048320   ;;  %s9321_s14 = sld [smem:[#allocation130_spill]] }
 0x263   : > { %5398 = vmatprep.subr.bf16.mxu0 %v5717_v23  ;;  %v7059_v27 = vld [vmem:[#allocation2 + $0x40] sm:$0xff]  ;;  %v7069_v31 = vld [vmem:[#allocation2 + $0x8] sm:$0xff]  ;;  %v5723_v34 = vld [vmem:[#allocation11 + $0x38] sm:$0xff]   ;;  %s9322_s13 = sld [smem:[#allocation26_spill]]  ;;  %s9323_s6 = sld [smem:[#allocation27_spill]] }
 0x264   : > { %v7061_v28 = vld [vmem:[#allocation2] sm:$0xff]  ;;  %5476 = vmatprep.subr.msk.bf16.mxu1 %vm1621_vm0, %v7059_v27  ;;  %v1650_v33 = vsel %vm1621_vm0, %v7069_v31, 0  ;;  %v7075_v35 = vld [vmem:[#allocation2 + $0x50] sm:$0xff]  ;;  %v5725_v37 = vld [vmem:[%s6924_s8 + $0x8] sm:$0xff]   ;;  %2216 = vrot.lane.b32.xlu1 %v7059_v27, %s6475_s3  ;;  %s4521_s5 = sshll.u32 %s6949_s11, 4  ;;  %s4506_s23 = scalar_lea.sflag [#allocation7], %s6920_s20  ;;  %s8827_s5 = int_to_ptr.vmem [resolvable:$true] %s4521_s5 }
 0x265   : > { %v1647_v30 = vsel %vm1621_vm0, %v7061_v28, 0  ;;  %v7079_v36 = vld [vmem:[#allocation2 + $0x10] sm:$0xff]  ;;  %v7085_v40 = vld [vmem:[#allocation2 + $0x58] sm:$0xff]  ;;  %v5728_v43 = vld [vmem:[%s6924_s8 + $0x20] sm:$0xff]   ;;  %2200 = vrot.lane.b32.xlu0 %v7061_v28, %s6475_s3  ;;  %p9325_p1 = scmp.ne.s32.totalorder %s9069_s24, 0 }
 0x266   : > { %5399 = vmatpush3.bf16.msra.mxu0 %v5717_v23  ;;  %4901 = vmatpush3.bf16.xpose.msra.mxu1 %v1647_v30  ;;  %v5726_v38 = vld [vmem:[%s6924_s8 + $0x10] sm:$0xff]   ;;  %v1653_v39 = vsel %vm1621_vm0, %v7079_v36, 0  ;;  %v7089_v41 = vld [vmem:[#allocation2 + $0x18] sm:$0xff]  ;;  %v7095_v45 = vld [vmem:[#allocation2 + $0x60] sm:$0xff] }
 0x267   : > { %5400 = vmatprep.subr.bf16.mxu0 %v5718_v49  ;;  %5477 = vmatprep.subr.msk.bf16.mxu1 %vm1621_vm0, %v7063_v29  ;;  %v5727_v42 = vld [vmem:[%s6924_s8 + $0x18] sm:$0xff]   ;;  %v1656_v44 = vsel %vm1621_vm0, %v7089_v41, 0  ;;  %v7099_v46 = vld [vmem:[#allocation2 + $0x20] sm:$0xff]  ;;  %v5729_v47 = vld [vmem:[%s6924_s8 + $0x28] sm:$0xff]  }
 0x268   : > { %v5730_v48 = vld [vmem:[%s6924_s8 + $0x30] sm:$0xff]   ;;  %v1659_v50 = vsel %vm1621_vm0, %v7099_v46, 0  ;;  %v7105_v52 = vld [vmem:[#allocation2 + $0x68] sm:$0xff]  ;;  %v5731_v54 = vld [vmem:[%s6924_s8 + $0x38] sm:$0xff]   ;;  %2218 = vrot.lane.b32.xlu1 %v7063_v29, %s6475_s3 }
 0x269   : > { %v7109_v53 = vld [vmem:[#allocation2 + $0x28] sm:$0xff]  ;;  %v7114_v56 = vld [vmem:[#allocation2 + $0x70] sm:$0xff]  ;;  %v7122_v59 = vld [vmem:[#allocation2 + $0x78] sm:$0xff]  ;;  %2202 = vrot.lane.b32.xlu0 %v7069_v31, %s6475_s3  ;;  %s4829_s30 = sshll.u32 %s9322_s13, 4  ;;  %s4830_s28 = sshll.u32 %s9323_s6, 5 }
 0x26a   : > { %5401 = vmatpush3.bf16.msra.mxu0 %v5718_v49  ;;  %v1662_v55 = vsel %vm1621_vm0, %v7109_v53, 0  ;;  %v7118_v57 = vld [vmem:[#allocation2 + $0x30] sm:$0xff]  ;;  %v7124_v60 = vld [vmem:[#allocation2 + $0x38] sm:$0xff]  ;;  %v4770_v63 = vld [vmem:[%s9092_s10] ss:$0 sm:$0xff]  ;;  %s4518_s0 = sadd.s32 %s4830_s28, %s4829_s30  ;;  %s6330_s10 = scalar_lea.vmem %s8827_s5, 2048 }
 0x26b   : > { %5402 = vmatprep.subr.bf16.mxu0 %v5719_v24  ;;  %v1665_v58 = vsel %vm1621_vm0, %v7118_v57, 0  ;;  %v1668_v61 = vsel %vm1621_vm0, %v7124_v60, 0  ;;  %s4831_s1 = sshll.u32 %s4518_s0, 7  ;;  %p6331_p4 = scmp.ne.s32.totalorder %s8827_s5, %s6330_s10 }
 0x26c   : > { %2220 = vrot.lane.b32.xlu1 %v7075_v35, %s6475_s3 }
 0x26d   : > { %2204 = vrot.lane.b32.xlu0 %v7079_v36, %s6475_s3  ;;  %p6332_p0 = pnand %p6331_p4, %p9325_p1 }
 0x26e   : > { %5403 = vmatpush3.bf16.msra.mxu0 %v5719_v24  ;;  %4903 = vmatpush3.bf16.xpose.msra.mxu1 %v1650_v33 }
 0x26f   : > { %5404 = vmatprep.subr.bf16.mxu0 %v5720_v51  ;;  %5478 = vmatprep.subr.msk.bf16.mxu1 %vm1621_vm0, %v7075_v35  ;;  %p6333_p8 = pneg %p6332_p0 }
 0x270   : > { %2222 = vrot.lane.b32.xlu1 %v7085_v40, %s6475_s3 }
 0x271   : > { %2206 = vrot.lane.b32.xlu0 %v7089_v41, %s6475_s3 }
 0x272   : > { %5405 = vmatpush3.bf16.msra.mxu0 %v5720_v51 }
 0x273   : > { %5406 = vmatprep.subr.bf16.mxu0 %v5721_v26 }
 0x274   : > { %2208 = vrot.lane.b32.xlu1 %v7099_v46, %s6475_s3 }
 0x276   : > { %5407 = vmatpush3.bf16.msra.mxu0 %v5721_v26  ;;  %4905 = vmatpush3.bf16.xpose.msra.mxu1 %v1653_v39 }
 0x277   : > { %5408 = vmatprep.subr.bf16.mxu0 %v5722_v32  ;;  %5479 = vmatprep.subr.msk.bf16.mxu1 %vm1621_vm0, %v7085_v40 }
 0x278   : > { %2224 = vrot.lane.b32.xlu1 %v7095_v45, %s6475_s3 }
 0x27a   : > { %5409 = vmatpush3.bf16.msra.mxu0 %v5722_v32 }
 0x27b   : > { %5410 = vmatprep.subr.bf16.mxu0 %v5723_v34 }
 0x27e   : > { %5411 = vmatpush3.bf16.msra.mxu0 %v5723_v34  ;;  %4907 = vmatpush3.bf16.xpose.msra.mxu1 %v1656_v44 }
 0x27f   : > { %5480 = vmatprep.subr.msk.bf16.mxu1 %vm1621_vm0, %v7095_v45 }
 0x281   : > { %5413 = vmatmul.mubr.bf16.vlgmr.msra.gmra.mrb[0].mxu0 %v5725_v37 }
 0x282   : > { %5416 = vmatprep.mubr.bf16.mxu0 %v5726_v38 }
 0x286   : > { %4909 = vmatpush3.bf16.xpose.msra.mxu1 %v1659_v50  ;;  %v7205_v50 = vld [vmem:[#allocation3 + $0x48] sm:$0xff] }
 0x287   : > { %5481 = vmatprep.subr.msk.bf16.mxu1 %vm1621_vm0, %v7105_v52  ;;  %9095 = vst [vmem:[#allocation35_spill] sm:$0xff] %v7205_v50 }
 0x289   : > { %5417 = vmatmul.mubr.bf16.gmra.mrb[4].mxu0 %v5727_v42 }
 0x28a   : > { %5420 = vmatprep.mubr.bf16.mxu0 %v5728_v43 }
 0x28e   : > { %4911 = vmatpush3.bf16.xpose.msra.mxu1 %v1662_v55  ;;  %v7213_v55 = vld [vmem:[#allocation3 + $0x50] sm:$0xff] }
 0x28f   : > { %5482 = vmatprep.subr.msk.bf16.mxu1 %vm1621_vm0, %v7114_v56  ;;  %9097 = vst [vmem:[#allocation37_spill] sm:$0xff] %v7213_v55 }
 0x291   : > { %5421 = vmatmul.mubr.bf16.gmra.mrb[8].mxu0 %v5729_v47  ;;  %v7201_v47 = vld [vmem:[#allocation3 + $0x40] sm:$0xff] }
 0x292   : > { %5424 = vmatprep.mubr.bf16.mxu0 %v5730_v48  ;;  %9093 = vst [vmem:[#allocation33_spill] sm:$0xff] %v7201_v47  ;;  %v7203_v48 = vld [vmem:[#allocation3] sm:$0xff]  ;;  %4932 = vmatprep.subr.bf16.mxu0 %v7201_v47 }
 0x293   : > { %9094 = vst [vmem:[#allocation34_spill] sm:$0xff] %v7203_v48  ;;  %4933 = vmatpush3.bf16.msra.mxu0 %v7203_v48 }
 0x294   : > { %4934 = vmatprep.subr.bf16.mxu0 %v7205_v50 }
 0x296   : > { %4913 = vmatpush3.bf16.xpose.msra.mxu1 %v1665_v58  ;;  %v7215_v58 = vld [vmem:[#allocation3 + $0x10] sm:$0xff] }
 0x297   : > { %5483 = vmatprep.subr.msk.bf16.mxu1 %vm1621_vm0, %v7122_v59  ;;  %9098 = vst [vmem:[#allocation38_spill] sm:$0xff] %v7215_v58 }
 0x299   : > { %5425 = vmatmul.mubr.bf16.gmra.mrb[12].mxu0 %v5731_v54  ;;  %v7210_v54 = vld [vmem:[#allocation3 + $0x8] sm:$0xff] }
 0x29a   : > { %9096 = vst [vmem:[#allocation36_spill] sm:$0xff] %v7210_v54  ;;  %4935 = vmatpush3.bf16.msra.mxu0 %v7210_v54 }
 0x29b   : > { %4936 = vmatprep.subr.bf16.mxu0 %v7213_v55 }
 0x29e   : > { %4915 = vmatpush3.bf16.xpose.msra.mxu1 %v1668_v61  ;;  %v7217_v61 = vld [vmem:[#allocation3 + $0x58] sm:$0xff]  ;;  %4937 = vmatpush3.bf16.msra.mxu0 %v7215_v58 }
 0x29f   : > { %9099 = vst [vmem:[#allocation39_spill] sm:$0xff] %v7217_v61  ;;  %4938 = vmatprep.subr.bf16.mxu0 %v7217_v61 }
 0x2d7   : > { %v7354_v58 = vpop.permute.xlu0 %2200 }
 0x354   : > { %v5414_v62 = vpop.f32.mrb[0].mxu0 }
 0x355   : > { %v1518_v0 = vpop.f32.mrb[1].mxu0  ;;  %v1527_v2 = vadd.f32 %v5414_v62, %v4770_v63  ;;  %v7222_v62 = vld [vmem:[#allocation3 + $0x18] sm:$0xff] }
 0x356   : > { %v5415_v1 = vpop.f32.mrb[2].mxu0  ;;  %v1519_v5 = vadd.f32 %v4770_v63, %v1518_v0  ;;  %9100 = vst [vmem:[#allocation40_spill] sm:$0xff] %v7222_v62  ;;  %4939 = vmatpush3.bf16.msra.mxu0 %v7222_v62  ;;  %v7227_v0 = vld [vmem:[#allocation3 + $0x20] sm:$0xff] }
 0x357   : > { %v1530_v3 = vadd.f32 %v5415_v1, %v4770_v63  ;;  %v1521_v4 = vpop.f32.mrb[3].mxu0  ;;  %9102 = vst [vmem:[#allocation42_spill] sm:$0xff] %v7227_v0  ;;  %v7230_v1 = vld [vmem:[#allocation3 + $0x68] sm:$0xff] }
 0x358   : > { %v1522_v6 = vadd.f32 %v4770_v63, %v1521_v4  ;;  %9103 = vst [vmem:[#allocation43_spill] sm:$0xff] %v7230_v1  ;;  %v7240_v4 = vld [vmem:[#allocation3 + $0x30] sm:$0xff] }
 0x359   : > { %v7153_v7 = vpack.c.bf16 %v1530_v3, %v1527_v2  ;;  %v7234_v2 = vld [vmem:[#allocation3 + $0x28] sm:$0xff]  ;;  %v7236_v3 = vld [vmem:[#allocation3 + $0x70] sm:$0xff]  ;;  %9106 = vst [vmem:[#allocation46_spill] sm:$0xff] %v7240_v4 }
 0x35a   : > { %v7155_v8 = vpack.c.bf16 %v1522_v6, %v1519_v5  ;;  %9104 = vst [vmem:[#allocation44_spill] sm:$0xff] %v7234_v2  ;;  %9105 = vst [vmem:[#allocation45_spill] sm:$0xff] %v7236_v3  ;;  %v7242_v5 = vld [vmem:[#allocation3 + $0x78] sm:$0xff] }
 0x35b   : > { %9107 = vst [vmem:[#allocation47_spill] sm:$0xff] %v7242_v5  ;;  %v7246_v6 = vld [vmem:[#allocation3 + $0x38] sm:$0xff] }
 0x35c   : > { %4916 = vmatprep.mubr.msk.bf16.mxu1 %vm1621_vm0, %v7155_v8  ;;  %v5418_v9 = vpop.f32.mrb[4].mxu0  ;;  %9108 = vst [vmem:[#allocation48_spill] sm:$0xff] %v7246_v6 }
 0x35d   : > { %4917 = vmatmul.mubr.msk.bf16.vlgmr.msra.gmra.mrb[0].mxu1 %vm1621_vm0, %v7155_v8  ;;  %v1543_v10 = vadd.f32 %v5418_v9, %v4770_v63  ;;  %v1534_v11 = vpop.f32.mrb[5].mxu0  ;;  %v2217_v9 = vpop.permute.xlu1 %2216 }
 0x35e   : > { %4918 = vmatprep.mubr.msk.bf16.mxu1 %vm1621_vm0, %v7153_v7  ;;  %v1535_v12 = vadd.f32 %v4770_v63, %v1534_v11  ;;  %v5419_v13 = vpop.f32.mrb[6].mxu0 }
 0x35f   : > { %v1546_v14 = vadd.f32 %v5419_v13, %v4770_v63  ;;  %v1537_v15 = vpop.f32.mrb[7].mxu0 }
 0x360   : > { %v1538_v16 = vadd.f32 %v4770_v63, %v1537_v15 }
 0x361   : > { %v7163_v17 = vpack.c.bf16 %v1546_v14, %v1543_v10  ;;  %v7356_v47 = vpop.permute.xlu1 %2218 }
 0x362   : > { %v7165_v18 = vpack.c.bf16 %v1538_v16, %v1535_v12 }
 0x364   : > { %v5422_v19 = vpop.f32.mrb[8].mxu0 }
 0x365   : > { %4919 = vmatmul.mubr.msk.bf16.gmra.mrb[4].mxu1 %vm1621_vm0, %v7153_v7  ;;  %v1559_v20 = vadd.f32 %v5422_v19, %v4770_v63  ;;  %v1550_v21 = vpop.f32.mrb[9].mxu0 }
 0x366   : > { %4920 = vmatprep.mubr.msk.bf16.mxu1 %vm1621_vm0, %v7165_v18  ;;  %v1551_v22 = vadd.f32 %v4770_v63, %v1550_v21  ;;  %v5423_v23 = vpop.f32.mrb[10].mxu0 }
 0x367   : > { %v1562_v49 = vadd.f32 %v5423_v23, %v4770_v63  ;;  %v1553_v24 = vpop.f32.mrb[11].mxu0 }
 0x368   : > { %v1554_v25 = vadd.f32 %v4770_v63, %v1553_v24 }
 0x369   : > { %v7171_v51 = vpack.c.bf16 %v1562_v49, %v1559_v20 }
 0x36a   : > { %v7173_v26 = vpack.c.bf16 %v1554_v25, %v1551_v22 }
 0x36c   : > { %v5426_v30 = vpop.f32.mrb[12].mxu0 }
 0x36d   : > { %4921 = vmatmul.mubr.msk.bf16.gmra.mrb[8].mxu1 %vm1621_vm0, %v7165_v18  ;;  %v1575_v32 = vadd.f32 %v5426_v30, %v4770_v63  ;;  %v1566_v33 = vpop.f32.mrb[13].mxu0 }
 0x36e   : > { %4922 = vmatprep.mubr.msk.bf16.mxu1 %vm1621_vm0, %v7163_v17  ;;  %v1567_v34 = vadd.f32 %v4770_v63, %v1566_v33  ;;  %v5427_v37 = vpop.f32.mrb[14].mxu0 }
 0x36f   : > { %v1578_v38 = vadd.f32 %v5427_v37, %v4770_v63  ;;  %v1569_v39 = vpop.f32.mrb[15].mxu0 }
 0x370   : > { %v1570_v42 = vadd.f32 %v4770_v63, %v1569_v39  ;;  %v7225_v63 = vld [vmem:[#allocation3 + $0x60] sm:$0xff] }
 0x371   : > { %v7179_v43 = vpack.c.bf16 %v1578_v38, %v1575_v32  ;;  %9101 = vst [vmem:[#allocation41_spill] sm:$0xff] %v7225_v63  ;;  %4940 = vmatprep.subr.bf16.mxu0 %v7225_v63 }
 0x372   : > { %v7181_v44 = vpack.c.bf16 %v1570_v42, %v1567_v34  ;;  %4941 = vmatpush3.bf16.msra.mxu0 %v7227_v0 }
 0x373   : > { %4942 = vmatprep.subr.bf16.mxu0 %v7230_v1 }
 0x375   : > { %4923 = vmatmul.mubr.msk.bf16.gmra.mrb[12].mxu1 %vm1621_vm0, %v7163_v17 }
 0x376   : > { %4924 = vmatprep.mubr.msk.bf16.mxu1 %vm1621_vm0, %v7173_v26  ;;  %4943 = vmatpush3.bf16.msra.mxu0 %v7234_v2 }
 0x377   : > { %4944 = vmatprep.subr.bf16.mxu0 %v7236_v3 }
 0x37a   : > { %4945 = vmatpush3.bf16.msra.mxu0 %v7240_v4 }
 0x37b   : > { %4946 = vmatprep.subr.bf16.mxu0 %v7242_v5 }
 0x37d   : > { %4925 = vmatmul.mubr.msk.bf16.gmra.mrb[16].mxu1 %vm1621_vm0, %v7173_v26 }
 0x37e   : > { %4926 = vmatprep.mubr.msk.bf16.mxu1 %vm1621_vm0, %v7171_v51  ;;  %4947 = vmatpush3.bf16.msra.mxu0 %v7246_v6 }
 0x37f   : > { %5484 = vmatprep.subr.msk.bf16.mxu0 %vm1621_vm0, %v2217_v9 }
 0x385   : > { %4927 = vmatmul.mubr.msk.bf16.gmra.mrb[20].mxu1 %vm1621_vm0, %v7171_v51 }
 0x386   : > { %4928 = vmatprep.mubr.msk.bf16.mxu1 %vm1621_vm0, %v7181_v44 }
 0x38d   : > { %4929 = vmatmul.mubr.msk.bf16.gmra.mrb[24].mxu1 %vm1621_vm0, %v7181_v44 }
 0x38e   : > { %4930 = vmatprep.mubr.msk.bf16.mxu1 %vm1621_vm0, %v7179_v43 }
 0x395   : > { %4931 = vmatmul.mubr.msk.bf16.gmra.mrb[28].mxu1 %vm1621_vm0, %v7179_v43 }
 0x430   : > { %v7250_v10 = vpop.f32.mrb[0].mxu1 }
 0x431   : > { %v7252_v11 = vpop.f32.mrb[1].mxu1 }
 0x432   : > { %v7254_v12 = vpop.f32.mrb[2].mxu1  ;;  %v1807_v13 = vmax.f32 %v7250_v10, %v7252_v11 }
 0x433   : > { %v7258_v14 = vpop.f32.mrb[3].mxu1 }
 0x434   : > { %1808 = vmax.xlane.f32.xlu0 %v1807_v13  ;;  %v1810_v15 = vmax.f32 %v7254_v12, %v7258_v14 }
 0x438   : > { %1811 = vmax.xlane.f32.xlu0 %v1810_v15  ;;  %v7262_v16 = vpop.f32.mrb[4].mxu1 }
 0x439   : > { %v7264_v19 = vpop.f32.mrb[5].mxu1 }
 0x43a   : > { %v7266_v20 = vpop.f32.mrb[6].mxu1  ;;  %v1813_v21 = vmax.f32 %v7262_v16, %v7264_v19 }
 0x43b   : > { %v7270_v22 = vpop.f32.mrb[7].mxu1 }
 0x43c   : > { %1814 = vmax.xlane.f32.xlu1 %v1813_v21  ;;  %v1816_v23 = vmax.f32 %v7266_v20, %v7270_v22 }
 0x440   : > { %1817 = vmax.xlane.f32.xlu1 %v1816_v23  ;;  %v7274_v49 = vpop.f32.mrb[8].mxu1 }
 0x441   : > { %v7276_v24 = vpop.f32.mrb[9].mxu1 }
 0x442   : > { %v7278_v25 = vpop.f32.mrb[10].mxu1  ;;  %v1819_v30 = vmax.f32 %v7274_v49, %v7276_v24 }
 0x443   : > { %v7282_v32 = vpop.f32.mrb[11].mxu1 }
 0x444   : > { %1820 = vmax.xlane.f32.xlu0 %v1819_v30  ;;  %v1822_v33 = vmax.f32 %v7278_v25, %v7282_v32 }
 0x446   : > { %1823 = vmax.xlane.f32.xlu1 %v1822_v33 }
 0x448   : > { %v7286_v34 = vpop.f32.mrb[12].mxu1 }
 0x449   : > { %v7288_v37 = vpop.f32.mrb[13].mxu1 }
 0x44a   : > { %v7290_v38 = vpop.f32.mrb[14].mxu1  ;;  %v1825_v39 = vmax.f32 %v7286_v34, %v7288_v37 }
 0x44b   : > { %v7294_v42 = vpop.f32.mrb[15].mxu1 }
 0x44c   : > { %1826 = vmax.xlane.f32.xlu0 %v1825_v39  ;;  %v1828_v9 = vmax.f32 %v7290_v38, %v7294_v42 }
 0x44e   : > { %1829 = vmax.xlane.f32.xlu1 %v1828_v9 }
 0x450   : > { %v7298_v13 = vpop.f32.mrb[16].mxu1 }
 0x451   : > { %v7300_v15 = vpop.f32.mrb[17].mxu1 }
 0x452   : > { %v7302_v21 = vpop.f32.mrb[18].mxu1  ;;  %v1831_v23 = vmax.f32 %v7298_v13, %v7300_v15 }
 0x453   : > { %v7306_v30 = vpop.f32.mrb[19].mxu1 }
 0x454   : > { %1832 = vmax.xlane.f32.xlu0 %v1831_v23  ;;  %v1834_v33 = vmax.f32 %v7302_v21, %v7306_v30 }
 0x456   : > { %1835 = vmax.xlane.f32.xlu1 %v1834_v33 }
 0x458   : > { %v7310_v39 = vpop.f32.mrb[20].mxu1 }
 0x459   : > { %v7312_v5 = vpop.f32.mrb[21].mxu1 }
 0x45a   : > { %v7314_v9 = vpop.f32.mrb[22].mxu1  ;;  %v1837_v3 = vmax.f32 %v7310_v39, %v7312_v5 }
 0x45b   : > { %v7318_v6 = vpop.f32.mrb[23].mxu1 }
 0x45c   : > { %1838 = vmax.xlane.f32.xlu1 %v1837_v3  ;;  %v1840_v1 = vmax.f32 %v7314_v9, %v7318_v6 }
 0x45e   : > { %1841 = vmax.xlane.f32.xlu0 %v1840_v1 }
 0x460   : > { %v7322_v23 = vpop.f32.mrb[24].mxu1 }
 0x461   : > { %9109 = vst [vmem:[#allocation49_spill] sm:$0xff] %v7322_v23  ;;  %v7324_v4 = vpop.f32.mrb[25].mxu1 }
 0x462   : > { %9110 = vst [vmem:[#allocation50_spill] sm:$0xff] %v7324_v4  ;;  %v7326_v33 = vpop.f32.mrb[26].mxu1  ;;  %v1843_v63 = vmax.f32 %v7322_v23, %v7324_v4 }
 0x463   : > { %9111 = vst [vmem:[#allocation51_spill] sm:$0xff] %v7326_v33  ;;  %v7330_v2 = vpop.f32.mrb[27].mxu1 }
 0x464   : > { %9112 = vst [vmem:[#allocation52_spill] sm:$0xff] %v7330_v2  ;;  %v1846_v61 = vmax.f32 %v7326_v33, %v7330_v2 }
 0x468   : > { %v7334_v0 = vpop.f32.mrb[28].mxu1 }
 0x469   : > { %9113 = vst [vmem:[#allocation53_spill] sm:$0xff] %v7334_v0  ;;  %v7336_v3 = vpop.f32.mrb[29].mxu1 }
 0x46a   : > { %9114 = vst [vmem:[#allocation54_spill] sm:$0xff] %v7336_v3  ;;  %v7338_v55 = vpop.f32.mrb[30].mxu1  ;;  %v1849_v1 = vmax.f32 %v7334_v0, %v7336_v3 }
 0x46b   : > { %9115 = vst [vmem:[#allocation55_spill] sm:$0xff] %v7338_v55  ;;  %v7342_v62 = vpop.f32.mrb[31].mxu1 }
 0x46c   : > { %9116 = vst [vmem:[#allocation56_spill] sm:$0xff] %v7342_v62  ;;  %v1852_v50 = vmax.f32 %v7338_v55, %v7342_v62 }
 0x46d   : > { %2226 = vrot.lane.b32.xlu1 %v7105_v52, %s6475_s3 }
 0x474   : > { %2210 = vrot.lane.b32.xlu0 %v7109_v53, %s6475_s3 }
 0x491   : > { %1844 = vmax.xlane.f32.xlu1 %v1843_v63 }
 0x493   : > { %1847 = vmax.xlane.f32.xlu0 %v1846_v61  ;;  %v7362_v61 = vpop.permute.xlu0 %2202 }
 0x495   : > { %1850 = vmax.xlane.f32.xlu1 %v1849_v1 }
 0x497   : > { %1853 = vmax.xlane.f32.xlu0 %v1852_v50  ;;  %v7368_v50 = vpop.permute.xlu1 %2220  ;;  %v7374_v63 = vpop.permute.xlu0 %2204 }
 0x49b   : > { %v7376_v1 = vpop.permute.xlu1 %2222  ;;  %v7382_v62 = vpop.permute.xlu0 %2206 }
 0x49f   : > { %v7388_v55 = vpop.permute.xlu1 %2208 }
 0x4a0   : > { %9117 = vst [vmem:[#allocation57_spill] sm:$0xff] %v7388_v55 }
 0x4a3   : > { %v7396_v4 = vpop.permute.xlu1 %2224 }
 0x4a6   : > { %2228 = vrot.lane.b32.xlu1 %v7114_v56, %s6475_s3 }
 0x4aa   : > { %2230 = vrot.lane.b32.xlu1 %v7122_v59, %s6475_s3 }
 0x4ad   : > { %2212 = vrot.lane.b32.xlu0 %v7118_v57, %s6475_s3 }
 0x4ae   : > { %2915 = vrot.lane.b32.xlu1 %v7061_v28, %s6476_s15 }
 0x4b1   : > { %2214 = vrot.lane.b32.xlu0 %v7124_v60, %s6475_s3 }
 0x4b2   : > { %2170 = vrot.lane.b32.xlu1 %v7153_v7, %s6475_s3 }
 0x4b5   : > { %2168 = vrot.lane.b32.xlu0 %v7155_v8, %s6475_s3 }
 0x4b6   : > { %2933 = vrot.lane.b32.xlu1 %v7063_v29, %s6476_s15 }
 0x4b9   : > { %2931 = vrot.lane.b32.xlu0 %v7059_v27, %s6476_s15 }
 0x4ba   : > { %2919 = vrot.lane.b32.xlu1 %v7079_v36, %s6476_s15 }
 0x4bd   : > { %2917 = vrot.lane.b32.xlu0 %v7069_v31, %s6476_s15 }
 0x4be   : > { %2174 = vrot.lane.b32.xlu1 %v7163_v17, %s6475_s3 }
 0x4c1   : > { %v1809_v3 = vpop.xlane.xlu0 %1808  ;;  %2172 = vrot.lane.b32.xlu0 %v7165_v18, %s6475_s3 }
 0x4c2   : > { %v1855_v0 = vsub.f32 %v7250_v10, %v1809_v3  ;;  %v1856_v54 = vsub.f32 %v7252_v11, %v1809_v3  ;;  %2937 = vrot.lane.b32.xlu1 %v7085_v40, %s6476_s15 }
 0x4c4   : > { %v1887_v2 = vmul.f32 1.442695, %v1855_v0  ;;  %v1889_v33 = vmul.f32 1.442695, %v1856_v54 }
 0x4c5   : > { %v1812_v23 = vpop.xlane.xlu0 %1811  ;;  %2935 = vrot.lane.b32.xlu0 %v7075_v35, %s6476_s15 }
 0x4c6   : > { %5740 = vpow2.f32 %v1887_v2  ;;  %v1857_v48 = vsub.f32 %v7254_v12, %v1812_v23  ;;  %v1858_v55 = vsub.f32 %v7258_v14, %v1812_v23  ;;  %2923 = vrot.lane.b32.xlu1 %v7099_v46, %s6476_s15 }
 0x4c7   : > { %5742 = vpow2.f32 %v1889_v33 }
 0x4c8   : > { %v1891_v10 = vmul.f32 1.442695, %v1857_v48  ;;  %v1893_v11 = vmul.f32 1.442695, %v1858_v55 }
 0x4c9   : > { %v1815_v3 = vpop.xlane.xlu1 %1814  ;;  %2921 = vrot.lane.b32.xlu0 %v7089_v41, %s6476_s15 }
 0x4ca   : > { %5744 = vpow2.f32 %v1891_v10  ;;  %v1859_v54 = vsub.f32 %v7262_v16, %v1815_v3  ;;  %v1860_v0 = vsub.f32 %v7264_v19, %v1815_v3  ;;  %2178 = vrot.lane.b32.xlu1 %v7171_v51, %s6475_s3 }
 0x4cb   : > { %5746 = vpow2.f32 %v1893_v11 }
 0x4cc   : > { %v1895_v2 = vmul.f32 1.442695, %v1859_v54  ;;  %v1897_v12 = vmul.f32 1.442695, %v1860_v0 }
 0x4cd   : > { %v1818_v14 = vpop.xlane.xlu1 %1817  ;;  %2176 = vrot.lane.b32.xlu0 %v7173_v26, %s6475_s3 }
 0x4ce   : > { %5748 = vpow2.f32 %v1895_v2  ;;  %v1861_v48 = vsub.f32 %v7266_v20, %v1818_v14  ;;  %v1862_v55 = vsub.f32 %v7270_v22, %v1818_v14  ;;  %2941 = vrot.lane.b32.xlu1 %v7105_v52, %s6476_s15 }
 0x4cf   : > { %5750 = vpow2.f32 %v1897_v12 }
 0x4d0   : > { %v5741_v16 = vpop.eup %5740  ;;  %v1899_v19 = vmul.f32 1.442695, %v1861_v48  ;;  %v1901_v23 = vmul.f32 1.442695, %v1862_v55 }
 0x4d1   : > { %v5743_v33 = vpop.eup %5742  ;;  %v1821_v10 = vpop.xlane.xlu0 %1820  ;;  %2939 = vrot.lane.b32.xlu0 %v7095_v45, %s6476_s15 }
 0x4d2   : > { %5752 = vpow2.f32 %v1899_v19  ;;  %v1863_v11 = vsub.f32 %v7274_v49, %v1821_v10  ;;  %v1864_v3 = vsub.f32 %v7276_v24, %v1821_v10  ;;  %2927 = vrot.lane.b32.xlu1 %v7118_v57, %s6476_s15  ;;  %v7422_v20 = vadd.f32 %v5743_v33, %v5741_v16 }
 0x4d3   : > { %5754 = vpow2.f32 %v1901_v23  ;;  %v1824_v22 = vpop.xlane.xlu1 %1823 }
 0x4d4   : > { %9118 = vst [vmem:[#allocation58_spill] sm:$0xff] %v7422_v20  ;;  %v5745_v54 = vpop.eup %5744  ;;  %v1903_v0 = vmul.f32 1.442695, %v1863_v11  ;;  %v1905_v2 = vmul.f32 1.442695, %v1864_v3  ;;  %v1865_v12 = vsub.f32 %v7278_v25, %v1824_v22  ;;  %v1866_v14 = vsub.f32 %v7282_v32, %v1824_v22 }
 0x4d5   : > { %v5747_v48 = vpop.eup %5746  ;;  %2925 = vrot.lane.b32.xlu0 %v7109_v53, %s6476_s15  ;;  %v1999_v49 = vpack.c.bf16 %v5745_v54, %v5741_v16  ;;  %v2257_v32 = vsel %vm1621_vm0, %v7354_v58, 0 }
 0x4d6   : > { %5756 = vpow2.f32 %v1903_v0  ;;  %v1907_v24 = vmul.f32 1.442695, %v1865_v12  ;;  %v1909_v55 = vmul.f32 1.442695, %v1866_v14  ;;  %2182 = vrot.lane.b32.xlu1 %v7179_v43, %s6475_s3  ;;  %v2000_v19 = vpack.c.bf16 %v5747_v48, %v5743_v33 }
 0x4d7   : > { %5758 = vpow2.f32 %v1905_v2  ;;  %v7430_v23 = vadd.f32 %v5747_v48, %v5745_v54 }
 0x4d8   : > { %v5749_v10 = vpop.eup %5748  ;;  %5760 = vpow2.f32 %v1907_v24  ;;  %2047 = vmatprep.mubr.bf16.mxu0 %v2000_v19 }
 0x4d9   : > { %9119 = vst [vmem:[#allocation59_spill] sm:$0xff] %v7430_v23  ;;  %v5751_v25 = vpop.eup %5750  ;;  %5762 = vpow2.f32 %v1909_v55  ;;  %2048 = vmatmul.mubr.bf16.vlgmr.msra.gmra.mrb[16].mxu0 %v1999_v49  ;;  %v1827_v16 = vpop.xlane.xlu0 %1826  ;;  %2180 = vrot.lane.b32.xlu0 %v7181_v44, %s6475_s3 }
 0x4da   : > { %4997 = vmatpush3.bf16.xpose.msra.mxu0 %v2257_v32  ;;  %v1867_v11 = vsub.f32 %v7286_v34, %v1827_v16  ;;  %v1868_v33 = vsub.f32 %v7288_v37, %v1827_v16  ;;  %2945 = vrot.lane.b32.xlu1 %v7122_v59, %s6476_s15  ;;  %v7440_v3 = vadd.f32 %v5751_v25, %v5749_v10 }
 0x4db   : > { %5485 = vmatprep.subr.msk.bf16.mxu0 %vm1621_vm0, %v7356_v47  ;;  %v1830_v58 = vpop.xlane.xlu1 %1829 }
 0x4dc   : > { %9120 = vst [vmem:[#allocation60_spill] sm:$0xff] %v7440_v3  ;;  %v5753_v22 = vpop.eup %5752  ;;  %v1911_v54 = vmul.f32 1.442695, %v1867_v11  ;;  %v1913_v0 = vmul.f32 1.442695, %v1868_v33  ;;  %v1869_v2 = vsub.f32 %v7290_v38, %v1830_v58  ;;  %v1870_v12 = vsub.f32 %v7294_v42, %v1830_v58 }
 0x4dd   : > { %v5755_v14 = vpop.eup %5754  ;;  %2943 = vrot.lane.b32.xlu0 %v7114_v56, %s6476_s15  ;;  %v2001_v34 = vpack.c.bf16 %v5753_v22, %v5749_v10  ;;  %v2260_v42 = vsel %vm1621_vm0, %v7362_v61, 0 }
 0x4de   : > { %5764 = vpow2.f32 %v1911_v54  ;;  %v1915_v37 = vmul.f32 1.442695, %v1869_v2  ;;  %v1917_v48 = vmul.f32 1.442695, %v1870_v12  ;;  %3614 = vrot.lane.b32.xlu1 %v7061_v28, %s6477_s29  ;;  %v2002_v47 = vpack.c.bf16 %v5755_v14, %v5751_v25 }
 0x4df   : > { %5766 = vpow2.f32 %v1913_v0  ;;  %v7450_v49 = vadd.f32 %v5755_v14, %v5753_v22 }
 0x4e0   : > { %v5757_v24 = vpop.eup %5756  ;;  %5768 = vpow2.f32 %v1915_v37  ;;  %2055 = vmatprep.mubr.bf16.mxu0 %v2002_v47 }
 0x4e1   : > { %9121 = vst [vmem:[#allocation61_spill] sm:$0xff] %v7450_v49  ;;  %v5759_v38 = vpop.eup %5758  ;;  %5770 = vpow2.f32 %v1917_v48  ;;  %2056 = vmatmul.mubr.bf16.gmra.mrb[20].mxu0 %v2001_v34  ;;  %v1833_v55 = vpop.xlane.xlu0 %1832  ;;  %2929 = vrot.lane.b32.xlu0 %v7124_v60, %s6476_s15 }
 0x4e2   : > { %v5761_v19 = vpop.eup %5760  ;;  %4999 = vmatpush3.bf16.xpose.msra.mxu0 %v2260_v42  ;;  %v1871_v28 = vsub.f32 %v7298_v13, %v1833_v55  ;;  %v1872_v10 = vsub.f32 %v7300_v15, %v1833_v55  ;;  %2901 = vrot.lane.b32.xlu1 %v7153_v7, %s6476_s15  ;;  %v7460_v25 = vadd.f32 %v5759_v38, %v5757_v24 }
 0x4e3   : > { %v5763_v32 = vpop.eup %5762  ;;  %5486 = vmatprep.subr.msk.bf16.mxu0 %vm1621_vm0, %v7368_v50  ;;  %v1836_v61 = vpop.xlane.xlu1 %1835  ;;  %v2003_v16 = vpack.c.bf16 %v5761_v19, %v5757_v24 }
 0x4e4   : > { %9122 = vst [vmem:[#allocation62_spill] sm:$0xff] %v7460_v25  ;;  %v1919_v11 = vmul.f32 1.442695, %v1871_v28  ;;  %v1921_v33 = vmul.f32 1.442695, %v1872_v10  ;;  %v1873_v58 = vsub.f32 %v7302_v21, %v1836_v61  ;;  %v1874_v22 = vsub.f32 %v7306_v30, %v1836_v61 }
 0x4e5   : > { %v2004_v13 = vpack.c.bf16 %v5763_v32, %v5759_v38  ;;  %2899 = vrot.lane.b32.xlu0 %v7155_v8, %s6476_s15  ;;  %v7468_v15 = vadd.f32 %v5763_v32, %v5761_v19  ;;  %v2263_v21 = vsel %vm1621_vm0, %v7374_v63, 0 }
 0x4e6   : > { %5772 = vpow2.f32 %v1919_v11  ;;  %v1923_v54 = vmul.f32 1.442695, %v1873_v58  ;;  %v1925_v0 = vmul.f32 1.442695, %v1874_v22  ;;  %3632 = vrot.lane.b32.xlu1 %v7063_v29, %s6477_s29 }
 0x4e7   : > { %9123 = vst [vmem:[#allocation63_spill] sm:$0xff] %v7468_v15  ;;  %5774 = vpow2.f32 %v1921_v33  ;;  %2063 = vmatprep.mubr.bf16.mxu0 %v2004_v13 }
 0x4e8   : > { %v5765_v50 = vpop.eup %5764  ;;  %5776 = vpow2.f32 %v1923_v54 }
 0x4e9   : > { %v5767_v2 = vpop.eup %5766  ;;  %5778 = vpow2.f32 %v1925_v0  ;;  %2064 = vmatmul.mubr.bf16.gmra.mrb[24].mxu0 %v2003_v16  ;;  %v1839_v30 = vpop.xlane.xlu1 %1838  ;;  %3630 = vrot.lane.b32.xlu0 %v7059_v27, %s6477_s29 }
 0x4ea   : > { %v5769_v12 = vpop.eup %5768  ;;  %5001 = vmatpush3.bf16.xpose.msra.mxu0 %v2263_v21  ;;  %v1875_v14 = vsub.f32 %v7310_v39, %v1839_v30  ;;  %v1876_v29 = vsub.f32 %v7312_v5, %v1839_v30  ;;  %3618 = vrot.lane.b32.xlu1 %v7079_v36, %s6477_s29  ;;  %v7480_v34 = vadd.f32 %v5767_v2, %v5765_v50  ;;  %v9138_v30 = vld [vmem:[#allocation54_spill] sm:$0xff] }
 0x4eb   : > { %v5771_v37 = vpop.eup %5770  ;;  %5487 = vmatprep.subr.msk.bf16.mxu0 %vm1621_vm0, %v7376_v1  ;;  %v1842_v63 = vpop.xlane.xlu0 %1841  ;;  %v2005_v48 = vpack.c.bf16 %v5769_v12, %v5765_v50 }
 0x4ec   : > { %9124 = vst [vmem:[#allocation64_spill] sm:$0xff] %v7480_v34  ;;  %v1927_v47 = vmul.f32 1.442695, %v1875_v14  ;;  %v1929_v24 = vmul.f32 1.442695, %v1876_v29  ;;  %v1877_v27 = vsub.f32 %v7314_v9, %v1842_v63  ;;  %v1878_v38 = vsub.f32 %v7318_v6, %v1842_v63 }
 0x4ed   : > { %v2006_v39 = vpack.c.bf16 %v5771_v37, %v5767_v2  ;;  %3616 = vrot.lane.b32.xlu0 %v7069_v31, %s6477_s29  ;;  %v7488_v5 = vadd.f32 %v5771_v37, %v5769_v12  ;;  %v2266_v6 = vsel %vm1621_vm0, %v7382_v62, 0  ;;  %v2227_v11 = vpop.permute.xlu1 %2226  ;;  %v9137_v2 = vld [vmem:[#allocation53_spill] sm:$0xff]  ;;  %v9139_v37 = vld [vmem:[#allocation55_spill] sm:$0xff] }
 0x4ee   : > { %5780 = vpow2.f32 %v1927_v47  ;;  %v1931_v36 = vmul.f32 1.442695, %v1877_v27  ;;  %v1933_v42 = vmul.f32 1.442695, %v1878_v38  ;;  %2905 = vrot.lane.b32.xlu1 %v7163_v17, %s6476_s15  ;;  %v9142_v38 = vld [vmem:[#allocation38_spill] sm:$0xff] }
 0x4ef   : > { %9125 = vst [vmem:[#allocation65_spill] sm:$0xff] %v7488_v5  ;;  %5782 = vpow2.f32 %v1929_v24  ;;  %2071 = vmatprep.mubr.bf16.mxu0 %v2006_v39  ;;  %v2211_v13 = vpop.permute.xlu0 %2210 }
 0x4f0   : > { %v5773_v1 = vpop.eup %5772  ;;  %5784 = vpow2.f32 %v1931_v36 }
 0x4f1   : > { %v5775_v55 = vpop.eup %5774  ;;  %5786 = vpow2.f32 %v1933_v42  ;;  %2072 = vmatmul.mubr.bf16.gmra.mrb[28].mxu0 %v2005_v48  ;;  %2903 = vrot.lane.b32.xlu0 %v7165_v18, %s6476_s15  ;;  %v9140_v48 = vld [vmem:[#allocation56_spill] sm:$0xff] }
 0x4f2   : > { %v5777_v31 = vpop.eup %5776  ;;  %5003 = vmatpush3.bf16.xpose.msra.mxu0 %v2266_v6  ;;  %3636 = vrot.lane.b32.xlu1 %v7085_v40, %s6477_s29  ;;  %v7498_v9 = vadd.f32 %v5775_v55, %v5773_v1  ;;  %v9128_v40 = vld [vmem:[#allocation57_spill] sm:$0xff] }
 0x4f3   : > { %v5779_v19 = vpop.eup %5778  ;;  %5488 = vmatprep.subr.msk.bf16.mxu0 %vm1621_vm0, %v7396_v4  ;;  %v2007_v28 = vpack.c.bf16 %v5777_v31, %v5773_v1  ;;  %v2269_v16 = vsel %vm1621_vm0, %v9128_v40, 0  ;;  %v9146_v40 = vld [vmem:[#allocation42_spill] sm:$0xff] }
 0x4f4   : > { %9126 = vst [vmem:[#allocation66_spill] sm:$0xff] %v7498_v9  ;;  %v2008_v10 = vpack.c.bf16 %v5779_v19, %v5775_v55  ;;  %v7502_v32 = vadd.f32 %v5779_v19, %v5777_v31  ;;  %v9143_v55 = vld [vmem:[#allocation35_spill] sm:$0xff]  ;;  %v9144_v31 = vld [vmem:[#allocation40_spill] sm:$0xff] }
 0x4f5   : > { %3634 = vrot.lane.b32.xlu0 %v7075_v35, %s6477_s29 }
 0x4f6   : > { %9127 = vst [vmem:[#allocation67_spill] sm:$0xff] %v7502_v32  ;;  %2079 = vmatprep.mubr.bf16.mxu0 %v2008_v10  ;;  %3622 = vrot.lane.b32.xlu1 %v7099_v46, %s6477_s29  ;;  %v9145_v10 = vld [vmem:[#allocation37_spill] sm:$0xff] }
 0x4f8   : > { %v5781_v62 = vpop.eup %5780 }
 0x4f9   : > { %v5783_v61 = vpop.eup %5782  ;;  %2080 = vmatmul.mubr.bf16.gmra.mrb[32].mxu0 %v2007_v28  ;;  %3620 = vrot.lane.b32.xlu0 %v7089_v41, %s6477_s29  ;;  %v2272_v41 = vsel %vm1621_vm0, %v2211_v13, 0 }
 0x4fa   : > { %v5785_v4 = vpop.eup %5784  ;;  %5005 = vmatpush3.bf16.xpose.msra.mxu0 %v2269_v16  ;;  %2909 = vrot.lane.b32.xlu1 %v7171_v51, %s6476_s15  ;;  %v7514_v35 = vadd.f32 %v5783_v61, %v5781_v62 }
 0x4fb   : > { %v5787_v33 = vpop.eup %5786  ;;  %5489 = vmatprep.subr.msk.bf16.mxu0 %vm1621_vm0, %v2227_v11  ;;  %v2009_v46 = vpack.c.bf16 %v5785_v4, %v5781_v62 }
 0x4fc   : > { %9129 = vst [vmem:[#allocation57_spill] sm:$0xff] %v7514_v35  ;;  %v2010_v58 = vpack.c.bf16 %v5787_v33, %v5783_v61  ;;  %v7517_v22 = vadd.f32 %v5787_v33, %v5785_v4 }
 0x4fd   : > { %2907 = vrot.lane.b32.xlu0 %v7173_v26, %s6476_s15 }
 0x4fe   : > { %9130 = vst [vmem:[#allocation68_spill] sm:$0xff] %v7517_v22  ;;  %2087 = vmatprep.mubr.bf16.mxu0 %v2010_v58  ;;  %3640 = vrot.lane.b32.xlu1 %v7105_v52, %s6477_s29  ;;  %v9131_v52 = vld [vmem:[#allocation34_spill] sm:$0xff]  ;;  %v6125_v22 = vld [vmem:[#allocation3 + $0x30] sm:$0xff] }
 0x501   : > { %2088 = vmatmul.mubr.bf16.gmra.mrb[36].mxu0 %v2009_v46  ;;  %3638 = vrot.lane.b32.xlu0 %v7095_v45, %s6477_s29 }
 0x502   : > { %5007 = vmatpush3.bf16.xpose.msra.mxu0 %v2272_v41  ;;  %3626 = vrot.lane.b32.xlu1 %v7118_v57, %s6477_s29  ;;  %v9133_v57 = vld [vmem:[#allocation50_spill] sm:$0xff] }
 0x505   : > { %3624 = vrot.lane.b32.xlu0 %v7109_v53, %s6477_s29  ;;  %v9132_v53 = vld [vmem:[#allocation49_spill] sm:$0xff] }
 0x506   : > { %2913 = vrot.lane.b32.xlu1 %v7179_v43, %s6476_s15 }
 0x509   : > { %2911 = vrot.lane.b32.xlu0 %v7181_v44, %s6476_s15 }
 0x50a   : > { %3644 = vrot.lane.b32.xlu1 %v7122_v59, %s6477_s29 }
 0x50d   : > { %3642 = vrot.lane.b32.xlu0 %v7114_v56, %s6477_s29 }
 0x50e   : > { %3600 = vrot.lane.b32.xlu1 %v7153_v7, %s6477_s29 }
 0x511   : > { %3628 = vrot.lane.b32.xlu0 %v7124_v60, %s6477_s29 }
 0x512   : > { %3604 = vrot.lane.b32.xlu1 %v7163_v17, %s6477_s29  ;;  %v9134_v17 = vld [vmem:[#allocation51_spill] sm:$0xff] }
 0x515   : > { %3598 = vrot.lane.b32.xlu0 %v7155_v8, %s6477_s29 }
 0x516   : > { %3608 = vrot.lane.b32.xlu1 %v7171_v51, %s6477_s29 }
 0x519   : > { %3602 = vrot.lane.b32.xlu0 %v7165_v18, %s6477_s29  ;;  %v9135_v18 = vld [vmem:[#allocation52_spill] sm:$0xff] }
 0x51a   : > { %3612 = vrot.lane.b32.xlu1 %v7179_v43, %s6477_s29 }
 0x51d   : > { %3606 = vrot.lane.b32.xlu0 %v7173_v26, %s6477_s29  ;;  %v9136_v26 = vld [vmem:[#allocation36_spill] sm:$0xff] }
 0x51e   : > { %v1845_v45 = vpop.xlane.xlu1 %1844  ;;  %2641 = vrot.lane.b32.xlu1 %v9131_v52, %s6475_s3 }
 0x51f   : > { %v1879_v56 = vsub.f32 %v9132_v53, %v1845_v45  ;;  %v1880_v59 = vsub.f32 %v9133_v57, %v1845_v45  ;;  %v9148_v45 = vld [vmem:[#allocation39_spill] sm:$0xff] }
 0x520   : > { %v1848_v60 = vpop.xlane.xlu0 %1847 }
 0x521   : > { %v1935_v7 = vmul.f32 1.442695, %v1879_v56  ;;  %v1937_v8 = vmul.f32 1.442695, %v1880_v59  ;;  %v1881_v51 = vsub.f32 %v9134_v17, %v1848_v60  ;;  %v1882_v54 = vsub.f32 %v9135_v18, %v1848_v60  ;;  %3610 = vrot.lane.b32.xlu0 %v7181_v44, %s6477_s29  ;;  %v9141_v44 = vld [vmem:[#allocation33_spill] sm:$0xff]  ;;  %v9150_v59 = vld [vmem:[#allocation44_spill] sm:$0xff] }
 0x522   : > { %v1851_v43 = vpop.xlane.xlu1 %1850  ;;  %2643 = vrot.lane.b32.xlu1 %v9136_v26, %s6475_s3 }
 0x523   : > { %5788 = vpow2.f32 %v1935_v7  ;;  %v1939_v0 = vmul.f32 1.442695, %v1881_v51  ;;  %v1941_v50 = vmul.f32 1.442695, %v1882_v54  ;;  %v1883_v21 = vsub.f32 %v9137_v2, %v1851_v43  ;;  %v9152_v54 = vld [vmem:[#allocation41_spill] sm:$0xff] }
 0x524   : > { %5790 = vpow2.f32 %v1937_v8  ;;  %v1884_v12 = vsub.f32 %v9138_v30, %v1851_v43  ;;  %v1854_v14 = vpop.xlane.xlu0 %1853 }
 0x525   : > { %5792 = vpow2.f32 %v1939_v0  ;;  %v1943_v29 = vmul.f32 1.442695, %v1883_v21  ;;  %v1885_v63 = vsub.f32 %v9139_v37, %v1854_v14  ;;  %v1886_v47 = vsub.f32 %v9140_v48, %v1854_v14  ;;  %2657 = vrot.lane.b32.xlu0 %v9141_v44, %s6475_s3  ;;  %v9155_v21 = vld [vmem:[#allocation43_spill] sm:$0xff] }
 0x526   : > { %5794 = vpow2.f32 %v1941_v50  ;;  %v1945_v24 = vmul.f32 1.442695, %v1884_v12  ;;  %v2229_v27 = vpop.permute.xlu1 %2228  ;;  %2645 = vrot.lane.b32.xlu1 %v9142_v38, %s6475_s3  ;;  %v9154_v50 = vld [vmem:[#allocation46_spill] sm:$0xff]  ;;  %v9156_v12 = vld [vmem:[#allocation48_spill] sm:$0xff]  ;;  %v9158_v48 = vld [vmem:[#allocation47_spill] sm:$0xff] }
 0x527   : > { %5796 = vpow2.f32 %v1943_v29  ;;  %v1947_v39 = vmul.f32 1.442695, %v1885_v63  ;;  %v1949_v36 = vmul.f32 1.442695, %v1886_v47  ;;  %5490 = vmatprep.subr.msk.bf16.mxu0 %vm1621_vm0, %v2229_v27  ;;  %v9157_v29 = vld [vmem:[#allocation45_spill] sm:$0xff] }
 0x528   : > { %5798 = vpow2.f32 %v1945_v24  ;;  %v2213_v42 = vpop.permute.xlu0 %2212 }
 0x529   : > { %5800 = vpow2.f32 %v1947_v39  ;;  %v2275_v1 = vsel %vm1621_vm0, %v2213_v42, 0  ;;  %2659 = vrot.lane.b32.xlu0 %v9143_v55, %s6475_s3 }
 0x52a   : > { %5802 = vpow2.f32 %v1949_v36  ;;  %v2231_v6 = vpop.permute.xlu1 %2230  ;;  %5009 = vmatpush3.bf16.xpose.msra.mxu0 %v2275_v1  ;;  %2647 = vrot.lane.b32.xlu1 %v9144_v31, %s6475_s3 }
 0x52b   : > { %5491 = vmatprep.subr.msk.bf16.mxu0 %vm1621_vm0, %v2231_v6 }
 0x52c   : > { %v2215_v19 = vpop.permute.xlu0 %2214 }
 0x52d   : > { %v5789_v28 = vpop.eup %5788  ;;  %2661 = vrot.lane.b32.xlu0 %v9145_v10, %s6475_s3  ;;  %v2278_v4 = vsel %vm1621_vm0, %v2215_v19, 0 }
 0x52e   : > { %v5791_v62 = vpop.eup %5790  ;;  %v2916_v61 = vpop.permute.xlu1 %2915  ;;  %2649 = vrot.lane.b32.xlu1 %v9146_v40, %s6475_s3 }
 0x52f   : > { %v5793_v16 = vpop.eup %5792  ;;  %v7584_v11 = vadd.f32 %v5791_v62, %v5789_v28  ;;  %v2972_v47 = vsel %vm1621_vm0, %v2916_v61, 0 }
 0x530   : > { %v5795_v33 = vpop.eup %5794  ;;  %v2169_v46 = vpop.permute.xlu0 %2168  ;;  %v2011_v58 = vpack.c.bf16 %v5793_v16, %v5789_v28 }
 0x531   : > { %9147 = vst [vmem:[#allocation34_spill] sm:$0xff] %v7584_v11  ;;  %v5797_v13 = vpop.eup %5796  ;;  %v2012_v41 = vpack.c.bf16 %v5795_v33, %v5791_v62  ;;  %2663 = vrot.lane.b32.xlu0 %v9148_v45, %s6475_s3  ;;  %v7588_v53 = vadd.f32 %v5795_v33, %v5793_v16 }
 0x532   : > { %v5799_v56 = vpop.eup %5798  ;;  %v2171_v57 = vpop.permute.xlu1 %2170  ;;  %5011 = vmatpush3.bf16.xpose.msra.mxu0 %v2278_v4  ;;  %2651 = vrot.lane.b32.xlu1 %v9150_v59, %s6475_s3 }
 0x533   : > { %9149 = vst [vmem:[#allocation49_spill] sm:$0xff] %v7588_v53  ;;  %v5801_v60 = vpop.eup %5800  ;;  %2095 = vmatprep.mubr.bf16.mxu0 %v2012_v41  ;;  %v7592_v7 = vadd.f32 %v5799_v56, %v5797_v13 }
 0x534   : > { %v5803_v8 = vpop.eup %5802  ;;  %2096 = vmatmul.mubr.bf16.gmra.mrb[40].mxu0 %v2011_v58  ;;  %v2932_v17 = vpop.permute.xlu0 %2931  ;;  %v2013_v51 = vpack.c.bf16 %v5801_v60, %v5797_v13 }
 0x535   : > { %9151 = vst [vmem:[#allocation50_spill] sm:$0xff] %v7592_v7  ;;  %v2014_v18 = vpack.c.bf16 %v5803_v8, %v5799_v56  ;;  %5492 = vmatprep.subr.msk.bf16.mxu0 %vm1621_vm0, %v2932_v17  ;;  %2665 = vrot.lane.b32.xlu0 %v9152_v54, %s6475_s3  ;;  %v7597_v43 = vadd.f32 %v5803_v8, %v5801_v60 }
 0x536   : > { %v2934_v0 = vpop.permute.xlu1 %2933  ;;  %2653 = vrot.lane.b32.xlu1 %v9154_v50, %s6475_s3 }
 0x537   : > { %9153 = vst [vmem:[#allocation51_spill] sm:$0xff] %v7597_v43  ;;  %2103 = vmatprep.mubr.bf16.mxu0 %v2014_v18 }
 0x538   : > { %v2918_v2 = vpop.permute.xlu0 %2917 }
 0x539   : > { %2667 = vrot.lane.b32.xlu0 %v9155_v21, %s6475_s3  ;;  %v2975_v42 = vsel %vm1621_vm0, %v2918_v2, 0 }
 0x53a   : > { %v2920_v30 = vpop.permute.xlu1 %2919  ;;  %2655 = vrot.lane.b32.xlu1 %v9156_v12, %s6475_s3 }
 0x53b   : > { %v2978_v62 = vsel %vm1621_vm0, %v2920_v30, 0 }
 0x53c   : > { %2104 = vmatmul.mubr.bf16.gmra.mrb[44].mxu0 %v2013_v51  ;;  %v2173_v14 = vpop.permute.xlu0 %2172 }
 0x53d   : > { %5012 = vmatprep.mubr.msk.bf16.mxu0 %vm1621_vm0, %v2169_v46  ;;  %2669 = vrot.lane.b32.xlu0 %v9157_v29, %s6475_s3 }
 0x53e   : > { %v2175_v37 = vpop.permute.xlu1 %2174  ;;  %3340 = vrot.lane.b32.xlu1 %v9131_v52, %s6476_s15 }
 0x540   : > { %v2936_v63 = vpop.permute.xlu0 %2935 }
 0x541   : > { %2671 = vrot.lane.b32.xlu0 %v9158_v48, %s6475_s3 }
 0x542   : > { %v2938_v24 = vpop.permute.xlu1 %2937  ;;  %3358 = vrot.lane.b32.xlu1 %v9143_v55, %s6476_s15 }
 0x544   : > { %5013 = vmatmul.mubr.msk.bf16.vlgmr.msra.gmra.mrb[48].mxu0 %vm1621_vm0, %v2169_v46  ;;  %v2922_v27 = vpop.permute.xlu0 %2921 }
 0x545   : > { %5093 = vmatpush3.bf16.xpose.msra.mxu0 %v2972_v47  ;;  %5014 = vmatprep.mubr.msk.bf16.mxu0 %vm1621_vm0, %v2171_v57  ;;  %v2981_v46 = vsel %vm1621_vm0, %v2922_v27, 0 }
 0x546   : > { %v2924_v39 = vpop.permute.xlu1 %2923  ;;  %5493 = vmatprep.subr.msk.bf16.mxu0 %vm1621_vm0, %v2934_v0  ;;  %3342 = vrot.lane.b32.xlu1 %v9136_v26, %s6476_s15 }
 0x547   : > { %3356 = vrot.lane.b32.xlu0 %v9141_v44, %s6476_s15 }
 0x548   : > { %v2177_v36 = vpop.permute.xlu0 %2176 }
 0x54a   : > { %v2179_v1 = vpop.permute.xlu1 %2178  ;;  %3344 = vrot.lane.b32.xlu1 %v9142_v38, %s6476_s15 }
 0x54b   : > { %3360 = vrot.lane.b32.xlu0 %v9145_v10, %s6476_s15 }
 0x54c   : > { %5015 = vmatmul.mubr.msk.bf16.gmra.mrb[52].mxu0 %vm1621_vm0, %v2171_v57  ;;  %v2940_v6 = vpop.permute.xlu0 %2939  ;;  %v2984_v57 = vsel %vm1621_vm0, %v2924_v39, 0 }
 0x54d   : > { %5095 = vmatpush3.bf16.xpose.msra.mxu0 %v2975_v42  ;;  %5016 = vmatprep.mubr.msk.bf16.mxu0 %vm1621_vm0, %v2173_v14 }
 0x54e   : > { %v2942_v19 = vpop.permute.xlu1 %2941  ;;  %5494 = vmatprep.subr.msk.bf16.mxu0 %vm1621_vm0, %v2936_v63  ;;  %3346 = vrot.lane.b32.xlu1 %v9144_v31, %s6476_s15 }
 0x54f   : > { %3362 = vrot.lane.b32.xlu0 %v9148_v45, %s6476_s15 }
 0x550   : > { %v2926_v28 = vpop.permute.xlu0 %2925 }
 0x552   : > { %v2928_v61 = vpop.permute.xlu1 %2927  ;;  %3348 = vrot.lane.b32.xlu1 %v9146_v40, %s6476_s15 }
 0x553   : > { %3364 = vrot.lane.b32.xlu0 %v9152_v54, %s6476_s15 }
 0x554   : > { %5017 = vmatmul.mubr.msk.bf16.gmra.mrb[56].mxu0 %vm1621_vm0, %v2173_v14  ;;  %v2181_v16 = vpop.permute.xlu0 %2180 }
 0x555   : > { %5097 = vmatpush3.bf16.xpose.msra.mxu0 %v2978_v62  ;;  %5018 = vmatprep.mubr.msk.bf16.mxu0 %vm1621_vm0, %v2175_v37 }
 0x556   : > { %v2183_v4 = vpop.permute.xlu1 %2182  ;;  %5495 = vmatprep.subr.msk.bf16.mxu0 %vm1621_vm0, %v2938_v24  ;;  %3350 = vrot.lane.b32.xlu1 %v9150_v59, %s6476_s15 }
 0x557   : > { %3366 = vrot.lane.b32.xlu0 %v9155_v21, %s6476_s15 }
 0x558   : > { %v2944_v33 = vpop.permute.xlu0 %2943 }
 0x55a   : > { %v2946_v58 = vpop.permute.xlu1 %2945  ;;  %3352 = vrot.lane.b32.xlu1 %v9154_v50, %s6476_s15 }
 0x55b   : > { %3368 = vrot.lane.b32.xlu0 %v9157_v29, %s6476_s15 }
 0x55c   : > { %5019 = vmatmul.mubr.msk.bf16.gmra.mrb[60].mxu0 %vm1621_vm0, %v2175_v37  ;;  %v2930_v13 = vpop.permute.xlu0 %2929 }
 0x55d   : > { %5099 = vmatpush3.bf16.xpose.msra.mxu0 %v2981_v46  ;;  %5020 = vmatprep.mubr.msk.bf16.mxu0 %vm1621_vm0, %v2177_v36  ;;  %v2993_v50 = vsel %vm1621_vm0, %v2930_v13, 0 }
 0x55e   : > { %v3615_v41 = vpop.permute.xlu1 %3614  ;;  %5496 = vmatprep.subr.msk.bf16.mxu0 %vm1621_vm0, %v2940_v6  ;;  %3354 = vrot.lane.b32.xlu1 %v9156_v12, %s6476_s15 }
 0x55f   : > { %3370 = vrot.lane.b32.xlu0 %v9158_v48, %s6476_s15 }
 0x560   : > { %v2900_v56 = vpop.permute.xlu0 %2899 }
 0x562   : > { %v2902_v60 = vpop.permute.xlu1 %2901  ;;  %4039 = vrot.lane.b32.xlu1 %v9131_v52, %s6477_s29  ;;  %v2987_v52 = vsel %vm1621_vm0, %v2926_v28, 0 }
 0x563   : > { %4055 = vrot.lane.b32.xlu0 %v9141_v44, %s6477_s29 }
 0x564   : > { %5021 = vmatmul.mubr.msk.bf16.gmra.mrb[64].mxu0 %vm1621_vm0, %v2177_v36  ;;  %v3631_v8 = vpop.permute.xlu0 %3630 }
 0x565   : > { %5101 = vmatpush3.bf16.xpose.msra.mxu0 %v2984_v57  ;;  %5022 = vmatprep.mubr.msk.bf16.mxu0 %vm1621_vm0, %v2179_v1 }
 0x566   : > { %v3633_v17 = vpop.permute.xlu1 %3632  ;;  %5497 = vmatprep.subr.msk.bf16.mxu0 %vm1621_vm0, %v2942_v19  ;;  %4057 = vrot.lane.b32.xlu1 %v9143_v55, %s6477_s29 }
 0x567   : > { %4059 = vrot.lane.b32.xlu0 %v9145_v10, %s6477_s29 }
 0x568   : > { %v3617_v51 = vpop.permute.xlu0 %3616 }
 0x56a   : > { %v3619_v18 = vpop.permute.xlu1 %3618  ;;  %4041 = vrot.lane.b32.xlu1 %v9136_v26, %s6477_s29  ;;  %v2990_v26 = vsel %vm1621_vm0, %v2928_v61, 0 }
 0x56b   : > { %4061 = vrot.lane.b32.xlu0 %v9148_v45, %s6477_s29  ;;  %v3677_v63 = vsel %vm1621_vm0, %v3619_v18, 0 }
 0x56c   : > { %5023 = vmatmul.mubr.msk.bf16.gmra.mrb[68].mxu0 %vm1621_vm0, %v2179_v1  ;;  %v2904_v44 = vpop.permute.xlu0 %2903 }
 0x56d   : > { %5103 = vmatpush3.bf16.xpose.msra.mxu0 %v2987_v52  ;;  %5024 = vmatprep.mubr.msk.bf16.mxu0 %vm1621_vm0, %v2181_v16 }
 0x56e   : > { %v2906_v55 = vpop.permute.xlu1 %2905  ;;  %5498 = vmatprep.subr.msk.bf16.mxu0 %vm1621_vm0, %v2944_v33  ;;  %4043 = vrot.lane.b32.xlu1 %v9142_v38, %s6477_s29 }
 0x56f   : > { %4063 = vrot.lane.b32.xlu0 %v9152_v54, %s6477_s29 }
 0x570   : > { %v3635_v10 = vpop.permute.xlu0 %3634 }
 0x572   : > { %v3637_v0 = vpop.permute.xlu1 %3636  ;;  %4045 = vrot.lane.b32.xlu1 %v9144_v31, %s6477_s29 }
 0x573   : > { %4065 = vrot.lane.b32.xlu0 %v9155_v21, %s6477_s29  ;;  %v3671_v21 = vsel %vm1621_vm0, %v3615_v41, 0 }
 0x574   : > { %5025 = vmatmul.mubr.msk.bf16.gmra.mrb[72].mxu0 %vm1621_vm0, %v2181_v16  ;;  %v3621_v45 = vpop.permute.xlu0 %3620 }
 0x575   : > { %5105 = vmatpush3.bf16.xpose.msra.mxu0 %v2990_v26  ;;  %5026 = vmatprep.mubr.msk.bf16.mxu0 %vm1621_vm0, %v2183_v4  ;;  %v3680_v24 = vsel %vm1621_vm0, %v3621_v45, 0 }
 0x576   : > { %5499 = vmatprep.subr.msk.bf16.mxu0 %vm1621_vm0, %v2946_v58  ;;  %4047 = vrot.lane.b32.xlu1 %v9146_v40, %s6477_s29  ;;  %v3623_v38 = vpop.permute.xlu1 %3622 }
 0x577   : > { %v3683_v36 = vsel %vm1621_vm0, %v3623_v38, 0 }
 0x578   : > { %v2908_v54 = vpop.permute.xlu0 %2907 }
 0x57a   : > { %4049 = vrot.lane.b32.xlu1 %v9150_v59, %s6477_s29  ;;  %v2910_v31 = vpop.permute.xlu1 %2909  ;;  %v3674_v59 = vsel %vm1621_vm0, %v3617_v51, 0 }
 0x57c   : > { %5027 = vmatmul.mubr.msk.bf16.gmra.mrb[76].mxu0 %vm1621_vm0, %v2183_v4  ;;  %v3639_v2 = vpop.permute.xlu0 %3638 }
 0x57d   : > { %5107 = vmatpush3.bf16.xpose.msra.mxu0 %v2993_v50  ;;  %5108 = vmatprep.mubr.msk.bf16.mxu0 %vm1621_vm0, %v2900_v56 }
 0x57e   : > { %5500 = vmatprep.subr.msk.bf16.mxu0 %vm1621_vm0, %v3631_v8  ;;  %v3641_v30 = vpop.permute.xlu1 %3640 }
 0x580   : > { %v3625_v40 = vpop.permute.xlu0 %3624 }
 0x581   : > { %v3686_v28 = vsel %vm1621_vm0, %v3625_v40, 0 }
 0x582   : > { %v3627_v12 = vpop.permute.xlu1 %3626 }
 0x583   : > { %v3689_v41 = vsel %vm1621_vm0, %v3627_v12, 0 }
 0x584   : > { %5109 = vmatmul.mubr.msk.bf16.vlgmr.msra.gmra.mrb[80].mxu0 %vm1621_vm0, %v2900_v56  ;;  %v2912_v14 = vpop.permute.xlu0 %2911 }
 0x585   : > { %5110 = vmatprep.mubr.msk.bf16.mxu0 %vm1621_vm0, %v2902_v60  ;;  %5189 = vmatpush3.bf16.xpose.msra.mxu0 %v3671_v21 }
 0x586   : > { %5501 = vmatprep.subr.msk.bf16.mxu0 %vm1621_vm0, %v3633_v17  ;;  %v2914_v29 = vpop.permute.xlu1 %2913 }
 0x588   : > { %v3643_v37 = vpop.permute.xlu0 %3642 }
 0x58a   : > { %v3645_v48 = vpop.permute.xlu1 %3644 }
 0x58c   : > { %5111 = vmatmul.mubr.msk.bf16.gmra.mrb[84].mxu0 %vm1621_vm0, %v2902_v60  ;;  %v3629_v47 = vpop.permute.xlu0 %3628 }
 0x58d   : > { %5112 = vmatprep.mubr.msk.bf16.mxu0 %vm1621_vm0, %v2904_v44  ;;  %5191 = vmatpush3.bf16.xpose.msra.mxu0 %v3674_v59 }
 0x58e   : > { %5502 = vmatprep.subr.msk.bf16.mxu0 %vm1621_vm0, %v3635_v10  ;;  %v7711_v27 = vpop.permute.xlu1 %3600  ;;  %v3692_v10 = vsel %vm1621_vm0, %v3629_v47, 0 }
 0x590   : > { %v7714_v39 = vpop.permute.xlu0 %3598 }
 0x592   : > { %v7719_v42 = vpop.permute.xlu1 %3604 }
 0x594   : > { %5113 = vmatmul.mubr.msk.bf16.gmra.mrb[88].mxu0 %vm1621_vm0, %v2904_v44  ;;  %v7721_v1 = vpop.permute.xlu0 %3602 }
 0x595   : > { %5114 = vmatprep.mubr.msk.bf16.mxu0 %vm1621_vm0, %v2906_v55  ;;  %5193 = vmatpush3.bf16.xpose.msra.mxu0 %v3677_v63 }
 0x596   : > { %5503 = vmatprep.subr.msk.bf16.mxu0 %vm1621_vm0, %v3637_v0  ;;  %v7726_v6 = vpop.permute.xlu1 %3608 }
 0x598   : > { %v7728_v19 = vpop.permute.xlu0 %3606 }
 0x59a   : > { %v7733_v16 = vpop.permute.xlu1 %3612 }
 0x59c   : > { %5115 = vmatmul.mubr.msk.bf16.gmra.mrb[92].mxu0 %vm1621_vm0, %v2906_v55  ;;  %v7738_v46 = vpop.permute.xlu0 %3610 }
 0x59d   : > { %5116 = vmatprep.mubr.msk.bf16.mxu0 %vm1621_vm0, %v2908_v54  ;;  %5195 = vmatpush3.bf16.xpose.msra.mxu0 %v3680_v24 }
 0x59e   : > { %5504 = vmatprep.subr.msk.bf16.mxu0 %vm1621_vm0, %v3639_v2  ;;  %v2642_v57 = vpop.permute.xlu1 %2641 }
 0x5a0   : > { %v2658_v56 = vpop.permute.xlu0 %2657 }
 0x5a1   : > { %5028 = vmatprep.subr.bf16.mxu1 %v2658_v56 }
 0x5a2   : > { %5029 = vmatpush3.bf16.msra.mxu1 %v2642_v57  ;;  %v2644_v55 = vpop.permute.xlu1 %2643 }
 0x5a4   : > { %5117 = vmatmul.mubr.msk.bf16.gmra.mrb[96].mxu0 %vm1621_vm0, %v2908_v54  ;;  %v2660_v18 = vpop.permute.xlu0 %2659 }
 0x5a5   : > { %5118 = vmatprep.mubr.msk.bf16.mxu0 %vm1621_vm0, %v2910_v31  ;;  %5197 = vmatpush3.bf16.xpose.msra.mxu0 %v3683_v36 }
 0x5a6   : > { %5505 = vmatprep.subr.msk.bf16.mxu0 %vm1621_vm0, %v3641_v30  ;;  %5030 = vmatprep.subr.bf16.mxu1 %v2660_v18  ;;  %v2646_v45 = vpop.permute.xlu1 %2645 }
 0x5a7   : > { %5031 = vmatpush3.bf16.msra.mxu1 %v2644_v55 }
 0x5a8   : > { %v2662_v26 = vpop.permute.xlu0 %2661 }
 0x5a9   : > { %5032 = vmatprep.subr.bf16.mxu1 %v2662_v26 }
 0x5aa   : > { %v2648_v30 = vpop.permute.xlu1 %2647 }
 0x5ab   : > { %5033 = vmatpush3.bf16.msra.mxu1 %v2646_v45 }
 0x5ac   : > { %v4948_v62 = vpop.f32.mrb[16].mxu0  ;;  %5119 = vmatmul.mubr.msk.bf16.gmra.mrb[100].mxu0 %vm1621_vm0, %v2910_v31  ;;  %v2664_v2 = vpop.permute.xlu0 %2663 }
 0x5ad   : > { %v4949_v61 = vpop.f32.mrb[17].mxu0  ;;  %5120 = vmatprep.mubr.msk.bf16.mxu0 %vm1621_vm0, %v2912_v14  ;;  %5199 = vmatpush3.bf16.xpose.msra.mxu0 %v3686_v28 }
 0x5ae   : > { %v7735_v4 = vadd.f32 %v4949_v61, %v4948_v62  ;;  %v4951_v33 = vpop.f32.mrb[18].mxu0  ;;  %5506 = vmatprep.subr.msk.bf16.mxu0 %vm1621_vm0, %v3643_v37  ;;  %5034 = vmatprep.subr.bf16.mxu1 %v2664_v2  ;;  %v2650_v12 = vpop.permute.xlu1 %2649 }
 0x5af   : > { %v4952_v58 = vpop.f32.mrb[19].mxu0  ;;  %5035 = vmatpush3.bf16.msra.mxu1 %v2648_v30 }
 0x5b0   : > { %9159 = vst [vmem:[#allocation52_spill] sm:$0xff] %v7735_v4  ;;  %v7740_v13 = vadd.f32 %v4952_v58, %v4951_v33  ;;  %v2666_v40 = vpop.permute.xlu0 %2665 }
 0x5b1   : > { %5036 = vmatprep.subr.bf16.mxu1 %v2666_v40 }
 0x5b2   : > { %9160 = vst [vmem:[#allocation36_spill] sm:$0xff] %v7740_v13  ;;  %v2652_v24 = vpop.permute.xlu1 %2651 }
 0x5b3   : > { %5037 = vmatpush3.bf16.msra.mxu1 %v2650_v12 }
 0x5b4   : > { %v4954_v60 = vpop.f32.mrb[20].mxu0  ;;  %5121 = vmatmul.mubr.msk.bf16.gmra.mrb[104].mxu0 %vm1621_vm0, %v2912_v14 }
 0x5b5   : > { %v4955_v8 = vpop.f32.mrb[21].mxu0  ;;  %5122 = vmatprep.mubr.msk.bf16.mxu0 %vm1621_vm0, %v2914_v29  ;;  %5201 = vmatpush3.bf16.xpose.msra.mxu0 %v3689_v41 }
 0x5b6   : > { %v7745_v17 = vadd.f32 %v4955_v8, %v4954_v60  ;;  %v4957_v51 = vpop.f32.mrb[22].mxu0  ;;  %5507 = vmatprep.subr.msk.bf16.mxu0 %vm1621_vm0, %v3645_v48  ;;  %v2668_v48 = vpop.permute.xlu0 %2667 }
 0x5b7   : > { %v4958_v52 = vpop.f32.mrb[23].mxu0  ;;  %5038 = vmatprep.subr.bf16.mxu1 %v2668_v48 }
 0x5b8   : > { %9161 = vst [vmem:[#allocation53_spill] sm:$0xff] %v7745_v17  ;;  %v7748_v44 = vadd.f32 %v4958_v52, %v4957_v51  ;;  %5039 = vmatpush3.bf16.msra.mxu1 %v2652_v24 }
 0x5ba   : > { %9162 = vst [vmem:[#allocation54_spill] sm:$0xff] %v7748_v44  ;;  %v2670_v36 = vpop.permute.xlu0 %2669 }
 0x5bb   : > { %5040 = vmatprep.subr.bf16.mxu1 %v2670_v36 }
 0x5bc   : > { %v4960_v0 = vpop.f32.mrb[24].mxu0  ;;  %5123 = vmatmul.mubr.msk.bf16.gmra.mrb[108].mxu0 %vm1621_vm0, %v2914_v29 }
 0x5bd   : > { %v4961_v38 = vpop.f32.mrb[25].mxu0  ;;  %5203 = vmatpush3.bf16.xpose.msra.mxu0 %v3692_v10  ;;  %5204 = vmatprep.mubr.msk.bf16.mxu0 %vm1621_vm0, %v7714_v39 }
 0x5be   : > { %v7754_v54 = vadd.f32 %v4961_v38, %v4960_v0  ;;  %v4963_v50 = vpop.f32.mrb[26].mxu0  ;;  %v2672_v41 = vpop.permute.xlu0 %2671 }
 0x5bf   : > { %v4964_v31 = vpop.f32.mrb[27].mxu0 }
 0x5c0   : > { %9163 = vst [vmem:[#allocation55_spill] sm:$0xff] %v7754_v54  ;;  %v7756_v21 = vadd.f32 %v4964_v31, %v4963_v50 }
 0x5c2   : > { %9164 = vst [vmem:[#allocation56_spill] sm:$0xff] %v7756_v21  ;;  %v3357_v55 = vpop.permute.xlu0 %3356 }
 0x5c4   : > { %v4966_v59 = vpop.f32.mrb[28].mxu0  ;;  %5205 = vmatmul.mubr.msk.bf16.vlgmr.msra.gmra.mrb[112].mxu0 %vm1621_vm0, %v7714_v39  ;;  %v2654_v39 = vpop.permute.xlu1 %2653 }
 0x5c5   : > { %v4967_v14 = vpop.f32.mrb[29].mxu0  ;;  %5206 = vmatprep.mubr.msk.bf16.mxu0 %vm1621_vm0, %v7711_v27  ;;  %5041 = vmatpush3.bf16.msra.mxu1 %v2654_v39 }
 0x5c6   : > { %v7762_v29 = vadd.f32 %v4967_v14, %v4966_v59  ;;  %v4969_v37 = vpop.f32.mrb[30].mxu0  ;;  %5042 = vmatprep.subr.bf16.mxu1 %v2672_v41  ;;  %v7941_v5 = vpop.permute.xlu0 %3360 }
 0x5c7   : > { %v4970_v63 = vpop.f32.mrb[31].mxu0 }
 0x5c8   : > { %9165 = vst [vmem:[#allocation33_spill] sm:$0xff] %v7762_v29  ;;  %v7764_v47 = vadd.f32 %v4970_v63, %v4969_v37  ;;  %v2656_v57 = vpop.permute.xlu1 %2655 }
 0x5c9   : > { %5043 = vmatpush3.bf16.msra.mxu1 %v2656_v57 }
 0x5ca   : > { %9166 = vst [vmem:[#allocation38_spill] sm:$0xff] %v7764_v47  ;;  %5124 = vmatprep.subr.bf16.mxu1 %v3357_v55  ;;  %v7955_v3 = vpop.permute.xlu0 %3362 }
 0x5cc   : > { %v4972_v28 = vpop.f32.mrb[32].mxu0  ;;  %5207 = vmatmul.mubr.msk.bf16.gmra.mrb[116].mxu0 %vm1621_vm0, %v7711_v27 }
 0x5cd   : > { %v4973_v62 = vpop.f32.mrb[33].mxu0  ;;  %5208 = vmatprep.mubr.msk.bf16.mxu0 %vm1621_vm0, %v7721_v1 }
 0x5ce   : > { %v7770_v61 = vadd.f32 %v4973_v62, %v4972_v28  ;;  %v4975_v33 = vpop.f32.mrb[34].mxu0 }
 0x5cf   : > { %v4976_v58 = vpop.f32.mrb[35].mxu0 }
 0x5d0   : > { %9167 = vst [vmem:[#allocation35_spill] sm:$0xff] %v7770_v61  ;;  %v7772_v56 = vadd.f32 %v4976_v58, %v4975_v33 }
 0x5d2   : > { %9168 = vst [vmem:[#allocation40_spill] sm:$0xff] %v7772_v56  ;;  %v6124_v56 = vld [vmem:[#allocation3 + $0x70] sm:$0xff] }
 0x5d4   : > { %v4978_v60 = vpop.f32.mrb[36].mxu0  ;;  %5209 = vmatmul.mubr.msk.bf16.gmra.mrb[120].mxu0 %vm1621_vm0, %v7721_v1 }
 0x5d5   : > { %v4979_v27 = vpop.f32.mrb[37].mxu0  ;;  %5210 = vmatprep.mubr.msk.bf16.mxu0 %vm1621_vm0, %v7719_v42 }
 0x5d6   : > { %v7778_v8 = vadd.f32 %v4979_v27, %v4978_v60  ;;  %v4981_v51 = vpop.f32.mrb[38].mxu0 }
 0x5d7   : > { %v4982_v52 = vpop.f32.mrb[39].mxu0 }
 0x5d8   : > { %9169 = vst [vmem:[#allocation37_spill] sm:$0xff] %v7778_v8  ;;  %v7780_v18 = vadd.f32 %v4982_v52, %v4981_v51 }
 0x5da   : > { %9170 = vst [vmem:[#allocation42_spill] sm:$0xff] %v7780_v18 }
 0x5dc   : > { %5211 = vmatmul.mubr.msk.bf16.gmra.mrb[124].mxu0 %vm1621_vm0, %v7719_v42 }
 0x5dd   : > { %5212 = vmatprep.mubr.msk.bf16.mxu0 %vm1621_vm0, %v7728_v19 }
 0x5e4   : > { %5213 = vmatmul.mubr.msk.bf16.gmra.mrb[128].mxu0 %vm1621_vm0, %v7728_v19 }
 0x5e5   : > { %5214 = vmatprep.mubr.msk.bf16.mxu0 %vm1621_vm0, %v7726_v6 }
 0x5ec   : > { %5215 = vmatmul.mubr.msk.bf16.gmra.mrb[132].mxu0 %vm1621_vm0, %v7726_v6 }
 0x5ed   : > { %5216 = vmatprep.mubr.msk.bf16.mxu0 %vm1621_vm0, %v7738_v46 }
 0x5f4   : > { %5217 = vmatmul.mubr.msk.bf16.gmra.mrb[136].mxu0 %vm1621_vm0, %v7738_v46 }
 0x5f5   : > { %5218 = vmatprep.mubr.msk.bf16.mxu0 %vm1621_vm0, %v7733_v16 }
 0x5fc   : > { %5219 = vmatmul.mubr.msk.bf16.gmra.mrb[140].mxu0 %vm1621_vm0, %v7733_v16 }
 0x607   : > { %v4984_v42 = vpop.f32.mrb[40].mxu0 }
 0x608   : > { %v4985_v1 = vpop.f32.mrb[41].mxu0 }
 0x609   : > { %v7800_v19 = vadd.f32 %v4985_v1, %v4984_v42  ;;  %v4987_v10 = vpop.f32.mrb[42].mxu0 }
 0x60a   : > { %v4988_v26 = vpop.f32.mrb[43].mxu0 }
 0x60b   : > { %9171 = vst [vmem:[#allocation39_spill] sm:$0xff] %v7800_v19  ;;  %v7802_v0 = vadd.f32 %v4988_v26, %v4987_v10 }
 0x60d   : > { %9172 = vst [vmem:[#allocation44_spill] sm:$0xff] %v7802_v0 }
 0x60f   : > { %v4990_v6 = vpop.f32.mrb[44].mxu0 }
 0x610   : > { %v4991_v45 = vpop.f32.mrb[45].mxu0 }
 0x611   : > { %v7804_v38 = vadd.f32 %v4991_v45, %v4990_v6  ;;  %v4993_v50 = vpop.f32.mrb[46].mxu0 }
 0x612   : > { %v4994_v46 = vpop.f32.mrb[47].mxu0 }
 0x613   : > { %9173 = vst [vmem:[#allocation41_spill] sm:$0xff] %v7804_v38  ;;  %v7806_v31 = vadd.f32 %v4994_v46, %v4993_v50  ;;  %v7892_v38 = vpop.permute.xlu1 %3340 }
 0x615   : > { %9174 = vst [vmem:[#allocation46_spill] sm:$0xff] %v7806_v31 }
 0x617   : > { %v7808_v2 = vpop.f32.mrb[48].mxu0  ;;  %v7904_v19 = vpop.permute.xlu1 %3358 }
 0x618   : > { %v7810_v30 = vpop.f32.mrb[49].mxu0 }
 0x619   : > { %v2417_v16 = vmax.f32 %v7808_v2, %v7810_v30  ;;  %v7814_v40 = vpop.f32.mrb[50].mxu0 }
 0x61a   : > { %v7816_v59 = vpop.f32.mrb[51].mxu0 }
 0x61b   : > { %v2420_v12 = vmax.f32 %v7814_v40, %v7816_v59  ;;  %2418 = vmax.xlane.f32.xlu0 %v2417_v16  ;;  %v7912_v54 = vpop.permute.xlu1 %3342 }
 0x61d   : > { %2421 = vmax.xlane.f32.xlu1 %v2420_v12 }
 0x61f   : > { %v7820_v14 = vpop.f32.mrb[52].mxu0  ;;  %v7922_v61 = vpop.permute.xlu1 %3344 }
 0x620   : > { %v7822_v37 = vpop.f32.mrb[53].mxu0 }
 0x621   : > { %v2423_v63 = vmax.f32 %v7820_v14, %v7822_v37  ;;  %v7826_v48 = vpop.f32.mrb[54].mxu0 }
 0x622   : > { %v7828_v24 = vpop.f32.mrb[55].mxu0 }
 0x623   : > { %v2426_v36 = vmax.f32 %v7826_v48, %v7828_v24  ;;  %2424 = vmax.xlane.f32.xlu0 %v2423_v63 }
 0x625   : > { %2427 = vmax.xlane.f32.xlu1 %v2426_v36 }
 0x627   : > { %v7832_v28 = vpop.f32.mrb[56].mxu0 }
 0x628   : > { %v7834_v39 = vpop.f32.mrb[57].mxu0 }
 0x629   : > { %v2429_v62 = vmax.f32 %v7832_v28, %v7834_v39  ;;  %v7838_v33 = vpop.f32.mrb[58].mxu0 }
 0x62a   : > { %v7840_v58 = vpop.f32.mrb[59].mxu0 }
 0x62b   : > { %v2432_v41 = vmax.f32 %v7838_v33, %v7840_v58  ;;  %2430 = vmax.xlane.f32.xlu0 %v2429_v62 }
 0x62d   : > { %2433 = vmax.xlane.f32.xlu1 %v2432_v41 }
 0x62f   : > { %v7844_v57 = vpop.f32.mrb[60].mxu0 }
 0x630   : > { %v7846_v60 = vpop.f32.mrb[61].mxu0 }
 0x631   : > { %v2435_v27 = vmax.f32 %v7844_v57, %v7846_v60  ;;  %v7850_v51 = vpop.f32.mrb[62].mxu0 }
 0x632   : > { %v7852_v52 = vpop.f32.mrb[63].mxu0 }
 0x633   : > { %v2438_v55 = vmax.f32 %v7850_v51, %v7852_v52  ;;  %2436 = vmax.xlane.f32.xlu0 %v2435_v27 }
 0x635   : > { %2439 = vmax.xlane.f32.xlu1 %v2438_v55 }
 0x637   : > { %v7856_v42 = vpop.f32.mrb[64].mxu0 }
 0x638   : > { %v7858_v1 = vpop.f32.mrb[65].mxu0 }
 0x639   : > { %v2441_v10 = vmax.f32 %v7856_v42, %v7858_v1  ;;  %v7862_v26 = vpop.f32.mrb[66].mxu0 }
 0x63a   : > { %v7864_v6 = vpop.f32.mrb[67].mxu0 }
 0x63b   : > { %v2444_v45 = vmax.f32 %v7862_v26, %v7864_v6  ;;  %2442 = vmax.xlane.f32.xlu0 %v2441_v10 }
 0x63d   : > { %2445 = vmax.xlane.f32.xlu1 %v2444_v45 }
 0x63f   : > { %v7868_v50 = vpop.f32.mrb[68].mxu0 }
 0x640   : > { %v7870_v46 = vpop.f32.mrb[69].mxu0 }
 0x641   : > { %v2447_v16 = vmax.f32 %v7868_v50, %v7870_v46  ;;  %v7874_v12 = vpop.f32.mrb[70].mxu0 }
 0x642   : > { %v7876_v63 = vpop.f32.mrb[71].mxu0 }
 0x643   : > { %v2450_v36 = vmax.f32 %v7874_v12, %v7876_v63  ;;  %2448 = vmax.xlane.f32.xlu0 %v2447_v16 }
 0x647   : > { %2451 = vmax.xlane.f32.xlu0 %v2450_v36  ;;  %v7880_v62 = vpop.f32.mrb[72].mxu0 }
 0x648   : > { %v7882_v41 = vpop.f32.mrb[73].mxu0 }
 0x649   : > { %v2453_v27 = vmax.f32 %v7880_v62, %v7882_v41  ;;  %v7886_v55 = vpop.f32.mrb[74].mxu0 }
 0x64a   : > { %v7888_v10 = vpop.f32.mrb[75].mxu0 }
 0x64b   : > { %v2456_v45 = vmax.f32 %v7886_v55, %v7888_v10  ;;  %2454 = vmax.xlane.f32.xlu0 %v2453_v27 }
 0x64d   : > { %2457 = vmax.xlane.f32.xlu1 %v2456_v45 }
 0x64f   : > { %v7894_v16 = vpop.f32.mrb[76].mxu0 }
 0x650   : > { %9175 = vst [vmem:[#allocation43_spill] sm:$0xff] %v7894_v16  ;;  %v7896_v36 = vpop.f32.mrb[77].mxu0 }
 0x651   : > { %9176 = vst [vmem:[#allocation48_spill] sm:$0xff] %v7896_v36  ;;  %v2459_v31 = vmax.f32 %v7894_v16, %v7896_v36  ;;  %v7900_v29 = vpop.f32.mrb[78].mxu0 }
 0x652   : > { %9177 = vst [vmem:[#allocation45_spill] sm:$0xff] %v7900_v29  ;;  %v7902_v47 = vpop.f32.mrb[79].mxu0 }
 0x653   : > { %9178 = vst [vmem:[#allocation47_spill] sm:$0xff] %v7902_v47  ;;  %v2462_v0 = vmax.f32 %v7900_v29, %v7902_v47 }
 0x655   : > { %2463 = vmax.xlane.f32.xlu1 %v2462_v0 }
 0x657   : > { %v7908_v27 = vpop.f32.mrb[80].mxu0 }
 0x658   : > { %9179 = vst [vmem:[#allocation69_spill] sm:$0xff] %v7908_v27  ;;  %v7910_v45 = vpop.f32.mrb[81].mxu0 }
 0x659   : > { %9180 = vst [vmem:[#allocation70_spill] sm:$0xff] %v7910_v45  ;;  %v3132_v8 = vmax.f32 %v7908_v27, %v7910_v45  ;;  %v7916_v21 = vpop.f32.mrb[82].mxu0 }
 0x65a   : > { %9181 = vst [vmem:[#allocation71_spill] sm:$0xff] %v7916_v21  ;;  %v7918_v17 = vpop.f32.mrb[83].mxu0 }
 0x65b   : > { %9182 = vst [vmem:[#allocation72_spill] sm:$0xff] %v7918_v17  ;;  %v3135_v18 = vmax.f32 %v7916_v21, %v7918_v17 }
 0x65d   : > { %3136 = vmax.xlane.f32.xlu1 %v3135_v18  ;;  %v7937_v18 = vpop.permute.xlu1 %3346 }
 0x65f   : > { %v7924_v0 = vpop.f32.mrb[84].mxu0 }
 0x660   : > { %9183 = vst [vmem:[#allocation73_spill] sm:$0xff] %v7924_v0  ;;  %v7926_v44 = vpop.f32.mrb[85].mxu0 }
 0x661   : > { %9184 = vst [vmem:[#allocation74_spill] sm:$0xff] %v7926_v44  ;;  %v3138_v4 = vmax.f32 %v7924_v0, %v7926_v44  ;;  %4067 = vrot.lane.b32.xlu0 %v6124_v56, %s6477_s29  ;;  %v7931_v13 = vpop.f32.mrb[86].mxu0  ;;  %v7949_v56 = vpop.permute.xlu1 %3348 }
 0x662   : > { %9185 = vst [vmem:[#allocation75_spill] sm:$0xff] %v7931_v13  ;;  %v7933_v7 = vpop.f32.mrb[87].mxu0 }
 0x663   : > { %9186 = vst [vmem:[#allocation76_spill] sm:$0xff] %v7933_v7  ;;  %v3141_v43 = vmax.f32 %v7931_v13, %v7933_v7 }
 0x665   : > { %v7960_v13 = vpop.permute.xlu1 %3350 }
 0x667   : > { %v7939_v34 = vpop.f32.mrb[88].mxu0 }
 0x668   : > { %9187 = vst [vmem:[#allocation77_spill] sm:$0xff] %v7939_v34  ;;  %v7943_v11 = vpop.f32.mrb[89].mxu0 }
 0x669   : > { %9188 = vst [vmem:[#allocation78_spill] sm:$0xff] %v7943_v11  ;;  %v3144_v53 = vmax.f32 %v7939_v34, %v7943_v11  ;;  %v7947_v25 = vpop.f32.mrb[90].mxu0  ;;  %v7974_v44 = vpop.permute.xlu1 %3352 }
 0x66a   : > { %9189 = vst [vmem:[#allocation79_spill] sm:$0xff] %v7947_v25  ;;  %v7951_v35 = vpop.f32.mrb[91].mxu0 }
 0x66b   : > { %9190 = vst [vmem:[#allocation80_spill] sm:$0xff] %v7951_v35  ;;  %v3147_v15 = vmax.f32 %v7947_v25, %v7951_v35  ;;  %v7972_v25 = vpop.permute.xlu0 %3364 }
 0x66e   : > { %4051 = vrot.lane.b32.xlu1 %v6125_v22, %s6477_s29 }
 0x66f   : > { %v7958_v7 = vpop.f32.mrb[92].mxu0 }
 0x670   : > { %9191 = vst [vmem:[#allocation81_spill] sm:$0xff] %v7958_v7  ;;  %v7962_v9 = vpop.f32.mrb[93].mxu0 }
 0x671   : > { %9192 = vst [vmem:[#allocation82_spill] sm:$0xff] %v7962_v9  ;;  %v3150_v49 = vmax.f32 %v7958_v7, %v7962_v9  ;;  %v7966_v11 = vpop.f32.mrb[94].mxu0  ;;  %v7984_v9 = vpop.permute.xlu0 %3366 }
 0x672   : > { %9193 = vst [vmem:[#allocation83_spill] sm:$0xff] %v7966_v11  ;;  %v7968_v34 = vpop.f32.mrb[95].mxu0 }
 0x673   : > { %9194 = vst [vmem:[#allocation84_spill] sm:$0xff] %v7968_v34  ;;  %v3153_v35 = vmax.f32 %v7966_v11, %v7968_v34  ;;  %v7990_v11 = vpop.permute.xlu1 %3354 }
 0x675   : > { %v7994_v27 = vpop.permute.xlu0 %3368 }
 0x677   : > { %v7976_v22 = vpop.f32.mrb[96].mxu0  ;;  %v8002_v16 = vpop.permute.xlu1 %4039 }
 0x678   : > { %9195 = vst [vmem:[#allocation85_spill] sm:$0xff] %v7976_v22  ;;  %v7978_v0 = vpop.f32.mrb[97].mxu0  ;;  %9202 = vst [vmem:[#allocation92_spill] sm:$0xff] %v8002_v16 }
 0x679   : > { %9196 = vst [vmem:[#allocation86_spill] sm:$0xff] %v7978_v0  ;;  %v3156_v20 = vmax.f32 %v7976_v22, %v7978_v0  ;;  %v7982_v32 = vpop.f32.mrb[98].mxu0 }
 0x67a   : > { %9197 = vst [vmem:[#allocation87_spill] sm:$0xff] %v7982_v32  ;;  %v7986_v7 = vpop.f32.mrb[99].mxu0 }
 0x67b   : > { %9198 = vst [vmem:[#allocation88_spill] sm:$0xff] %v7986_v7  ;;  %v3159_v34 = vmax.f32 %v7982_v32, %v7986_v7  ;;  %v8008_v32 = vpop.permute.xlu0 %3370 }
 0x67f   : > { %v7992_v45 = vpop.f32.mrb[100].mxu0 }
 0x680   : > { %9199 = vst [vmem:[#allocation89_spill] sm:$0xff] %v7992_v45  ;;  %2460 = vmax.xlane.f32.xlu0 %v2459_v31  ;;  %v7996_v36 = vpop.f32.mrb[101].mxu0  ;;  %v8012_v31 = vpop.permute.xlu1 %4057 }
 0x681   : > { %9200 = vst [vmem:[#allocation90_spill] sm:$0xff] %v7996_v36  ;;  %v3162_v0 = vmax.f32 %v7992_v45, %v7996_v36  ;;  %v8000_v22 = vpop.f32.mrb[102].mxu0  ;;  %9205 = vst [vmem:[#allocation95_spill] sm:$0xff] %v8012_v31 }
 0x682   : > { %9201 = vst [vmem:[#allocation91_spill] sm:$0xff] %v8000_v22  ;;  %v8004_v23 = vpop.f32.mrb[103].mxu0 }
 0x683   : > { %9203 = vst [vmem:[#allocation93_spill] sm:$0xff] %v8004_v23  ;;  %v3165_v7 = vmax.f32 %v8000_v22, %v8004_v23 }
 0x684   : > { %3133 = vmax.xlane.f32.xlu0 %v3132_v8  ;;  %v8024_v8 = vpop.permute.xlu0 %4055  ;;  %v8026_v22 = vpop.permute.xlu1 %4041 }
 0x687   : > { %v8010_v17 = vpop.f32.mrb[104].mxu0 }
 0x688   : > { %9204 = vst [vmem:[#allocation94_spill] sm:$0xff] %v8010_v17  ;;  %3139 = vmax.xlane.f32.xlu0 %v3138_v4  ;;  %v8014_v21 = vpop.f32.mrb[105].mxu0  ;;  %v8036_v31 = vpop.permute.xlu0 %4059 }
 0x689   : > { %9206 = vst [vmem:[#allocation96_spill] sm:$0xff] %v8014_v21  ;;  %v3168_v36 = vmax.f32 %v8010_v17, %v8014_v21  ;;  %v8018_v45 = vpop.f32.mrb[106].mxu0  ;;  %9212 = vst [vmem:[#allocation102_spill] sm:$0xff] %v8036_v31 }
 0x68a   : > { %9207 = vst [vmem:[#allocation97_spill] sm:$0xff] %v8018_v45  ;;  %v8020_v16 = vpop.f32.mrb[107].mxu0 }
 0x68b   : > { %9208 = vst [vmem:[#allocation98_spill] sm:$0xff] %v8020_v16  ;;  %v3171_v23 = vmax.f32 %v8018_v45, %v8020_v16  ;;  %v8042_v16 = vpop.permute.xlu1 %4043 }
 0x68c   : > { %3145 = vmax.xlane.f32.xlu0 %v3144_v53  ;;  %v8046_v45 = vpop.permute.xlu0 %4061 }
 0x68f   : > { %v8028_v47 = vpop.f32.mrb[108].mxu0  ;;  %v8054_v31 = vpop.permute.xlu1 %4045 }
 0x690   : > { %9209 = vst [vmem:[#allocation99_spill] sm:$0xff] %v8028_v47  ;;  %3151 = vmax.xlane.f32.xlu0 %v3150_v49  ;;  %v8030_v4 = vpop.f32.mrb[109].mxu0  ;;  %9217 = vst [vmem:[#allocation107_spill] sm:$0xff] %v8054_v31 }
 0x691   : > { %9210 = vst [vmem:[#allocation100_spill] sm:$0xff] %v8030_v4  ;;  %v3174_v21 = vmax.f32 %v8028_v47, %v8030_v4  ;;  %v8034_v17 = vpop.f32.mrb[110].mxu0 }
 0x692   : > { %9211 = vst [vmem:[#allocation101_spill] sm:$0xff] %v8034_v17  ;;  %3142 = vmax.xlane.f32.xlu1 %v3141_v43  ;;  %v8038_v29 = vpop.f32.mrb[111].mxu0 }
 0x693   : > { %9213 = vst [vmem:[#allocation103_spill] sm:$0xff] %v8038_v29  ;;  %v3177_v53 = vmax.f32 %v8034_v17, %v8038_v29  ;;  %v8064_v17 = vpop.permute.xlu1 %4047 }
 0x694   : > { %3157 = vmax.xlane.f32.xlu0 %v3156_v20  ;;  %9221 = vst [vmem:[#allocation111_spill] sm:$0xff] %v8064_v17 }
 0x696   : > { %3148 = vmax.xlane.f32.xlu1 %v3147_v15  ;;  %v8060_v15 = vpop.permute.xlu0 %4063 }
 0x697   : > { %v8044_v49 = vpop.f32.mrb[112].mxu0  ;;  %9219 = vst [vmem:[#allocation109_spill] sm:$0xff] %v8060_v15 }
 0x698   : > { %9214 = vst [vmem:[#allocation104_spill] sm:$0xff] %v8044_v49  ;;  %3163 = vmax.xlane.f32.xlu0 %v3162_v0  ;;  %v8048_v4 = vpop.f32.mrb[113].mxu0 }
 0x699   : > { %9215 = vst [vmem:[#allocation105_spill] sm:$0xff] %v8048_v4  ;;  %v3831_v47 = vmax.f32 %v8044_v49, %v8048_v4  ;;  %v8052_v43 = vpop.f32.mrb[114].mxu0 }
 0x69a   : > { %9216 = vst [vmem:[#allocation106_spill] sm:$0xff] %v8052_v43  ;;  %3154 = vmax.xlane.f32.xlu1 %v3153_v35  ;;  %v8056_v29 = vpop.f32.mrb[115].mxu0 }
 0x69b   : > { %9218 = vst [vmem:[#allocation108_spill] sm:$0xff] %v8056_v29  ;;  %v3834_v20 = vmax.f32 %v8052_v43, %v8056_v29  ;;  %v8076_v29 = vpop.permute.xlu0 %4065 }
 0x69c   : > { %3166 = vmax.xlane.f32.xlu0 %v3165_v7  ;;  %9225 = vst [vmem:[#allocation115_spill] sm:$0xff] %v8076_v29 }
 0x69e   : > { %3160 = vmax.xlane.f32.xlu1 %v3159_v34  ;;  %v8078_v34 = vpop.permute.xlu1 %4049 }
 0x69f   : > { %v8062_v0 = vpop.f32.mrb[116].mxu0  ;;  %9226 = vst [vmem:[#allocation116_spill] sm:$0xff] %v8078_v34 }
 0x6a0   : > { %9220 = vst [vmem:[#allocation110_spill] sm:$0xff] %v8062_v0  ;;  %3169 = vmax.xlane.f32.xlu0 %v3168_v36  ;;  %v8066_v4 = vpop.f32.mrb[117].mxu0 }
 0x6a1   : > { %9222 = vst [vmem:[#allocation112_spill] sm:$0xff] %v8066_v4  ;;  %v3837_v49 = vmax.f32 %v8062_v0, %v8066_v4  ;;  %v8070_v35 = vpop.f32.mrb[118].mxu0 }
 0x6a2   : > { %9223 = vst [vmem:[#allocation113_spill] sm:$0xff] %v8070_v35  ;;  %3172 = vmax.xlane.f32.xlu1 %v3171_v23  ;;  %v8072_v31 = vpop.f32.mrb[119].mxu0 }
 0x6a3   : > { %9224 = vst [vmem:[#allocation114_spill] sm:$0xff] %v8072_v31  ;;  %v3840_v7 = vmax.f32 %v8070_v35, %v8072_v31 }
 0x6a4   : > { %3175 = vmax.xlane.f32.xlu0 %v3174_v21 }
 0x6a6   : > { %3178 = vmax.xlane.f32.xlu1 %v3177_v53 }
 0x6a7   : > { %v8080_v36 = vpop.f32.mrb[120].mxu0 }
 0x6a8   : > { %3832 = vmax.xlane.f32.xlu0 %v3831_v47  ;;  %v8082_v17 = vpop.f32.mrb[121].mxu0  ;;  %v2419_v4 = vpop.xlane.xlu0 %2418 }
 0x6a9   : > { %9227 = vst [vmem:[#allocation117_spill] sm:$0xff] %v8082_v17  ;;  %v3843_v23 = vmax.f32 %v8080_v36, %v8082_v17  ;;  %v2465_v0 = vsub.f32 %v7808_v2, %v2419_v4  ;;  %v2466_v43 = vsub.f32 %v7810_v30, %v2419_v4  ;;  %v8088_v31 = vpop.f32.mrb[122].mxu0 }
 0x6aa   : > { %v2422_v35 = vpop.xlane.xlu1 %2421  ;;  %3835 = vmax.xlane.f32.xlu1 %v3834_v20  ;;  %v8090_v21 = vpop.f32.mrb[123].mxu0 }
 0x6ab   : > { %v2497_v53 = vmul.f32 1.442695, %v2465_v0  ;;  %v2499_v34 = vmul.f32 1.442695, %v2466_v43  ;;  %v2467_v47 = vsub.f32 %v7814_v40, %v2422_v35  ;;  %v2468_v29 = vsub.f32 %v7816_v59, %v2422_v35 }
 0x6ac   : > { %v3846_v15 = vmax.f32 %v8088_v31, %v8090_v21  ;;  %3838 = vmax.xlane.f32.xlu0 %v3837_v49 }
 0x6ad   : > { %5804 = vpow2.f32 %v2497_v53  ;;  %v2501_v2 = vmul.f32 1.442695, %v2467_v47  ;;  %v2503_v17 = vmul.f32 1.442695, %v2468_v29 }
 0x6ae   : > { %5806 = vpow2.f32 %v2499_v34  ;;  %3841 = vmax.xlane.f32.xlu1 %v3840_v7 }
 0x6af   : > { %5808 = vpow2.f32 %v2501_v2  ;;  %v8096_v30 = vpop.f32.mrb[124].mxu0 }
 0x6b0   : > { %5810 = vpow2.f32 %v2503_v17  ;;  %3844 = vmax.xlane.f32.xlu0 %v3843_v23  ;;  %v8098_v4 = vpop.f32.mrb[125].mxu0  ;;  %v2425_v43 = vpop.xlane.xlu0 %2424 }
 0x6b1   : > { %9228 = vst [vmem:[#allocation118_spill] sm:$0xff] %v8098_v4  ;;  %v3849_v40 = vmax.f32 %v8096_v30, %v8098_v4  ;;  %v2469_v59 = vsub.f32 %v7820_v14, %v2425_v43  ;;  %v2470_v49 = vsub.f32 %v7822_v37, %v2425_v43  ;;  %v8104_v20 = vpop.f32.mrb[126].mxu0 }
 0x6b2   : > { %9229 = vst [vmem:[#allocation119_spill] sm:$0xff] %v8104_v20  ;;  %v2428_v29 = vpop.xlane.xlu1 %2427  ;;  %3847 = vmax.xlane.f32.xlu1 %v3846_v15  ;;  %v8106_v0 = vpop.f32.mrb[127].mxu0 }
 0x6b3   : > { %9230 = vst [vmem:[#allocation120_spill] sm:$0xff] %v8106_v0  ;;  %v2505_v35 = vmul.f32 1.442695, %v2469_v59  ;;  %v2507_v7 = vmul.f32 1.442695, %v2470_v49  ;;  %v2471_v17 = vsub.f32 %v7826_v48, %v2428_v29  ;;  %v2472_v34 = vsub.f32 %v7828_v24, %v2428_v29 }
 0x6b4   : > { %v3852_v23 = vmax.f32 %v8104_v20, %v8106_v0  ;;  %3850 = vmax.xlane.f32.xlu0 %v3849_v40 }
 0x6b5   : > { %5812 = vpow2.f32 %v2505_v35  ;;  %v2509_v14 = vmul.f32 1.442695, %v2471_v17  ;;  %v2511_v53 = vmul.f32 1.442695, %v2472_v34 }
 0x6b6   : > { %5814 = vpow2.f32 %v2507_v7  ;;  %3853 = vmax.xlane.f32.xlu1 %v3852_v23 }
 0x6b7   : > { %v5805_v37 = vpop.eup %5804  ;;  %5816 = vpow2.f32 %v2509_v14  ;;  %v8112_v15 = vpop.f32.mrb[128].mxu0 }
 0x6b8   : > { %v5807_v47 = vpop.eup %5806  ;;  %5818 = vpow2.f32 %v2511_v53  ;;  %v8114_v2 = vpop.f32.mrb[129].mxu0 }
 0x6b9   : > { %v2431_v48 = vpop.xlane.xlu0 %2430  ;;  %v5809_v43 = vpop.eup %5808  ;;  %v8122_v29 = vadd.f32 %v5807_v47, %v5805_v37 }
 0x6ba   : > { %v2473_v40 = vsub.f32 %v7832_v28, %v2431_v48  ;;  %v2474_v59 = vsub.f32 %v7834_v39, %v2431_v48  ;;  %v8120_v49 = vpop.f32.mrb[130].mxu0  ;;  %v5811_v35 = vpop.eup %5810  ;;  %v2609_v34 = vpack.c.bf16 %v5809_v43, %v5805_v37 }
 0x6bb   : > { %v2434_v7 = vpop.xlane.xlu1 %2433  ;;  %v8124_v17 = vpop.f32.mrb[131].mxu0  ;;  %v2610_v24 = vpack.c.bf16 %v5811_v35, %v5807_v47  ;;  %v8130_v39 = vadd.f32 %v5811_v35, %v5809_v43 }
 0x6bc   : > { %v2513_v23 = vmul.f32 1.442695, %v2473_v40  ;;  %v2515_v14 = vmul.f32 1.442695, %v2474_v59  ;;  %v2475_v53 = vsub.f32 %v7838_v33, %v2434_v7  ;;  %v2476_v0 = vsub.f32 %v7840_v58, %v2434_v7 }
 0x6bd   : > { %v3858_v28 = vmax.f32 %v8120_v49, %v8124_v17  ;;  %2721 = vmatprep.mubr.bf16.mxu1 %v2610_v24 }
 0x6be   : > { %5820 = vpow2.f32 %v2513_v23  ;;  %v2517_v48 = vmul.f32 1.442695, %v2475_v53  ;;  %v2519_v20 = vmul.f32 1.442695, %v2476_v0  ;;  %2722 = vmatmul.mubr.bf16.vlgmr.msra.gmra.mrb[32].mxu1 %v2609_v34 }
 0x6bf   : > { %5822 = vpow2.f32 %v2515_v14  ;;  %v5813_v4 = vpop.eup %5812  ;;  %v8132_v37 = vpop.f32.mrb[132].mxu0  ;;  %5125 = vmatpush3.bf16.msra.mxu1 %v7892_v38 }
 0x6c0   : > { %5824 = vpow2.f32 %v2517_v48  ;;  %v5815_v40 = vpop.eup %5814  ;;  %v8135_v33 = vpop.f32.mrb[133].mxu0  ;;  %5126 = vmatprep.subr.bf16.mxu1 %v7904_v19 }
 0x6c1   : > { %5826 = vpow2.f32 %v2519_v20  ;;  %v2437_v58 = vpop.xlane.xlu0 %2436  ;;  %v5817_v47 = vpop.eup %5816  ;;  %v8144_v35 = vadd.f32 %v5815_v40, %v5813_v4 }
 0x6c2   : > { %v2477_v43 = vsub.f32 %v7844_v57, %v2437_v58  ;;  %v2478_v24 = vsub.f32 %v7846_v60, %v2437_v58  ;;  %v8142_v59 = vpop.f32.mrb[134].mxu0  ;;  %v5819_v20 = vpop.eup %5818  ;;  %v2611_v34 = vpack.c.bf16 %v5817_v47, %v5813_v4 }
 0x6c3   : > { %v2440_v7 = vpop.xlane.xlu1 %2439  ;;  %v8146_v38 = vpop.f32.mrb[135].mxu0  ;;  %5127 = vmatpush3.bf16.msra.mxu1 %v7912_v54  ;;  %v2612_v60 = vpack.c.bf16 %v5819_v20, %v5815_v40  ;;  %v8153_v48 = vadd.f32 %v5819_v20, %v5817_v47 }
 0x6c4   : > { %v2521_v23 = vmul.f32 1.442695, %v2477_v43  ;;  %v2523_v14 = vmul.f32 1.442695, %v2478_v24  ;;  %v2479_v19 = vsub.f32 %v7850_v51, %v2440_v7  ;;  %v2480_v53 = vsub.f32 %v7852_v52, %v2440_v7  ;;  %5128 = vmatprep.subr.bf16.mxu1 %v7941_v5  ;;  %v6126_v51 = vld [vmem:[#allocation3 + $0x38] sm:$0xff] }
 0x6c5   : > { %v3864_v57 = vmax.f32 %v8142_v59, %v8146_v38  ;;  %2729 = vmatprep.mubr.bf16.mxu1 %v2612_v60 }
 0x6c6   : > { %5828 = vpow2.f32 %v2521_v23  ;;  %v2525_v58 = vmul.f32 1.442695, %v2479_v19  ;;  %v2527_v0 = vmul.f32 1.442695, %v2480_v53  ;;  %2730 = vmatmul.mubr.bf16.gmra.mrb[36].mxu1 %v2611_v34 }
 0x6c7   : > { %5830 = vpow2.f32 %v2523_v14  ;;  %4053 = vrot.lane.b32.xlu1 %v6126_v51, %s6477_s29  ;;  %v8157_v54 = vpop.f32.mrb[136].mxu0  ;;  %5129 = vmatpush3.bf16.msra.mxu1 %v7922_v61  ;;  %v6127_v61 = vld [vmem:[#allocation3 + $0x78] sm:$0xff] }
 0x6c8   : > { %v5821_v4 = vpop.eup %5820  ;;  %5832 = vpow2.f32 %v2525_v58  ;;  %v8160_v40 = vpop.f32.mrb[137].mxu0  ;;  %5130 = vmatprep.subr.bf16.mxu1 %v7955_v3 }
 0x6c9   : > { %v5823_v52 = vpop.eup %5822  ;;  %5834 = vpow2.f32 %v2527_v0  ;;  %v2443_v47 = vpop.xlane.xlu0 %2442  ;;  %v3867_v5 = vmax.f32 %v8157_v54, %v8160_v40 }
 0x6ca   : > { %v5825_v43 = vpop.eup %5824  ;;  %v2481_v24 = vsub.f32 %v7856_v42, %v2443_v47  ;;  %v2482_v20 = vsub.f32 %v7858_v1, %v2443_v47  ;;  %v8167_v7 = vpop.f32.mrb[138].mxu0  ;;  %v8169_v34 = vadd.f32 %v5823_v52, %v5821_v4  ;;  %4069 = vrot.lane.b32.xlu0 %v6127_v61, %s6477_s29 }
 0x6cb   : > { %v5827_v0 = vpop.eup %5826  ;;  %v2446_v23 = vpop.xlane.xlu1 %2445  ;;  %v2613_v19 = vpack.c.bf16 %v5825_v43, %v5821_v4  ;;  %5131 = vmatpush3.bf16.msra.mxu1 %v7937_v18 }
 0x6cc   : > { %v8172_v14 = vpop.f32.mrb[139].mxu0  ;;  %v2529_v3 = vmul.f32 1.442695, %v2481_v24  ;;  %v2531_v53 = vmul.f32 1.442695, %v2482_v20  ;;  %v2483_v60 = vsub.f32 %v7862_v26, %v2446_v23  ;;  %v2484_v42 = vsub.f32 %v7864_v6, %v2446_v23  ;;  %5132 = vmatprep.subr.bf16.mxu1 %v7972_v25 }
 0x6cd   : > { %v3870_v1 = vmax.f32 %v8167_v7, %v8172_v14  ;;  %v2614_v58 = vpack.c.bf16 %v5827_v0, %v5823_v52  ;;  %v8179_v51 = vadd.f32 %v5827_v0, %v5825_v43 }
 0x6ce   : > { %5836 = vpow2.f32 %v2529_v3  ;;  %v2533_v47 = vmul.f32 1.442695, %v2483_v60  ;;  %v2535_v61 = vmul.f32 1.442695, %v2484_v42 }
 0x6cf   : > { %5838 = vpow2.f32 %v2531_v53  ;;  %2737 = vmatprep.mubr.bf16.mxu1 %v2614_v58  ;;  %v8182_v26 = vpop.f32.mrb[140].mxu0  ;;  %5133 = vmatpush3.bf16.msra.mxu1 %v7949_v56 }
 0x6d0   : > { %v5829_v4 = vpop.eup %5828  ;;  %5840 = vpow2.f32 %v2533_v47  ;;  %2738 = vmatmul.mubr.bf16.gmra.mrb[40].mxu1 %v2613_v19  ;;  %v8185_v18 = vpop.f32.mrb[141].mxu0  ;;  %5134 = vmatprep.subr.bf16.mxu1 %v7984_v9 }
 0x6d1   : > { %v5831_v6 = vpop.eup %5830  ;;  %5842 = vpow2.f32 %v2535_v61  ;;  %v2449_v52 = vpop.xlane.xlu0 %2448  ;;  %v3873_v25 = vmax.f32 %v8182_v26, %v8185_v18 }
 0x6d2   : > { %v5833_v43 = vpop.eup %5832  ;;  %v2485_v24 = vsub.f32 %v7868_v50, %v2449_v52  ;;  %v2486_v20 = vsub.f32 %v7870_v46, %v2449_v52  ;;  %v8192_v0 = vpop.f32.mrb[142].mxu0  ;;  %v8194_v23 = vadd.f32 %v5831_v6, %v5829_v4 }
 0x6d3   : > { %v5835_v19 = vpop.eup %5834  ;;  %v8196_v3 = vpop.f32.mrb[143].mxu0  ;;  %v2615_v56 = vpack.c.bf16 %v5833_v43, %v5829_v4  ;;  %5135 = vmatpush3.bf16.msra.mxu1 %v7960_v13 }
 0x6d4   : > { %v2537_v53 = vmul.f32 1.442695, %v2485_v24  ;;  %v2539_v60 = vmul.f32 1.442695, %v2486_v20  ;;  %v3876_v9 = vmax.f32 %v8192_v0, %v8196_v3  ;;  %v2616_v42 = vpack.c.bf16 %v5835_v19, %v5831_v6  ;;  %5136 = vmatprep.subr.bf16.mxu1 %v7994_v27 }
 0x6d5   : > { %v2452_v58 = vpop.xlane.xlu0 %2451  ;;  %v8201_v50 = vadd.f32 %v5835_v19, %v5833_v43 }
 0x6d6   : > { %5844 = vpow2.f32 %v2537_v53  ;;  %2745 = vmatprep.mubr.bf16.mxu1 %v2616_v42  ;;  %v2487_v46 = vsub.f32 %v7874_v12, %v2452_v58  ;;  %v2488_v47 = vsub.f32 %v7876_v63, %v2452_v58 }
 0x6d7   : > { %5846 = vpow2.f32 %v2539_v60  ;;  %5137 = vmatpush3.bf16.msra.mxu1 %v7974_v44 }
 0x6d8   : > { %v5837_v61 = vpop.eup %5836  ;;  %v2541_v4 = vmul.f32 1.442695, %v2487_v46  ;;  %v2543_v52 = vmul.f32 1.442695, %v2488_v47  ;;  %2746 = vmatmul.mubr.bf16.gmra.mrb[44].mxu1 %v2615_v56  ;;  %5138 = vmatprep.subr.bf16.mxu1 %v8008_v32 }
 0x6d9   : > { %v5839_v24 = vpop.eup %5838  ;;  %v2455_v13 = vpop.xlane.xlu0 %2454 }
 0x6da   : > { %v5841_v6 = vpop.eup %5840  ;;  %5848 = vpow2.f32 %v2541_v4  ;;  %v2489_v27 = vsub.f32 %v7880_v62, %v2455_v13  ;;  %v2490_v43 = vsub.f32 %v7882_v41, %v2455_v13  ;;  %v8210_v12 = vadd.f32 %v5839_v24, %v5837_v61  ;;  %v2458_v20 = vpop.xlane.xlu1 %2457  ;;  %v9232_v4 = vld [vmem:[#allocation47_spill] sm:$0xff] }
 0x6db   : > { %v5843_v63 = vpop.eup %5842  ;;  %5850 = vpow2.f32 %v2543_v52  ;;  %v2617_v19 = vpack.c.bf16 %v5841_v6, %v5837_v61  ;;  %v2491_v60 = vsub.f32 %v7886_v55, %v2458_v20  ;;  %v2492_v44 = vsub.f32 %v7888_v10, %v2458_v20  ;;  %5139 = vmatpush3.bf16.msra.mxu1 %v7990_v11  ;;  %v9231_v11 = vld [vmem:[#allocation45_spill] sm:$0xff] }
 0x6dc   : > { %v2545_v53 = vmul.f32 1.442695, %v2489_v27  ;;  %v2547_v56 = vmul.f32 1.442695, %v2490_v43  ;;  %v2618_v42 = vpack.c.bf16 %v5843_v63, %v5839_v24  ;;  %v8215_v32 = vadd.f32 %v5843_v63, %v5841_v6  ;;  %5220 = vmatprep.subr.bf16.mxu1 %v8024_v8 }
 0x6dd   : > { %v2549_v62 = vmul.f32 1.442695, %v2491_v60  ;;  %v2551_v41 = vmul.f32 1.442695, %v2492_v44 }
 0x6de   : > { %5852 = vpow2.f32 %v2545_v53  ;;  %2753 = vmatprep.mubr.bf16.mxu1 %v2618_v42  ;;  %v9233_v53 = vmax.f32 %v8112_v15, %v8114_v2 }
 0x6df   : > { %5854 = vpow2.f32 %v2547_v56 }
 0x6e0   : > { %v5845_v58 = vpop.eup %5844  ;;  %5856 = vpow2.f32 %v2549_v62  ;;  %2754 = vmatmul.mubr.bf16.gmra.mrb[48].mxu1 %v2617_v19  ;;  %v9234_v62 = vld [vmem:[#allocation71_spill] sm:$0xff] }
 0x6e1   : > { %v5847_v46 = vpop.eup %5846  ;;  %5858 = vpow2.f32 %v2551_v41 }
 0x6e2   : > { %v8218_v55 = vadd.f32 %v5847_v46, %v5845_v58  ;;  %v2464_v10 = vpop.xlane.xlu1 %2463 }
 0x6e3   : > { %v2495_v61 = vsub.f32 %v9231_v11, %v2464_v10  ;;  %v2496_v52 = vsub.f32 %v9232_v4, %v2464_v10  ;;  %v9236_v4 = vmax.f32 %v8132_v37, %v8135_v33 }
 0x6e4   : > { %v5849_v47 = vpop.eup %5848 }
 0x6e5   : > { %v5851_v24 = vpop.eup %5850  ;;  %v2619_v13 = vpack.c.bf16 %v5849_v47, %v5845_v58  ;;  %v2557_v6 = vmul.f32 1.442695, %v2495_v61  ;;  %v2559_v27 = vmul.f32 1.442695, %v2496_v52  ;;  %v9235_v58 = vld [vmem:[#allocation72_spill] sm:$0xff] }
 0x6e6   : > { %v2620_v8 = vpack.c.bf16 %v5851_v24, %v5847_v46  ;;  %v2594_v43 = vadd.f32 %v5851_v24, %v5849_v47 }
 0x6e7   : > { %5860 = vpow2.f32 %v2557_v6 }
 0x6e8   : > { %v5853_v63 = vpop.eup %5852  ;;  %2761 = vmatprep.mubr.bf16.mxu1 %v2620_v8  ;;  %5862 = vpow2.f32 %v2559_v27  ;;  %v9241_v27 = vld [vmem:[#allocation70_spill] sm:$0xff]  ;;  %v9242_v8 = vld [vmem:[#allocation67_spill] sm:$0xff] }
 0x6e9   : > { %v5855_v20 = vpop.eup %5854  ;;  %2762 = vmatmul.mubr.bf16.gmra.mrb[52].mxu1 %v2619_v13  ;;  %3856 = vmax.xlane.f32.xlu0 %v9233_v53 }
 0x6ea   : > { %v5857_v19 = vpop.eup %5856  ;;  %v2597_v56 = vadd.f32 %v5855_v20, %v5853_v63  ;;  %v3137_v44 = vpop.xlane.xlu1 %3136 }
 0x6eb   : > { %v5859_v60 = vpop.eup %5858  ;;  %v2621_v42 = vpack.c.bf16 %v5857_v19, %v5853_v63  ;;  %v3182_v41 = vsub.f32 %v9234_v62, %v3137_v44  ;;  %v3183_v46 = vsub.f32 %v9235_v58, %v3137_v44  ;;  %3859 = vmax.xlane.f32.xlu1 %v3858_v28 }
 0x6ec   : > { %v2622_v10 = vpack.c.bf16 %v5859_v60, %v5855_v20  ;;  %v2600_v47 = vadd.f32 %v5859_v60, %v5857_v19  ;;  %v9243_v20 = vld [vmem:[#allocation58_spill] sm:$0xff] }
 0x6ed   : > { %v3216_v11 = vmul.f32 1.442695, %v3182_v41  ;;  %v3218_v61 = vmul.f32 1.442695, %v3183_v46  ;;  %3862 = vmax.xlane.f32.xlu0 %v9236_v4  ;;  %v9245_v60 = vld [vmem:[#allocation74_spill] sm:$0xff]  ;;  %v9246_v41 = vld [vmem:[#allocation77_spill] sm:$0xff] }
 0x6ee   : > { %2769 = vmatprep.mubr.bf16.mxu1 %v2622_v10  ;;  %v9247_v46 = vld [vmem:[#allocation78_spill] sm:$0xff] }
 0x6ef   : > { %5864 = vpow2.f32 %v3216_v11  ;;  %3871 = vmax.xlane.f32.xlu1 %v3870_v1  ;;  %v8286_v11 = vpop.permute.xlu1 %4051 }
 0x6f0   : > { %5866 = vpow2.f32 %v3218_v61  ;;  %v9248_v61 = vld [vmem:[#allocation61_spill] sm:$0xff] }
 0x6f1   : > { %2770 = vmatmul.mubr.bf16.gmra.mrb[56].mxu1 %v2621_v42  ;;  %v8236_v52 = vpop.eup %5860  ;;  %3865 = vmax.xlane.f32.xlu0 %v3864_v57 }
 0x6f2   : > { %v8241_v28 = vpop.eup %5862 }
 0x6f3   : > { %3877 = vmax.xlane.f32.xlu1 %v3876_v9  ;;  %v2606_v24 = vadd.f32 %v8241_v28, %v8236_v52 }
 0x6f5   : > { %3868 = vmax.xlane.f32.xlu0 %v3867_v5 }
 0x6f7   : > { %2565 = vadd.xlane.f32.xlu1 %v8130_v39  ;;  %v8270_v39 = vpop.permute.xlu0 %4067 }
 0x6f9   : > { %v8252_v1 = vpop.eup %5864  ;;  %3874 = vmax.xlane.f32.xlu0 %v3873_v25 }
 0x6fa   : > { %v8257_v57 = vpop.eup %5866 }
 0x6fb   : > { %2571 = vadd.xlane.f32.xlu1 %v8153_v48  ;;  %v8262_v9 = vadd.f32 %v8257_v57, %v8252_v1  ;;  %v9237_v48 = vld [vmem:[#allocation59_spill] sm:$0xff] }
 0x6fd   : > { %2562 = vadd.xlane.f32.xlu0 %v8122_v29  ;;  %v9238_v29 = vld [vmem:[#allocation43_spill] sm:$0xff] }
 0x6ff   : > { %2577 = vadd.xlane.f32.xlu1 %v8179_v51  ;;  %v9239_v51 = vld [vmem:[#allocation48_spill] sm:$0xff] }
 0x701   : > { %2568 = vadd.xlane.f32.xlu0 %v8144_v35 }
 0x703   : > { %2583 = vadd.xlane.f32.xlu1 %v8201_v50 }
 0x705   : > { %2574 = vadd.xlane.f32.xlu0 %v8169_v34 }
 0x707   : > { %2589 = vadd.xlane.f32.xlu1 %v8215_v32  ;;  %v9240_v32 = vld [vmem:[#allocation69_spill] sm:$0xff] }
 0x709   : > { %2586 = vadd.xlane.f32.xlu0 %v8210_v12 }
 0x70b   : > { %1955 = vadd.xlane.f32.xlu1 %v9237_v48 }
 0x70d   : > { %2580 = vadd.xlane.f32.xlu0 %v8194_v23  ;;  %v2461_v5 = vpop.xlane.xlu0 %2460 }
 0x70e   : > { %v2493_v25 = vsub.f32 %v9238_v29, %v2461_v5  ;;  %v2494_v13 = vsub.f32 %v9239_v51, %v2461_v5  ;;  %v9250_v51 = vld [vmem:[#allocation81_spill] sm:$0xff] }
 0x70f   : > { %2595 = vadd.xlane.f32.xlu1 %v2594_v43  ;;  %v9244_v43 = vld [vmem:[#allocation73_spill] sm:$0xff] }
 0x710   : > { %v2553_v35 = vmul.f32 1.442695, %v2493_v25  ;;  %v2555_v50 = vmul.f32 1.442695, %v2494_v13  ;;  %v9249_v25 = vld [vmem:[#allocation66_spill] sm:$0xff] }
 0x711   : > { %2592 = vadd.xlane.f32.xlu0 %v8218_v55  ;;  %v3134_v34 = vpop.xlane.xlu0 %3133 }
 0x712   : > { %5868 = vpow2.f32 %v2553_v35  ;;  %v3180_v6 = vsub.f32 %v9240_v32, %v3134_v34  ;;  %v3181_v12 = vsub.f32 %v9241_v27, %v3134_v34  ;;  %v9251_v35 = vld [vmem:[#allocation82_spill] sm:$0xff] }
 0x713   : > { %5870 = vpow2.f32 %v2555_v50  ;;  %1979 = vadd.xlane.f32.xlu1 %v9242_v8 }
 0x714   : > { %v3212_v23 = vmul.f32 1.442695, %v3180_v6  ;;  %v3214_v63 = vmul.f32 1.442695, %v3181_v12 }
 0x715   : > { %1952 = vadd.xlane.f32.xlu0 %v9243_v20  ;;  %v3140_v19 = vpop.xlane.xlu0 %3139  ;;  %v9253_v20 = vld [vmem:[#allocation76_spill] sm:$0xff] }
 0x716   : > { %5872 = vpow2.f32 %v3212_v23  ;;  %v3184_v53 = vsub.f32 %v9244_v43, %v3140_v19  ;;  %v3185_v44 = vsub.f32 %v9245_v60, %v3140_v19  ;;  %v9252_v23 = vld [vmem:[#allocation75_spill] sm:$0xff] }
 0x717   : > { %5874 = vpow2.f32 %v3214_v63  ;;  %2601 = vadd.xlane.f32.xlu1 %v2600_v47 }
 0x718   : > { %v3220_v55 = vmul.f32 1.442695, %v3184_v53  ;;  %v3222_v42 = vmul.f32 1.442695, %v3185_v44  ;;  %v9254_v44 = vld [vmem:[#allocation85_spill] sm:$0xff] }
 0x719   : > { %2598 = vadd.xlane.f32.xlu0 %v2597_v56  ;;  %v3146_v62 = vpop.xlane.xlu0 %3145 }
 0x71a   : > { %5876 = vpow2.f32 %v3220_v55  ;;  %v3188_v58 = vsub.f32 %v9246_v41, %v3146_v62  ;;  %v3189_v10 = vsub.f32 %v9247_v46, %v3146_v62  ;;  %v9255_v55 = vld [vmem:[#allocation86_spill] sm:$0xff]  ;;  %v9256_v41 = vld [vmem:[#allocation68_spill] sm:$0xff] }
 0x71b   : > { %5878 = vpow2.f32 %v3222_v42  ;;  %1961 = vadd.xlane.f32.xlu1 %v9248_v61 }
 0x71c   : > { %v5869_v4 = vpop.eup %5868  ;;  %v3228_v48 = vmul.f32 1.442695, %v3188_v58  ;;  %v3230_v5 = vmul.f32 1.442695, %v3189_v10 }
 0x71d   : > { %v5871_v29 = vpop.eup %5870  ;;  %1976 = vadd.xlane.f32.xlu0 %v9249_v25  ;;  %v3152_v47 = vpop.xlane.xlu0 %3151  ;;  %v2623_v56 = vpack.c.bf16 %v8236_v52, %v5869_v4 }
 0x71e   : > { %5880 = vpow2.f32 %v3228_v48  ;;  %v3192_v13 = vsub.f32 %v9250_v51, %v3152_v47  ;;  %v3193_v50 = vsub.f32 %v9251_v35, %v3152_v47  ;;  %v2624_v34 = vpack.c.bf16 %v8241_v28, %v5871_v29  ;;  %v9258_v48 = vld [vmem:[#allocation80_spill] sm:$0xff] }
 0x71f   : > { %5882 = vpow2.f32 %v3230_v5  ;;  %v3143_v32 = vpop.xlane.xlu1 %3142  ;;  %2607 = vadd.xlane.f32.xlu1 %v2606_v24  ;;  %v2603_v6 = vadd.f32 %v5871_v29, %v5869_v4  ;;  %v9257_v4 = vld [vmem:[#allocation79_spill] sm:$0xff]  ;;  %v9259_v47 = vld [vmem:[#allocation60_spill] sm:$0xff] }
 0x720   : > { %v5873_v27 = vpop.eup %5872  ;;  %v3236_v12 = vmul.f32 1.442695, %v3192_v13  ;;  %v3238_v8 = vmul.f32 1.442695, %v3193_v50  ;;  %v3186_v63 = vsub.f32 %v9252_v23, %v3143_v32  ;;  %v3187_v19 = vsub.f32 %v9253_v20, %v3143_v32  ;;  %2777 = vmatprep.mubr.bf16.mxu1 %v2624_v34  ;;  %v9260_v13 = vld [vmem:[#allocation89_spill] sm:$0xff]  ;;  %v9261_v50 = vld [vmem:[#allocation90_spill] sm:$0xff] }
 0x721   : > { %v5875_v52 = vpop.eup %5874  ;;  %2778 = vmatmul.mubr.bf16.gmra.mrb[60].mxu1 %v2623_v56  ;;  %2604 = vadd.xlane.f32.xlu0 %v2603_v6  ;;  %v3158_v43 = vpop.xlane.xlu0 %3157  ;;  %v3324_v53 = vpack.c.bf16 %v8252_v1, %v5873_v27 }
 0x722   : > { %5884 = vpow2.f32 %v3236_v12  ;;  %v3224_v28 = vmul.f32 1.442695, %v3186_v63  ;;  %v3226_v60 = vmul.f32 1.442695, %v3187_v19  ;;  %v3196_v24 = vsub.f32 %v9254_v44, %v3158_v43  ;;  %v9263_v63 = vld [vmem:[#allocation84_spill] sm:$0xff]  ;;  %v9265_v44 = vld [vmem:[#allocation91_spill] sm:$0xff] }
 0x723   : > { %5886 = vpow2.f32 %v3238_v8  ;;  %v3197_v42 = vsub.f32 %v9255_v55, %v3158_v43  ;;  %v3149_v62 = vpop.xlane.xlu1 %3148  ;;  %1985 = vadd.xlane.f32.xlu1 %v9256_v41  ;;  %v3325_v58 = vpack.c.bf16 %v8257_v57, %v5875_v52  ;;  %v3276_v46 = vadd.f32 %v5875_v52, %v5873_v27  ;;  %v9262_v8 = vld [vmem:[#allocation83_spill] sm:$0xff] }
 0x724   : > { %v8301_v10 = vpop.eup %5876  ;;  %5888 = vpow2.f32 %v3224_v28  ;;  %v3244_v61 = vmul.f32 1.442695, %v3196_v24  ;;  %v3190_v1 = vsub.f32 %v9257_v4, %v3149_v62  ;;  %v3191_v5 = vsub.f32 %v9258_v48, %v3149_v62  ;;  %v9266_v55 = vld [vmem:[#allocation95_spill] sm:$0xff]  ;;  %v9270_v48 = vld [vmem:[#allocation88_spill] sm:$0xff] }
 0x725   : > { %v8305_v29 = vpop.eup %5878  ;;  %5890 = vpow2.f32 %v3226_v60  ;;  %v3246_v25 = vmul.f32 1.442695, %v3197_v42  ;;  %3420 = vmatprep.mubr.bf16.mxu1 %v3325_v58  ;;  %1958 = vadd.xlane.f32.xlu0 %v9259_v47  ;;  %v3164_v56 = vpop.xlane.xlu0 %3163  ;;  %v9264_v60 = vld [vmem:[#allocation92_spill] sm:$0xff]  ;;  %v9267_v42 = vld [vmem:[#allocation93_spill] sm:$0xff]  ;;  %v9268_v58 = vld [vmem:[#allocation63_spill] sm:$0xff] }
 0x726   : > { %5892 = vpow2.f32 %v3244_v61  ;;  %v3232_v51 = vmul.f32 1.442695, %v3190_v1  ;;  %v3234_v57 = vmul.f32 1.442695, %v3191_v5  ;;  %v3200_v35 = vsub.f32 %v9260_v13, %v3164_v56  ;;  %v9269_v4 = vld [vmem:[#allocation87_spill] sm:$0xff] }
 0x727   : > { %5894 = vpow2.f32 %v3246_v25  ;;  %v3201_v34 = vsub.f32 %v9261_v50, %v3164_v56  ;;  %v3155_v32 = vpop.xlane.xlu1 %3154  ;;  %3280 = vadd.xlane.f32.xlu1 %v8262_v9  ;;  %v3282_v6 = vadd.f32 %v8305_v29, %v8301_v10  ;;  %v9271_v56 = vld [vmem:[#allocation57_spill] sm:$0xff]  ;;  %v9272_v50 = vld [vmem:[#allocation94_spill] sm:$0xff] }
 0x728   : > { %v8313_v27 = vpop.eup %5880  ;;  %5896 = vpow2.f32 %v3232_v51  ;;  %v3252_v12 = vmul.f32 1.442695, %v3200_v35  ;;  %v3194_v23 = vsub.f32 %v9262_v8, %v3155_v32  ;;  %v3195_v20 = vsub.f32 %v9263_v63, %v3155_v32  ;;  %v9274_v8 = vld [vmem:[#allocation96_spill] sm:$0xff] }
 0x729   : > { %v8317_v19 = vpop.eup %5882  ;;  %5898 = vpow2.f32 %v3234_v57  ;;  %v3254_v52 = vmul.f32 1.442695, %v3201_v34  ;;  %3421 = vmatmul.mubr.bf16.vlgmr.msra.gmra.mrb[64].mxu1 %v3324_v53  ;;  %3277 = vadd.xlane.f32.xlu0 %v3276_v46  ;;  %v3167_v43 = vpop.xlane.xlu0 %3166 }
 0x72a   : > { %5900 = vpow2.f32 %v3252_v12  ;;  %v3240_v9 = vmul.f32 1.442695, %v3194_v23  ;;  %v3242_v28 = vmul.f32 1.442695, %v3195_v20  ;;  %5221 = vmatpush3.bf16.msra.mxu1 %v9264_v60  ;;  %v3202_v24 = vsub.f32 %v9265_v44, %v3167_v43  ;;  %v9273_v12 = vld [vmem:[#allocation102_spill] sm:$0xff] }
 0x72b   : > { %5902 = vpow2.f32 %v3254_v52  ;;  %5222 = vmatprep.subr.bf16.mxu1 %v9266_v55  ;;  %v3203_v62 = vsub.f32 %v9267_v42, %v3167_v43  ;;  %v3161_v41 = vpop.xlane.xlu1 %3160  ;;  %1967 = vadd.xlane.f32.xlu1 %v9268_v58  ;;  %v8326_v53 = vadd.f32 %v8317_v19, %v8313_v27  ;;  %v9276_v60 = vld [vmem:[#allocation98_spill] sm:$0xff] }
 0x72c   : > { %v8328_v46 = vpop.eup %5884  ;;  %5904 = vpow2.f32 %v3240_v9  ;;  %v3256_v61 = vmul.f32 1.442695, %v3202_v24  ;;  %v3198_v1 = vsub.f32 %v9269_v4, %v3161_v41  ;;  %v3199_v5 = vsub.f32 %v9270_v48, %v3161_v41  ;;  %v9277_v4 = vld [vmem:[#allocation99_spill] sm:$0xff] }
 0x72d   : > { %v8332_v25 = vpop.eup %5886  ;;  %5906 = vpow2.f32 %v3242_v28  ;;  %v3258_v47 = vmul.f32 1.442695, %v3203_v62  ;;  %1982 = vadd.xlane.f32.xlu0 %v9271_v56  ;;  %v3170_v51 = vpop.xlane.xlu0 %3169 }
 0x72e   : > { %v5889_v57 = vpop.eup %5888  ;;  %5908 = vpow2.f32 %v3256_v61  ;;  %v3248_v13 = vmul.f32 1.442695, %v3198_v1  ;;  %v3250_v35 = vmul.f32 1.442695, %v3199_v5  ;;  %5223 = vmatpush3.bf16.msra.mxu1 %v8026_v22  ;;  %v3204_v34 = vsub.f32 %v9272_v50, %v3170_v51  ;;  %v9275_v22 = vld [vmem:[#allocation97_spill] sm:$0xff]  ;;  %v9278_v5 = vld [vmem:[#allocation100_spill] sm:$0xff] }
 0x72f   : > { %v5891_v32 = vpop.eup %5890  ;;  %5910 = vpow2.f32 %v3258_v47  ;;  %5224 = vmatprep.subr.bf16.mxu1 %v9273_v12  ;;  %v3205_v23 = vsub.f32 %v9274_v8, %v3170_v51  ;;  %v3173_v63 = vpop.xlane.xlu1 %3172  ;;  %v3326_v20 = vpack.c.bf16 %v5889_v57, %v8301_v10  ;;  %v8342_v52 = vadd.f32 %v8332_v25, %v8328_v46 }
 0x730   : > { %v8344_v43 = vpop.eup %5892  ;;  %5912 = vpow2.f32 %v3248_v13  ;;  %v3260_v9 = vmul.f32 1.442695, %v3204_v34  ;;  %v3206_v28 = vsub.f32 %v9275_v22, %v3173_v63  ;;  %v3207_v44 = vsub.f32 %v9276_v60, %v3173_v63  ;;  %v9283_v22 = vld [vmem:[#allocation104_spill] sm:$0xff] }
 0x731   : > { %v8348_v24 = vpop.eup %5894  ;;  %5914 = vpow2.f32 %v3250_v35  ;;  %v3262_v55 = vmul.f32 1.442695, %v3205_v23  ;;  %v3285_v42 = vadd.f32 %v5891_v32, %v5889_v57  ;;  %v3327_v62 = vpack.c.bf16 %v5891_v32, %v8305_v29  ;;  %3283 = vadd.xlane.f32.xlu0 %v3282_v6  ;;  %v3176_v10 = vpop.xlane.xlu0 %3175  ;;  %v9279_v57 = vld [vmem:[#allocation101_spill] sm:$0xff]  ;;  %v9280_v35 = vld [vmem:[#allocation103_spill] sm:$0xff] }
 0x732   : > { %v8351_v41 = vpop.eup %5896  ;;  %5916 = vpow2.f32 %v3260_v9  ;;  %v3264_v58 = vmul.f32 1.442695, %v3206_v28  ;;  %v3266_v61 = vmul.f32 1.442695, %v3207_v44  ;;  %5225 = vmatpush3.bf16.msra.mxu1 %v8042_v16  ;;  %v3208_v1 = vsub.f32 %v9277_v4, %v3176_v10  ;;  %v9282_v9 = vld [vmem:[#allocation107_spill] sm:$0xff]  ;;  %v9284_v44 = vld [vmem:[#allocation49_spill] sm:$0xff] }
 0x733   : > { %v5899_v48 = vpop.eup %5898  ;;  %5918 = vpow2.f32 %v3262_v55  ;;  %3286 = vadd.xlane.f32.xlu1 %v3285_v42  ;;  %3428 = vmatprep.mubr.bf16.mxu1 %v3327_v62  ;;  %v3209_v47 = vsub.f32 %v9278_v5, %v3176_v10  ;;  %v3179_v56 = vpop.xlane.xlu1 %3178  ;;  %v3328_v29 = vpack.c.bf16 %v8351_v41, %v8313_v27  ;;  %v8360_v6 = vadd.f32 %v8348_v24, %v8344_v43  ;;  %v9281_v27 = vld [vmem:[#allocation62_spill] sm:$0xff]  ;;  %v9285_v55 = vld [vmem:[#allocation109_spill] sm:$0xff] }
 0x734   : > { %v8362_v51 = vpop.eup %5900  ;;  %5920 = vpow2.f32 %v3264_v58  ;;  %5226 = vmatprep.subr.bf16.mxu1 %v8046_v45  ;;  %v3268_v16 = vmul.f32 1.442695, %v3208_v1  ;;  %3429 = vmatmul.mubr.bf16.gmra.mrb[68].mxu1 %v3326_v20  ;;  %v3210_v13 = vsub.f32 %v9279_v57, %v3179_v56  ;;  %v3211_v50 = vsub.f32 %v9280_v35, %v3179_v56  ;;  %v9286_v42 = vld [vmem:[#allocation105_spill] sm:$0xff]  ;;  %v9287_v4 = vld [vmem:[#allocation106_spill] sm:$0xff] }
 0x735   : > { %v8367_v34 = vpop.eup %5902  ;;  %5922 = vpow2.f32 %v3266_v61  ;;  %v3270_v32 = vmul.f32 1.442695, %v3209_v47  ;;  %1964 = vadd.xlane.f32.xlu0 %v9281_v27  ;;  %v3329_v12 = vpack.c.bf16 %v5899_v48, %v8317_v19  ;;  %v3833_v8 = vpop.xlane.xlu0 %3832  ;;  %v3291_v23 = vadd.f32 %v5899_v48, %v8351_v41  ;;  %v9288_v48 = vld [vmem:[#allocation108_spill] sm:$0xff]  ;;  %v9289_v27 = vld [vmem:[#allocation111_spill] sm:$0xff] }
 0x736   : > { %v8372_v63 = vpop.eup %5904  ;;  %5924 = vpow2.f32 %v3268_v16  ;;  %v3272_v45 = vmul.f32 1.442695, %v3210_v13  ;;  %v3274_v20 = vmul.f32 1.442695, %v3211_v50  ;;  %5227 = vmatpush3.bf16.msra.mxu1 %v9282_v9  ;;  %v3879_v28 = vsub.f32 %v9283_v22, %v3833_v8 }
 0x737   : > { %v5907_v60 = vpop.eup %5906  ;;  %5926 = vpow2.f32 %v3270_v32  ;;  %1991 = vadd.xlane.f32.xlu1 %v9284_v44  ;;  %5228 = vmatprep.subr.bf16.mxu1 %v9285_v55  ;;  %v3880_v19 = vsub.f32 %v9286_v42, %v3833_v8  ;;  %v3836_v62 = vpop.xlane.xlu1 %3835  ;;  %v3330_v10 = vpack.c.bf16 %v8372_v63, %v8328_v46  ;;  %v8383_v41 = vadd.f32 %v8367_v34, %v8362_v51  ;;  %v9293_v55 = vld [vmem:[#allocation113_spill] sm:$0xff] }
 0x738   : > { %v8385_v58 = vpop.eup %5908  ;;  %5928 = vpow2.f32 %v3272_v45  ;;  %3436 = vmatprep.mubr.bf16.mxu1 %v3329_v12  ;;  %v3911_v61 = vmul.f32 1.442695, %v3879_v28  ;;  %v3881_v1 = vsub.f32 %v9287_v4, %v3836_v62  ;;  %v3882_v5 = vsub.f32 %v9288_v48, %v3836_v62  ;;  %v9290_v12 = vld [vmem:[#allocation110_spill] sm:$0xff] }
 0x739   : > { %v8389_v47 = vpop.eup %5910  ;;  %5930 = vpow2.f32 %v3274_v20  ;;  %v3913_v56 = vmul.f32 1.442695, %v3880_v19  ;;  %3289 = vadd.xlane.f32.xlu0 %v8326_v53  ;;  %v3839_v16 = vpop.xlane.xlu0 %3838  ;;  %v3331_v57 = vpack.c.bf16 %v5907_v60, %v8332_v25  ;;  %v3297_v13 = vadd.f32 %v5907_v60, %v8372_v63  ;;  %v9291_v20 = vld [vmem:[#allocation115_spill] sm:$0xff]  ;;  %v9292_v53 = vld [vmem:[#allocation112_spill] sm:$0xff]  ;;  %v9294_v19 = vld [vmem:[#allocation114_spill] sm:$0xff] }
 0x73a   : > { %v8394_v35 = vpop.eup %5912  ;;  %5932 = vpow2.f32 %v3911_v61  ;;  %v3915_v50 = vmul.f32 1.442695, %v3881_v1  ;;  %v3917_v32 = vmul.f32 1.442695, %v3882_v5  ;;  %5229 = vmatpush3.bf16.msra.mxu1 %v9289_v27  ;;  %v3883_v8 = vsub.f32 %v9290_v12, %v3839_v16  ;;  %v9295_v4 = vld [vmem:[#allocation34_spill] sm:$0xff]  ;;  %v9297_v27 = vld [vmem:[#allocation65_spill] sm:$0xff] }
 0x73b   : > { %v8398_v45 = vpop.eup %5914  ;;  %5934 = vpow2.f32 %v3913_v56  ;;  %3292 = vadd.xlane.f32.xlu1 %v3291_v23  ;;  %5230 = vmatprep.subr.bf16.mxu1 %v9291_v20  ;;  %v3884_v9 = vsub.f32 %v9292_v53, %v3839_v16  ;;  %v3842_v25 = vpop.xlane.xlu1 %3841  ;;  %v3332_v22 = vpack.c.bf16 %v8394_v35, %v8344_v43  ;;  %v3335_v28 = vpack.c.bf16 %v8389_v47, %v8367_v34 }
 0x73c   : > { %v8406_v60 = vpop.eup %5916  ;;  %5936 = vpow2.f32 %v3915_v50  ;;  %v3919_v44 = vmul.f32 1.442695, %v3883_v8  ;;  %3437 = vmatmul.mubr.bf16.gmra.mrb[72].mxu1 %v3328_v29  ;;  %v3885_v42 = vsub.f32 %v9293_v55, %v3842_v25  ;;  %v3886_v23 = vsub.f32 %v9294_v19, %v3842_v25  ;;  %v9296_v50 = vld [vmem:[#allocation116_spill] sm:$0xff] }
 0x73d   : > { %v8410_v62 = vpop.eup %5918  ;;  %5938 = vpow2.f32 %v3917_v32  ;;  %v3921_v61 = vmul.f32 1.442695, %v3884_v9  ;;  %3444 = vmatprep.mubr.bf16.mxu1 %v3331_v57  ;;  %1988 = vadd.xlane.f32.xlu0 %v9295_v4  ;;  %v3845_v1 = vpop.xlane.xlu0 %3844  ;;  %v3333_v48 = vpack.c.bf16 %v8398_v45, %v8348_v24  ;;  %v8417_v5 = vadd.f32 %v8398_v45, %v8394_v35  ;;  %v9298_v24 = vld [vmem:[#allocation117_spill] sm:$0xff] }
 0x73e   : > { %v8419_v29 = vpop.eup %5920  ;;  %5940 = vpow2.f32 %v3919_v44  ;;  %v3923_v56 = vmul.f32 1.442695, %v3885_v42  ;;  %v3925_v16 = vmul.f32 1.442695, %v3886_v23  ;;  %5231 = vmatpush3.bf16.msra.mxu1 %v9296_v50  ;;  %v3887_v32 = vsub.f32 %v8080_v36, %v3845_v1 }
 0x73f   : > { %v8423_v57 = vpop.eup %5922  ;;  %5942 = vpow2.f32 %v3921_v61  ;;  %1973 = vadd.xlane.f32.xlu1 %v9297_v27  ;;  %5232 = vmatprep.subr.bf16.mxu1 %v8270_v39  ;;  %v3888_v12 = vsub.f32 %v9298_v24, %v3845_v1  ;;  %v3848_v8 = vpop.xlane.xlu1 %3847  ;;  %v8430_v45 = vadd.f32 %v8389_v47, %v8385_v58  ;;  %v3334_v20 = vpack.c.bf16 %v8385_v58, %v8362_v51  ;;  %v9301_v27 = vld [vmem:[#allocation120_spill] sm:$0xff] }
 0x740   : > { %v8434_v53 = vpop.eup %5924  ;;  %5944 = vpow2.f32 %v3923_v56  ;;  %v3927_v36 = vmul.f32 1.442695, %v3887_v32  ;;  %v3889_v9 = vsub.f32 %v8088_v31, %v3848_v8  ;;  %v3890_v25 = vsub.f32 %v8090_v21, %v3848_v8 }
 0x741   : > { %v8438_v44 = vpop.eup %5926  ;;  %5946 = vpow2.f32 %v3925_v16  ;;  %v3929_v39 = vmul.f32 1.442695, %v3888_v12  ;;  %3295 = vadd.xlane.f32.xlu0 %v8342_v52  ;;  %v3851_v55 = vpop.xlane.xlu0 %3850  ;;  %v8443_v42 = vadd.f32 %v8423_v57, %v8419_v29  ;;  %v3337_v19 = vpack.c.bf16 %v8423_v57, %v8410_v62  ;;  %v9299_v52 = vld [vmem:[#allocation118_spill] sm:$0xff] }
 0x742   : > { %v8447_v23 = vpop.eup %5928  ;;  %5948 = vpow2.f32 %v3927_v36  ;;  %v3931_v31 = vmul.f32 1.442695, %v3889_v9  ;;  %v3933_v61 = vmul.f32 1.442695, %v3890_v25  ;;  %5233 = vmatpush3.bf16.msra.mxu1 %v8286_v11  ;;  %v3891_v21 = vsub.f32 %v8096_v30, %v3851_v55  ;;  %v9300_v30 = vld [vmem:[#allocation119_spill] sm:$0xff]  ;;  %v9302_v36 = vld [vmem:[#allocation64_spill] sm:$0xff] }
 0x743   : > { %v8451_v4 = vpop.eup %5930  ;;  %5950 = vpow2.f32 %v3929_v39  ;;  %3298 = vadd.xlane.f32.xlu1 %v3297_v13  ;;  %v3892_v1 = vsub.f32 %v9299_v52, %v3851_v55  ;;  %v3854_v56 = vpop.xlane.xlu1 %3853  ;;  %v8456_v16 = vadd.f32 %v8410_v62, %v8406_v60  ;;  %v8460_v50 = vadd.f32 %v8438_v44, %v8434_v53 }
 0x744   : > { %v8462_v32 = vpop.eup %5932  ;;  %5952 = vpow2.f32 %v3931_v31  ;;  %v3935_v11 = vmul.f32 1.442695, %v3891_v21  ;;  %3445 = vmatmul.mubr.bf16.gmra.mrb[76].mxu1 %v3330_v10  ;;  %v3893_v13 = vsub.f32 %v9300_v30, %v3854_v56  ;;  %v3894_v24 = vsub.f32 %v9301_v27, %v3854_v56 }
 0x745   : > { %v8469_v12 = vpop.eup %5934  ;;  %5954 = vpow2.f32 %v3933_v61  ;;  %v3937_v8 = vmul.f32 1.442695, %v3892_v1  ;;  %3452 = vmatprep.mubr.bf16.mxu1 %v3333_v48  ;;  %1970 = vadd.xlane.f32.xlu0 %v9302_v36  ;;  %v4070_v9 = vpop.permute.xlu0 %4069  ;;  %v3321_v25 = vadd.f32 %v8451_v4, %v8447_v23  ;;  %v3336_v39 = vpack.c.bf16 %v8419_v29, %v8406_v60  ;;  %v9303_v48 = vld [vmem:[#allocation51_spill] sm:$0xff] }
 0x746   : > { %v8476_v46 = vpop.eup %5936  ;;  %5956 = vpow2.f32 %v3935_v11  ;;  %v3939_v63 = vmul.f32 1.442695, %v3893_v13  ;;  %v3941_v10 = vmul.f32 1.442695, %v3894_v24  ;;  %5234 = vmatprep.subr.bf16.mxu1 %v4070_v9  ;;  %v3339_v55 = vpack.c.bf16 %v8451_v4, %v8438_v44  ;;  %v9304_v24 = vld [vmem:[#allocation50_spill] sm:$0xff] }
 0x747   : > { %v5939_v31 = vpop.eup %5938  ;;  %5958 = vpow2.f32 %v3937_v8  ;;  %1997 = vadd.xlane.f32.xlu1 %v9303_v48  ;;  %v4054_v61 = vpop.permute.xlu1 %4053  ;;  %v3975_v21 = vadd.f32 %v8469_v12, %v8462_v32  ;;  %v3338_v60 = vpack.c.bf16 %v8447_v23, %v8434_v53  ;;  %v4023_v29 = vpack.c.bf16 %v8476_v46, %v8462_v32 }
 0x748   : > { %v5941_v52 = vpop.eup %5940  ;;  %5960 = vpow2.f32 %v3939_v63  ;;  %5235 = vmatpush3.bf16.msra.mxu1 %v4054_v61  ;;  %v3978_v1 = vadd.f32 %v5939_v31, %v8476_v46  ;;  %v4024_v44 = vpack.c.bf16 %v5939_v31, %v8469_v12 }
 0x749   : > { %v5943_v4 = vpop.eup %5942  ;;  %5962 = vpow2.f32 %v3941_v10  ;;  %3301 = vadd.xlane.f32.xlu0 %v8360_v6 }
 0x74a   : > { %v5945_v56 = vpop.eup %5944  ;;  %v3981_v11 = vadd.f32 %v5943_v4, %v5941_v52 }
 0x74b   : > { %v5947_v30 = vpop.eup %5946  ;;  %3304 = vadd.xlane.f32.xlu1 %v8417_v5  ;;  %v4025_v53 = vpack.c.bf16 %v5945_v56, %v5941_v52 }
 0x74c   : > { %v5949_v23 = vpop.eup %5948  ;;  %3453 = vmatmul.mubr.bf16.gmra.mrb[80].mxu1 %v3332_v22  ;;  %v3984_v32 = vadd.f32 %v5947_v30, %v5945_v56  ;;  %v4026_v13 = vpack.c.bf16 %v5947_v30, %v5943_v4 }
 0x74d   : > { %v5951_v27 = vpop.eup %5950  ;;  %3460 = vmatprep.mubr.bf16.mxu1 %v3335_v28  ;;  %1994 = vadd.xlane.f32.xlu0 %v9304_v24 }
 0x74e   : > { %v5953_v6 = vpop.eup %5952  ;;  %v3987_v12 = vadd.f32 %v5951_v27, %v5949_v23 }
 0x74f   : > { %v5955_v8 = vpop.eup %5954  ;;  %3310 = vadd.xlane.f32.xlu1 %v8430_v45  ;;  %v4027_v5 = vpack.c.bf16 %v5953_v6, %v5949_v23 }
 0x750   : > { %v8499_v36 = vpop.eup %5956  ;;  %v3990_v9 = vadd.f32 %v5955_v8, %v5953_v6  ;;  %v4028_v43 = vpack.c.bf16 %v5955_v8, %v5951_v27 }
 0x751   : > { %v5959_v35 = vpop.eup %5958  ;;  %3307 = vadd.xlane.f32.xlu0 %v8383_v41 }
 0x752   : > { %v8502_v22 = vpop.eup %5960  ;;  %v3993_v34 = vadd.f32 %v5959_v35, %v8499_v36 }
 0x753   : > { %v5963_v47 = vpop.eup %5962  ;;  %3316 = vadd.xlane.f32.xlu1 %v8443_v42  ;;  %v4029_v28 = vpack.c.bf16 %v8502_v22, %v8499_v36 }
 0x754   : > { %3461 = vmatmul.mubr.bf16.gmra.mrb[84].mxu1 %v3334_v20  ;;  %v3996_v45 = vadd.f32 %v5963_v47, %v8502_v22  ;;  %v4030_v46 = vpack.c.bf16 %v5963_v47, %v5959_v35 }
 0x755   : > { %3468 = vmatprep.mubr.bf16.mxu1 %v3337_v19  ;;  %3313 = vadd.xlane.f32.xlu0 %v8456_v16 }
 0x757   : > { %3322 = vadd.xlane.f32.xlu1 %v3321_v25 }
 0x759   : > { %3319 = vadd.xlane.f32.xlu0 %v8460_v50 }
 0x75b   : > { %3979 = vadd.xlane.f32.xlu1 %v3978_v1 }
 0x75c   : > { %3469 = vmatmul.mubr.bf16.gmra.mrb[88].mxu1 %v3336_v39 }
 0x75d   : > { %3476 = vmatprep.mubr.bf16.mxu1 %v3339_v55  ;;  %3976 = vadd.xlane.f32.xlu0 %v3975_v21 }
 0x75f   : > { %3985 = vadd.xlane.f32.xlu1 %v3984_v32 }
 0x761   : > { %3982 = vadd.xlane.f32.xlu0 %v3981_v11 }
 0x763   : > { %3991 = vadd.xlane.f32.xlu1 %v3990_v9 }
 0x764   : > { %3477 = vmatmul.mubr.bf16.gmra.mrb[92].mxu1 %v3338_v60 }
 0x765   : > { %4119 = vmatprep.mubr.bf16.mxu1 %v4024_v44  ;;  %3988 = vadd.xlane.f32.xlu0 %v3987_v12 }
 0x767   : > { %3997 = vadd.xlane.f32.xlu1 %v3996_v45 }
 0x769   : > { %3994 = vadd.xlane.f32.xlu0 %v3993_v34 }
 0x76c   : > { %4120 = vmatmul.mubr.bf16.vlgmr.msra.gmra.mrb[96].mxu1 %v4023_v29 }
 0x76d   : > { %4127 = vmatprep.mubr.bf16.mxu1 %v4026_v13 }
 0x774   : > { %4128 = vmatmul.mubr.bf16.gmra.mrb[100].mxu1 %v4025_v53 }
 0x775   : > { %4135 = vmatprep.mubr.bf16.mxu1 %v4028_v43 }
 0x776   : > { %v3857_v51 = vpop.xlane.xlu0 %3856 }
 0x777   : > { %v3895_v41 = vsub.f32 %v8112_v15, %v3857_v51  ;;  %v3896_v58 = vsub.f32 %v8114_v2, %v3857_v51 }
 0x778   : > { %v3860_v62 = vpop.xlane.xlu1 %3859 }
 0x779   : > { %v3943_v57 = vmul.f32 1.442695, %v3895_v41  ;;  %v3945_v20 = vmul.f32 1.442695, %v3896_v58  ;;  %v3897_v42 = vsub.f32 %v8120_v49, %v3860_v62  ;;  %v3898_v19 = vsub.f32 %v8124_v17, %v3860_v62 }
 0x77a   : > { %v3863_v16 = vpop.xlane.xlu0 %3862 }
 0x77b   : > { %5964 = vpow2.f32 %v3943_v57  ;;  %v3947_v50 = vmul.f32 1.442695, %v3897_v42  ;;  %v3949_v25 = vmul.f32 1.442695, %v3898_v19  ;;  %v3899_v39 = vsub.f32 %v8132_v37, %v3863_v16 }
 0x77c   : > { %5966 = vpow2.f32 %v3945_v20  ;;  %4136 = vmatmul.mubr.bf16.gmra.mrb[104].mxu1 %v4027_v5  ;;  %v3900_v63 = vsub.f32 %v8135_v33, %v3863_v16  ;;  %v3872_v15 = vpop.xlane.xlu1 %3871 }
 0x77d   : > { %5968 = vpow2.f32 %v3947_v50  ;;  %v3951_v2 = vmul.f32 1.442695, %v3899_v39  ;;  %4143 = vmatprep.mubr.bf16.mxu1 %v4030_v46  ;;  %v3905_v10 = vsub.f32 %v8167_v7, %v3872_v15  ;;  %v3906_v49 = vsub.f32 %v8172_v14, %v3872_v15 }
 0x77e   : > { %5970 = vpow2.f32 %v3949_v25  ;;  %v3953_v17 = vmul.f32 1.442695, %v3900_v63  ;;  %v3866_v55 = vpop.xlane.xlu0 %3865 }
 0x77f   : > { %5972 = vpow2.f32 %v3951_v2  ;;  %v3963_v31 = vmul.f32 1.442695, %v3905_v10  ;;  %v3965_v48 = vmul.f32 1.442695, %v3906_v49  ;;  %v3901_v37 = vsub.f32 %v8142_v59, %v3866_v55 }
 0x780   : > { %5974 = vpow2.f32 %v3953_v17  ;;  %v3902_v61 = vsub.f32 %v8146_v38, %v3866_v55  ;;  %v3878_v33 = vpop.xlane.xlu1 %3877 }
 0x781   : > { %5976 = vpow2.f32 %v3963_v31  ;;  %v3955_v21 = vmul.f32 1.442695, %v3901_v37  ;;  %v3909_v60 = vsub.f32 %v8192_v0, %v3878_v33  ;;  %v3910_v7 = vsub.f32 %v8196_v3, %v3878_v33 }
 0x782   : > { %5978 = vpow2.f32 %v3965_v48  ;;  %v3957_v14 = vmul.f32 1.442695, %v3902_v61  ;;  %v3869_v29 = vpop.xlane.xlu0 %3868 }
 0x783   : > { %5980 = vpow2.f32 %v3955_v21  ;;  %v3971_v52 = vmul.f32 1.442695, %v3909_v60  ;;  %v3973_v1 = vmul.f32 1.442695, %v3910_v7  ;;  %v3903_v44 = vsub.f32 %v8157_v54, %v3869_v29 }
 0x784   : > { %5982 = vpow2.f32 %v3957_v14  ;;  %4144 = vmatmul.mubr.bf16.gmra.mrb[108].mxu1 %v4029_v28  ;;  %v3904_v59 = vsub.f32 %v8160_v40, %v3869_v29  ;;  %v8534_v38 = vpop.xlane.xlu1 %2565 }
 0x785   : > { %v5965_v0 = vpop.eup %5964  ;;  %5984 = vpow2.f32 %v3971_v52  ;;  %v3959_v3 = vmul.f32 1.442695, %v3903_v44 }
 0x786   : > { %v5967_v4 = vpop.eup %5966  ;;  %5986 = vpow2.f32 %v3973_v1  ;;  %v3961_v56 = vmul.f32 1.442695, %v3904_v59  ;;  %v3875_v11 = vpop.xlane.xlu0 %3874 }
 0x787   : > { %v5969_v30 = vpop.eup %5968  ;;  %5988 = vpow2.f32 %v3959_v3  ;;  %v3907_v54 = vsub.f32 %v8182_v26, %v3875_v11  ;;  %v3908_v53 = vsub.f32 %v8185_v18, %v3875_v11  ;;  %v3999_v23 = vadd.f32 %v5967_v4, %v5965_v0 }
 0x788   : > { %v5971_v32 = vpop.eup %5970  ;;  %5990 = vpow2.f32 %v3961_v56  ;;  %v8538_v13 = vpop.xlane.xlu1 %2571  ;;  %v4031_v40 = vpack.c.bf16 %v5969_v30, %v5965_v0 }
 0x789   : > { %v5973_v27 = vpop.eup %5972  ;;  %v3967_v24 = vmul.f32 1.442695, %v3907_v54  ;;  %v3969_v6 = vmul.f32 1.442695, %v3908_v53  ;;  %4000 = vadd.xlane.f32.xlu0 %v3999_v23  ;;  %v4002_v12 = vadd.f32 %v5971_v32, %v5969_v30  ;;  %v4032_v5 = vpack.c.bf16 %v5971_v32, %v5967_v4  ;;  %v9305_v53 = vld [vmem:[#allocation36_spill] sm:$0xff] }
 0x78a   : > { %v5975_v8 = vpop.eup %5974  ;;  %v8540_v36 = vpop.xlane.xlu0 %2562 }
 0x78b   : > { %v5977_v9 = vpop.eup %5976  ;;  %5992 = vpow2.f32 %v3967_v24  ;;  %4003 = vadd.xlane.f32.xlu1 %v4002_v12  ;;  %v4005_v26 = vadd.f32 %v5975_v8, %v5973_v27  ;;  %4151 = vmatprep.mubr.bf16.mxu1 %v4032_v5 }
 0x78c   : > { %v5979_v18 = vpop.eup %5978  ;;  %5994 = vpow2.f32 %v3969_v6  ;;  %v8542_v43 = vpop.xlane.xlu1 %2577  ;;  %4152 = vmatmul.mubr.bf16.gmra.mrb[112].mxu1 %v4031_v40 }
 0x78d   : > { %v5981_v35 = vpop.eup %5980  ;;  %4006 = vadd.xlane.f32.xlu0 %v4005_v26  ;;  %v4014_v22 = vadd.f32 %v5979_v18, %v5977_v9 }
 0x78e   : > { %v5983_v34 = vpop.eup %5982  ;;  %v8544_v47 = vpop.xlane.xlu0 %2568  ;;  %v4033_v28 = vpack.c.bf16 %v5981_v35, %v5973_v27 }
 0x78f   : > { %v5985_v45 = vpop.eup %5984  ;;  %v4034_v46 = vpack.c.bf16 %v5983_v34, %v5975_v8  ;;  %v4008_v51 = vadd.f32 %v5983_v34, %v5981_v35  ;;  %v9306_v34 = vld [vmem:[#allocation40_spill] sm:$0xff] }
 0x790   : > { %v5987_v41 = vpop.eup %5986  ;;  %v8546_v58 = vpop.xlane.xlu1 %2583 }
 0x791   : > { %v5989_v62 = vpop.eup %5988  ;;  %4159 = vmatprep.mubr.bf16.mxu1 %v4034_v46  ;;  %4009 = vadd.xlane.f32.xlu1 %v4008_v51  ;;  %v4020_v57 = vadd.f32 %v5987_v41, %v5985_v45  ;;  %v5044_v42 = vpop.f32.mrb[32].mxu1 }
 0x792   : > { %v5991_v20 = vpop.eup %5990  ;;  %v2575_v19 = vpop.xlane.xlu0 %2574  ;;  %v4035_v16 = vpack.c.bf16 %v5977_v9, %v5989_v62 }
 0x793   : > { %v5045_v50 = vpop.f32.mrb[33].mxu1  ;;  %v4036_v25 = vpack.c.bf16 %v5979_v18, %v5991_v20  ;;  %v4011_v39 = vadd.f32 %v5991_v20, %v5989_v62 }
 0x794   : > { %v8548_v63 = vadd.f32 %v5045_v50, %v5044_v42  ;;  %v5047_v15 = vpop.f32.mrb[34].mxu1  ;;  %v8550_v2 = vpop.xlane.xlu1 %2589  ;;  %4160 = vmatmul.mubr.bf16.gmra.mrb[116].mxu1 %v4033_v28 }
 0x795   : > { %v5993_v10 = vpop.eup %5992  ;;  %v5048_v49 = vpop.f32.mrb[35].mxu1  ;;  %4015 = vadd.xlane.f32.xlu1 %v4014_v22  ;;  %4167 = vmatprep.mubr.bf16.mxu1 %v4036_v25 }
 0x796   : > { %v5995_v17 = vpop.eup %5994  ;;  %v5049_v55 = vadd.f32 %v5048_v49, %v5047_v15  ;;  %4012 = vadd.xlane.f32.xlu0 %v4011_v39  ;;  %v2587_v31 = vpop.xlane.xlu0 %2586  ;;  %v4037_v48 = vpack.c.bf16 %v5985_v45, %v5993_v10 }
 0x797   : > { %v4017_v37 = vadd.f32 %v5995_v17, %v5993_v10  ;;  %v4038_v61 = vpack.c.bf16 %v5987_v41, %v5995_v17 }
 0x798   : > { %v1956_v33 = vpop.xlane.xlu1 %1955 }
 0x799   : > { %5996 = vrcp.f32 %v1956_v33  ;;  %4021 = vadd.xlane.f32.xlu1 %v4020_v57  ;;  %v5050_v21 = vpop.f32.mrb[36].mxu1 }
 0x79a   : > { %4018 = vadd.xlane.f32.xlu0 %v4017_v37  ;;  %v2581_v60 = vpop.xlane.xlu0 %2580  ;;  %v5051_v7 = vpop.f32.mrb[37].mxu1  ;;  %5998 = vrcp.f32 %v8534_v38 }
 0x79b   : > { %v8552_v14 = vadd.f32 %v5051_v7, %v5050_v21  ;;  %v5053_v29 = vpop.f32.mrb[38].mxu1  ;;  %6000 = vrcp.f32 %v8538_v13  ;;  %v9309_v7 = vld [vmem:[#allocation35_spill] sm:$0xff] }
 0x79c   : > { %v8554_v52 = vpop.xlane.xlu1 %2595  ;;  %v5054_v1 = vpop.f32.mrb[39].mxu1  ;;  %4168 = vmatmul.mubr.bf16.gmra.mrb[120].mxu1 %v4035_v16  ;;  %6002 = vrcp.f32 %v8540_v36 }
 0x79d   : > { %v5055_v44 = vadd.f32 %v5054_v1, %v5053_v29  ;;  %4175 = vmatprep.mubr.bf16.mxu1 %v4038_v61 }
 0x79e   : > { %v8557_v59 = vpop.xlane.xlu0 %2592 }
 0x7a0   : > { %v1980_v0 = vpop.xlane.xlu1 %1979 }
 0x7a1   : > { %6004 = vrcp.f32 %v1980_v0 }
 0x7a2   : > { %v1953_v4 = vpop.xlane.xlu0 %1952 }
 0x7a3   : > { %v5056_v3 = vpop.f32.mrb[40].mxu1  ;;  %v5997_v56 = vpop.eup %5996  ;;  %6006 = vrcp.f32 %v1953_v4 }
 0x7a4   : > { %v5057_v11 = vpop.f32.mrb[41].mxu1  ;;  %v8563_v54 = vpop.xlane.xlu1 %2601  ;;  %v2115_v23 = vmul.f32 %v5997_v56, %v9305_v53  ;;  %6008 = vrcp.f32 %v8542_v43  ;;  %4176 = vmatmul.mubr.bf16.gmra.mrb[124].mxu1 %v4037_v48 }
 0x7a5   : > { %v8561_v30 = vadd.f32 %v5057_v11, %v5056_v3  ;;  %v5059_v38 = vpop.f32.mrb[42].mxu1  ;;  %v5999_v27 = vpop.eup %5998  ;;  %6010 = vrcp.f32 %v8544_v47 }
 0x7a6   : > { %v5060_v32 = vpop.f32.mrb[43].mxu1  ;;  %v8567_v40 = vpop.xlane.xlu0 %2598  ;;  %2145 = vst.msk [vmem:[#allocation4 + $0x8] sm:$0xff] %vm1621_vm0, %v2115_v23  ;;  %6012 = vrcp.f32 %v8546_v58  ;;  %v2789_v24 = vmul.f32 %v5999_v27, %v5049_v55  ;;  %v9307_v58 = vld [vmem:[#allocation52_spill] sm:$0xff] }
 0x7a7   : > { %v5061_v13 = vadd.f32 %v5060_v32, %v5059_v38  ;;  %v6001_v12 = vpop.eup %6000  ;;  %v9310_v38 = vld [vmem:[#allocation42_spill] sm:$0xff] }
 0x7a8   : > { %v1962_v6 = vpop.xlane.xlu1 %1961  ;;  %v6003_v8 = vpop.eup %6002  ;;  %v2793_v18 = vmul.f32 %v6001_v12, %v5055_v44  ;;  %v9311_v12 = vld [vmem:[#allocation53_spill] sm:$0xff] }
 0x7a9   : > { %6014 = vrcp.f32 %v1962_v6  ;;  %v2787_v46 = vmul.f32 %v6003_v8, %v8548_v63 }
 0x7aa   : > { %6016 = vrcp.f32 %v2575_v19  ;;  %2836 = vrot.lane.b32.xlu1 %v2789_v24, %s6477_s29  ;;  %v1977_v36 = vpop.xlane.xlu0 %1976 }
 0x7ab   : > { %v5062_v5 = vpop.f32.mrb[44].mxu1  ;;  %v6005_v9 = vpop.eup %6004  ;;  %6018 = vrcp.f32 %v1977_v36 }
 0x7ac   : > { %v5063_v26 = vpop.f32.mrb[45].mxu1  ;;  %v8573_v22 = vpop.xlane.xlu1 %2607  ;;  %v2131_v47 = vmul.f32 %v6005_v9, %v9306_v34  ;;  %6020 = vrcp.f32 %v2587_v31  ;;  %v9308_v31 = vld [vmem:[#allocation54_spill] sm:$0xff] }
 0x7ad   : > { %v5064_v43 = vadd.f32 %v5063_v26, %v5062_v5  ;;  %v5065_v35 = vpop.f32.mrb[46].mxu1  ;;  %v6007_v28 = vpop.eup %6006  ;;  %6022 = vrcp.f32 %v2581_v60 }
 0x7ae   : > { %v5066_v45 = vpop.f32.mrb[47].mxu1  ;;  %2840 = vrot.lane.b32.xlu1 %v2793_v18, %s6477_s29  ;;  %v8578_v41 = vpop.xlane.xlu0 %2604  ;;  %v2113_v62 = vmul.f32 %v6007_v28, %v9307_v58  ;;  %2153 = vst.msk [vmem:[#allocation4 + $0x48] sm:$0xff] %vm1621_vm0, %v2131_v47  ;;  %6024 = vrcp.f32 %v8550_v2  ;;  %v9312_v47 = vld [vmem:[#allocation56_spill] sm:$0xff] }
 0x7af   : > { %v5067_v51 = vadd.f32 %v5066_v45, %v5065_v35  ;;  %v6009_v57 = vpop.eup %6008 }
 0x7b0   : > { %v2797_v20 = vmul.f32 %v6009_v57, %v5061_v13  ;;  %2834 = vrot.lane.b32.xlu0 %v2787_v46, %s6477_s29  ;;  %v1986_v42 = vpop.xlane.xlu1 %1985  ;;  %2144 = vst.msk [vmem:[#allocation4] sm:$0xff] %vm1621_vm0, %v2113_v62  ;;  %v6011_v19 = vpop.eup %6010 }
 0x7b1   : > { %6026 = vrcp.f32 %v1986_v42  ;;  %v6013_v16 = vpop.eup %6012  ;;  %v2791_v50 = vmul.f32 %v6011_v19, %v8552_v14 }
 0x7b2   : > { %2844 = vrot.lane.b32.xlu1 %v2797_v20, %s6477_s29  ;;  %v1959_v39 = vpop.xlane.xlu0 %1958  ;;  %v2801_v2 = vmul.f32 %v6013_v16, %v5067_v51  ;;  %v9313_v20 = vld [vmem:[#allocation37_spill] sm:$0xff] }
 0x7b3   : > { %v5068_v25 = vpop.f32.mrb[48].mxu1  ;;  %v6015_v63 = vpop.eup %6014  ;;  %6028 = vrcp.f32 %v1959_v39 }
 0x7b4   : > { %v5069_v15 = vpop.f32.mrb[49].mxu1  ;;  %v6017_v10 = vpop.eup %6016  ;;  %6030 = vrcp.f32 %v8557_v59  ;;  %2838 = vrot.lane.b32.xlu0 %v2791_v50, %s6477_s29  ;;  %v2119_v48 = vmul.f32 %v6015_v63, %v9308_v31 }
 0x7b5   : > { %v5070_v49 = vadd.f32 %v5069_v15, %v5068_v25  ;;  %v5071_v17 = vpop.f32.mrb[50].mxu1  ;;  %v8589_v55 = vpop.xlane.xlu1 %3280  ;;  %6032 = vrcp.f32 %v8554_v52  ;;  %v2795_v33 = vmul.f32 %v6017_v10, %v8561_v30 }
 0x7b6   : > { %v6019_v37 = vpop.eup %6018  ;;  %v5072_v61 = vpop.f32.mrb[51].mxu1  ;;  %2848 = vrot.lane.b32.xlu1 %v2801_v2, %s6477_s29  ;;  %2147 = vst.msk [vmem:[#allocation4 + $0x18] sm:$0xff] %vm1621_vm0, %v2119_v48 }
 0x7b7   : > { %v5073_v21 = vadd.f32 %v5072_v61, %v5071_v17  ;;  %v8595_v60 = vpop.xlane.xlu0 %3277  ;;  %v2129_v14 = vmul.f32 %v6019_v37, %v9309_v7  ;;  %v6021_v29 = vpop.eup %6020  ;;  %v9315_v37 = vld [vmem:[#allocation44_spill] sm:$0xff] }
 0x7b8   : > { %v2803_v1 = vmul.f32 %v6021_v29, %v5070_v49  ;;  %2842 = vrot.lane.b32.xlu0 %v2795_v33, %s6477_s29  ;;  %v6023_v59 = vpop.eup %6022  ;;  %v9314_v49 = vld [vmem:[#allocation55_spill] sm:$0xff] }
 0x7b9   : > { %v1968_v44 = vpop.xlane.xlu1 %1967  ;;  %2152 = vst.msk [vmem:[#allocation4 + $0x40] sm:$0xff] %vm1621_vm0, %v2129_v14  ;;  %v6025_v52 = vpop.eup %6024  ;;  %v2799_v0 = vmul.f32 %v6023_v59, %v5064_v43  ;;  %v9316_v29 = vld [vmem:[#allocation39_spill] sm:$0xff]  ;;  %v9317_v59 = vld [vmem:[#allocation38_spill] sm:$0xff] }
 0x7ba   : > { %6034 = vrcp.f32 %v1968_v44  ;;  %2850 = vrot.lane.b32.xlu1 %v2803_v1, %s6477_s29  ;;  %v2805_v11 = vmul.f32 %v6025_v52, %v5073_v21 }
 0x7bb   : > { %v1983_v3 = vpop.xlane.xlu0 %1982  ;;  %v6027_v4 = vpop.eup %6026 }
 0x7bc   : > { %v5074_v56 = vpop.f32.mrb[52].mxu1  ;;  %6036 = vrcp.f32 %v1983_v3  ;;  %2846 = vrot.lane.b32.xlu0 %v2799_v0, %s6477_s29  ;;  %v2135_v53 = vmul.f32 %v6027_v4, %v9310_v38  ;;  %v9318_v4 = vld [vmem:[#allocation33_spill] sm:$0xff] }
 0x7bd   : > { %6038 = vrcp.f32 %v8567_v40  ;;  %v5075_v30 = vpop.f32.mrb[53].mxu1  ;;  %v6029_v23 = vpop.eup %6028 }
 0x7be   : > { %v5076_v32 = vadd.f32 %v5075_v30, %v5074_v56  ;;  %v5077_v13 = vpop.f32.mrb[54].mxu1  ;;  %v6031_v27 = vpop.eup %6030  ;;  %6040 = vrcp.f32 %v8563_v54  ;;  %2852 = vrot.lane.b32.xlu1 %v2805_v11, %s6477_s29  ;;  %v2117_v8 = vmul.f32 %v6029_v23, %v9311_v12  ;;  %2155 = vst.msk [vmem:[#allocation4 + $0x58] sm:$0xff] %vm1621_vm0, %v2135_v53  ;;  %v9319_v30 = vld [vmem:[#allocation46_spill] sm:$0xff]  ;;  %v9320_v23 = vld [vmem:[#allocation41_spill] sm:$0xff] }
 0x7bf   : > { %v5078_v24 = vpop.f32.mrb[55].mxu1  ;;  %v8607_v6 = vpop.xlane.xlu0 %3283 }
 0x7c0   : > { %v2807_v40 = vmul.f32 %v6031_v27, %v5076_v32  ;;  %v5079_v5 = vadd.f32 %v5078_v24, %v5077_v13  ;;  %v6033_v36 = vpop.eup %6032  ;;  %v8611_v9 = vpop.xlane.xlu1 %3286  ;;  %2146 = vst.msk [vmem:[#allocation4 + $0x10] sm:$0xff] %vm1621_vm0, %v2117_v8 }
 0x7c2   : > { %v2809_v26 = vmul.f32 %v6033_v36, %v5079_v5  ;;  %2854 = vrot.lane.b32.xlu0 %v2807_v40, %s6477_s29 }
 0x7c3   : > { %v1965_v54 = vpop.xlane.xlu0 %1964 }
 0x7c4   : > { %v6035_v18 = vpop.eup %6034  ;;  %v5080_v43 = vpop.f32.mrb[56].mxu1  ;;  %2856 = vrot.lane.b32.xlu1 %v2809_v26, %s6477_s29  ;;  %6042 = vrcp.f32 %v1965_v54 }
 0x7c5   : > { %v1992_v35 = vpop.xlane.xlu1 %1991  ;;  %v5081_v34 = vpop.f32.mrb[57].mxu1  ;;  %v2123_v28 = vmul.f32 %v6035_v18, %v9312_v47 }
 0x7c6   : > { %v6037_v45 = vpop.eup %6036  ;;  %6044 = vrcp.f32 %v1992_v35  ;;  %v5082_v46 = vadd.f32 %v5081_v34, %v5080_v43  ;;  %v5083_v51 = vpop.f32.mrb[58].mxu1 }
 0x7c7   : > { %v6039_v58 = vpop.eup %6038  ;;  %v5084_v62 = vpop.f32.mrb[59].mxu1  ;;  %2149 = vst.msk [vmem:[#allocation4 + $0x28] sm:$0xff] %vm1621_vm0, %v2123_v28  ;;  %v2133_v42 = vmul.f32 %v6037_v45, %v9313_v20 }
 0x7c8   : > { %v8617_v57 = vpop.xlane.xlu0 %3289  ;;  %v2811_v19 = vmul.f32 %v6039_v58, %v5082_v46  ;;  %v5085_v16 = vadd.f32 %v5084_v62, %v5083_v51  ;;  %v6041_v50 = vpop.eup %6040 }
 0x7c9   : > { %v8621_v25 = vpop.xlane.xlu1 %3292  ;;  %2154 = vst.msk [vmem:[#allocation4 + $0x50] sm:$0xff] %vm1621_vm0, %v2133_v42 }
 0x7ca   : > { %v2813_v39 = vmul.f32 %v6041_v50, %v5085_v16  ;;  %2858 = vrot.lane.b32.xlu0 %v2811_v19, %s6477_s29 }
 0x7cc   : > { %v1989_v63 = vpop.xlane.xlu0 %1988  ;;  %2860 = vrot.lane.b32.xlu1 %v2813_v39, %s6477_s29 }
 0x7cd   : > { %6046 = vrcp.f32 %v1989_v63  ;;  %v1974_v15 = vpop.xlane.xlu1 %1973 }
 0x7ce   : > { %v6043_v10 = vpop.eup %6042  ;;  %6048 = vrcp.f32 %v1974_v15 }
 0x7cf   : > { %v2121_v17 = vmul.f32 %v6043_v10, %v9314_v49 }
 0x7d0   : > { %v8626_v2 = vpop.xlane.xlu0 %3295  ;;  %v6045_v31 = vpop.eup %6044 }
 0x7d1   : > { %v8629_v48 = vpop.xlane.xlu1 %3298  ;;  %2148 = vst.msk [vmem:[#allocation4 + $0x20] sm:$0xff] %vm1621_vm0, %v2121_v17  ;;  %v2139_v61 = vmul.f32 %v6045_v31, %v9315_v37 }
 0x7d3   : > { %2157 = vst.msk [vmem:[#allocation4 + $0x68] sm:$0xff] %vm1621_vm0, %v2139_v61 }
 0x7d4   : > { %v1971_v33 = vpop.xlane.xlu0 %1970 }
 0x7d5   : > { %6050 = vrcp.f32 %v1971_v33  ;;  %v1998_v21 = vpop.xlane.xlu1 %1997 }
 0x7d6   : > { %6052 = vrcp.f32 %v1998_v21 }
 0x7d7   : > { %v6047_v7 = vpop.eup %6046 }
 0x7d8   : > { %v8634_v14 = vpop.xlane.xlu0 %3301  ;;  %v2137_v1 = vmul.f32 %v6047_v7, %v9316_v29  ;;  %v6049_v44 = vpop.eup %6048 }
 0x7d9   : > { %v2127_v52 = vmul.f32 %v6049_v44, %v9317_v59  ;;  %v8646_v13 = vpop.xlane.xlu1 %3304 }
 0x7da   : > { %2156 = vst.msk [vmem:[#allocation4 + $0x60] sm:$0xff] %vm1621_vm0, %v2137_v1 }
 0x7db   : > { %2151 = vst.msk [vmem:[#allocation4 + $0x38] sm:$0xff] %vm1621_vm0, %v2127_v52 }
 0x7dc   : > { %v1995_v0 = vpop.xlane.xlu0 %1994 }
 0x7dd   : > { %6054 = vrcp.f32 %v1995_v0  ;;  %v8652_v24 = vpop.xlane.xlu1 %3310 }
 0x7de   : > { %6056 = vrcp.f32 %v8578_v41 }
 0x7df   : > { %v6051_v3 = vpop.eup %6050  ;;  %6058 = vrcp.f32 %v8573_v22 }
 0x7e0   : > { %v2125_v56 = vmul.f32 %v6051_v3, %v9318_v4  ;;  %v6053_v11 = vpop.eup %6052  ;;  %v8650_v27 = vpop.xlane.xlu0 %3307  ;;  %6060 = vrcp.f32 %v8595_v60 }
 0x7e1   : > { %v2143_v38 = vmul.f32 %v6053_v11, %v9319_v30  ;;  %6062 = vrcp.f32 %v8589_v55  ;;  %v8658_v18 = vpop.xlane.xlu1 %3316 }
 0x7e2   : > { %2150 = vst.msk [vmem:[#allocation4 + $0x30] sm:$0xff] %vm1621_vm0, %v2125_v56  ;;  %6064 = vrcp.f32 %v8607_v6 }
 0x7e3   : > { %2159 = vst.msk [vmem:[#allocation4 + $0x78] sm:$0xff] %vm1621_vm0, %v2143_v38  ;;  %6066 = vrcp.f32 %v8611_v9 }
 0x7e4   : > { %v8656_v26 = vpop.xlane.xlu0 %3313  ;;  %6068 = vrcp.f32 %v8617_v57 }
 0x7e5   : > { %v8664_v28 = vpop.xlane.xlu1 %3322  ;;  %6070 = vrcp.f32 %v8621_v25 }
 0x7e6   : > { %6072 = vrcp.f32 %v8626_v2 }
 0x7e7   : > { %v6055_v53 = vpop.eup %6054  ;;  %6074 = vrcp.f32 %v8629_v48 }
 0x7e8   : > { %v2141_v32 = vmul.f32 %v6055_v53, %v9320_v23  ;;  %v6057_v36 = vpop.eup %6056  ;;  %v8662_v60 = vpop.xlane.xlu0 %3319  ;;  %6076 = vrcp.f32 %v8634_v14 }
 0x7e9   : > { %v6059_v43 = vpop.eup %6058  ;;  %v8671_v16 = vpop.xlane.xlu1 %3979  ;;  %6078 = vrcp.f32 %v8646_v13 }
 0x7ea   : > { %2158 = vst.msk [vmem:[#allocation4 + $0x70] sm:$0xff] %vm1621_vm0, %v2141_v32  ;;  %v6061_v46 = vpop.eup %6060  ;;  %6080 = vrcp.f32 %v8650_v27 }
 0x7eb   : > { %v6063_v20 = vpop.eup %6062  ;;  %6082 = vrcp.f32 %v8652_v24 }
 0x7ec   : > { %v8669_v19 = vpop.xlane.xlu0 %3976  ;;  %v6065_v10 = vpop.eup %6064  ;;  %6084 = vrcp.f32 %v8656_v26 }
 0x7ed   : > { %v8678_v9 = vpop.xlane.xlu1 %3985  ;;  %v6067_v37 = vpop.eup %6066  ;;  %6086 = vrcp.f32 %v8658_v18 }
 0x7ee   : > { %v6069_v1 = vpop.eup %6068  ;;  %6088 = vrcp.f32 %v8662_v60 }
 0x7ef   : > { %v6071_v0 = vpop.eup %6070  ;;  %6090 = vrcp.f32 %v8664_v28 }
 0x7f0   : > { %v8675_v63 = vpop.xlane.xlu0 %3982  ;;  %v6073_v53 = vpop.eup %6072  ;;  %6092 = vrcp.f32 %v8669_v19 }
 0x7f1   : > { %v8685_v21 = vpop.xlane.xlu1 %3991  ;;  %6094 = vrcp.f32 %v8671_v16 }
 0x7f2   : > { %6096 = vrcp.f32 %v8675_v63 }
 0x7f3   : > { %6098 = vrcp.f32 %v8678_v9 }
 0x7f4   : > { %v5086_v12 = vpop.f32.mrb[60].mxu1  ;;  %v8681_v33 = vpop.xlane.xlu0 %3988 }
 0x7f5   : > { %v5087_v8 = vpop.f32.mrb[61].mxu1  ;;  %v8691_v56 = vpop.xlane.xlu1 %3997  ;;  %6100 = vrcp.f32 %v8681_v33 }
 0x7f6   : > { %v5088_v40 = vadd.f32 %v5087_v8, %v5086_v12  ;;  %v5089_v5 = vpop.f32.mrb[62].mxu1  ;;  %6102 = vrcp.f32 %v8685_v21 }
 0x7f7   : > { %v5090_v54 = vpop.f32.mrb[63].mxu1 }
 0x7f8   : > { %v2815_v41 = vmul.f32 %v6057_v36, %v5088_v40  ;;  %v5091_v22 = vadd.f32 %v5090_v54, %v5089_v5  ;;  %v8688_v3 = vpop.xlane.xlu0 %3994  ;;  %v6075_v40 = vpop.eup %6074 }
 0x7f9   : > { %6104 = vrcp.f32 %v8688_v3 }
 0x7fa   : > { %v2817_v35 = vmul.f32 %v6059_v43, %v5091_v22  ;;  %2862 = vrot.lane.b32.xlu0 %v2815_v41, %s6477_s29  ;;  %v6077_v43 = vpop.eup %6076  ;;  %6106 = vrcp.f32 %v8691_v56 }
 0x7fc   : > { %v5140_v34 = vpop.f32.mrb[64].mxu1  ;;  %2864 = vrot.lane.b32.xlu1 %v2817_v35, %s6477_s29 }
 0x7fd   : > { %v5141_v47 = vpop.f32.mrb[65].mxu1 }
 0x7fe   : > { %v5142_v55 = vadd.f32 %v5141_v47, %v5140_v34  ;;  %v5143_v45 = vpop.f32.mrb[66].mxu1 }
 0x7ff   : > { %v5144_v51 = vpop.f32.mrb[67].mxu1 }
 0x800   : > { %v3486_v58 = vmul.f32 %v6061_v46, %v5142_v55  ;;  %v5145_v62 = vadd.f32 %v5144_v51, %v5143_v45  ;;  %v6079_v46 = vpop.eup %6078 }
 0x802   : > { %v3488_v42 = vmul.f32 %v6063_v20, %v5145_v62  ;;  %3533 = vrot.lane.b32.xlu0 %v3486_v58, %s6476_s15 }
 0x804   : > { %3535 = vrot.lane.b32.xlu1 %v3488_v42, %s6476_s15 }
 0x807   : > { %v5146_v50 = vpop.f32.mrb[68].mxu1 }
 0x808   : > { %v5147_v39 = vpop.f32.mrb[69].mxu1 }
 0x809   : > { %v5148_v6 = vadd.f32 %v5147_v39, %v5146_v50  ;;  %v5149_v15 = vpop.f32.mrb[70].mxu1  ;;  %v6081_v50 = vpop.eup %6080 }
 0x80a   : > { %v5150_v49 = vpop.f32.mrb[71].mxu1 }
 0x80b   : > { %v3490_v17 = vmul.f32 %v6065_v10, %v5148_v6  ;;  %v5151_v31 = vadd.f32 %v5150_v49, %v5149_v15  ;;  %v5732_v15 = vld [vmem:[#allocation16] sm:$0xff]  }
 0x80c   : > { %5428 = vmatprep.subr.bf16.mxu0 %v5732_v15  ;;  %5460 = vmatprep.subr.bf16.mxu1 %v5732_v15 }
 0x80d   : > { %v3492_v61 = vmul.f32 %v6067_v37, %v5151_v31  ;;  %3537 = vrot.lane.b32.xlu0 %v3490_v17, %s6476_s15  ;;  %v6083_v31 = vpop.eup %6082  ;;  %5429 = vmatpush3.bf16.msra.mxu0 %v5732_v15 }
 0x80e   : > { %5468 = vmatpush3.bf16.msra.mxu1 %v5732_v15 }
 0x80f   : > { %v5152_v57 = vpop.f32.mrb[72].mxu1  ;;  %3539 = vrot.lane.b32.xlu1 %v3492_v61, %s6476_s15 }
 0x810   : > { %v5153_v7 = vpop.f32.mrb[73].mxu1 }
 0x811   : > { %v5154_v25 = vadd.f32 %v5153_v7, %v5152_v57  ;;  %v5155_v29 = vpop.f32.mrb[74].mxu1  ;;  %v5733_v7 = vld [vmem:[#allocation16 + $0x8] sm:$0xff]  }
 0x812   : > { %v5156_v44 = vpop.f32.mrb[75].mxu1  ;;  %5430 = vmatprep.subr.bf16.mxu0 %v5733_v7  ;;  %5461 = vmatprep.subr.bf16.mxu1 %v5733_v7 }
 0x813   : > { %v3494_v59 = vmul.f32 %v6069_v1, %v5154_v25  ;;  %v5157_v52 = vadd.f32 %v5156_v44, %v5155_v29  ;;  %v6085_v1 = vpop.eup %6084  ;;  %5431 = vmatpush3.bf16.msra.mxu0 %v5733_v7  ;;  %5469 = vmatpush3.bf16.msra.mxu1 %v5733_v7 }
 0x814   : > { %v6087_v60 = vpop.eup %6086 }
 0x815   : > { %v3496_v4 = vmul.f32 %v6071_v0, %v5157_v52  ;;  %3541 = vrot.lane.b32.xlu0 %v3494_v59, %s6476_s15  ;;  %v5734_v52 = vld [vmem:[#allocation16 + $0x10] sm:$0xff]  }
 0x816   : > { %v8695_v30 = vpop.xlane.xlu0 %4000  ;;  %5432 = vmatprep.subr.bf16.mxu0 %v5734_v52  ;;  %5462 = vmatprep.subr.bf16.mxu1 %v5734_v52 }
 0x817   : > { %v5158_v2 = vpop.f32.mrb[76].mxu1  ;;  %3543 = vrot.lane.b32.xlu1 %v3496_v4, %s6476_s15  ;;  %5433 = vmatpush3.bf16.msra.mxu0 %v5734_v52  ;;  %6108 = vrcp.f32 %v8695_v30 }
 0x818   : > { %v5159_v11 = vpop.f32.mrb[77].mxu1  ;;  %v8698_v23 = vpop.xlane.xlu1 %4003  ;;  %5470 = vmatpush3.bf16.msra.mxu1 %v5734_v52 }
 0x819   : > { %v5160_v48 = vadd.f32 %v5159_v11, %v5158_v2  ;;  %v5161_v38 = vpop.f32.mrb[78].mxu1  ;;  %6110 = vrcp.f32 %v8698_v23 }
 0x81a   : > { %v5162_v32 = vpop.f32.mrb[79].mxu1  ;;  %v8703_v14 = vpop.xlane.xlu0 %4006 }
 0x81b   : > { %v3498_v12 = vmul.f32 %v6073_v53, %v5160_v48  ;;  %v5163_v8 = vadd.f32 %v5162_v32, %v5161_v38  ;;  %v5735_v32 = vld [vmem:[#allocation16 + $0x18] sm:$0xff]   ;;  %6112 = vrcp.f32 %v8703_v14 }
 0x81c   : > { %5434 = vmatprep.subr.bf16.mxu0 %v5735_v32  ;;  %5463 = vmatprep.subr.bf16.mxu1 %v5735_v32 }
 0x81d   : > { %v3500_v5 = vmul.f32 %v6075_v40, %v5163_v8  ;;  %3545 = vrot.lane.b32.xlu0 %v3498_v12, %s6476_s15  ;;  %v6089_v40 = vpop.eup %6088  ;;  %5435 = vmatpush3.bf16.msra.mxu0 %v5735_v32 }
 0x81e   : > { %v8701_v36 = vpop.xlane.xlu1 %4009  ;;  %5471 = vmatpush3.bf16.msra.mxu1 %v5735_v32 }
 0x81f   : > { %v5164_v54 = vpop.f32.mrb[80].mxu1  ;;  %3547 = vrot.lane.b32.xlu1 %v3500_v5, %s6476_s15  ;;  %6114 = vrcp.f32 %v8701_v36 }
 0x820   : > { %v5165_v41 = vpop.f32.mrb[81].mxu1 }
 0x821   : > { %v5166_v13 = vadd.f32 %v5165_v41, %v5164_v54  ;;  %v5167_v22 = vpop.f32.mrb[82].mxu1  ;;  %v5736_v41 = vld [vmem:[#allocation16 + $0x20] sm:$0xff]  }
 0x822   : > { %v5168_v35 = vpop.f32.mrb[83].mxu1  ;;  %v8708_v34 = vpop.xlane.xlu1 %4015  ;;  %5436 = vmatprep.subr.bf16.mxu0 %v5736_v41  ;;  %5464 = vmatprep.subr.bf16.mxu1 %v5736_v41 }
 0x823   : > { %v3502_v47 = vmul.f32 %v6077_v43, %v5166_v13  ;;  %v5169_v55 = vadd.f32 %v5168_v35, %v5167_v22  ;;  %v8710_v45 = vpop.xlane.xlu0 %4012  ;;  %v6091_v43 = vpop.eup %6090  ;;  %5437 = vmatpush3.bf16.msra.mxu0 %v5736_v41  ;;  %5472 = vmatpush3.bf16.msra.mxu1 %v5736_v41 }
 0x824   : > { %6116 = vrcp.f32 %v8710_v45 }
 0x825   : > { %v3504_v51 = vmul.f32 %v6079_v46, %v5169_v55  ;;  %3549 = vrot.lane.b32.xlu0 %v3502_v47, %s6476_s15  ;;  %6118 = vrcp.f32 %v8708_v34 }
 0x826   : > { %v8713_v58 = vpop.xlane.xlu1 %4021 }
 0x827   : > { %v5170_v27 = vpop.f32.mrb[84].mxu1  ;;  %3551 = vrot.lane.b32.xlu1 %v3504_v51, %s6476_s15  ;;  %v8716_v62 = vpop.xlane.xlu0 %4018  ;;  %v5737_v51 = vld [vmem:[#allocation16 + $0x28] sm:$0xff]  }
 0x828   : > { %v5171_v24 = vpop.f32.mrb[85].mxu1  ;;  %5438 = vmatprep.subr.bf16.mxu0 %v5737_v51  ;;  %5465 = vmatprep.subr.bf16.mxu1 %v5737_v51  ;;  %6120 = vrcp.f32 %v8716_v62 }
 0x829   : > { %v5172_v20 = vadd.f32 %v5171_v24, %v5170_v27  ;;  %v5173_v42 = vpop.f32.mrb[86].mxu1  ;;  %5439 = vmatpush3.bf16.msra.mxu0 %v5737_v51  ;;  %5473 = vmatpush3.bf16.msra.mxu1 %v5737_v51  ;;  %6122 = vrcp.f32 %v8713_v58 }
 0x82a   : > { %v5174_v39 = vpop.f32.mrb[87].mxu1  ;;  %v2837_v6 = vpop.permute.xlu1 %2836 }
 0x82b   : > { %v3506_v10 = vmul.f32 %v6081_v50, %v5172_v20  ;;  %v5175_v49 = vadd.f32 %v5174_v39, %v5173_v42  ;;  %2884 = vst.msk [vmem:[#allocation4 + $0x8] sm:$0xff] %vm2882_vm1, %v2837_v6  ;;  %v2835_v17 = vpop.permute.xlu0 %2834  ;;  %v6093_v20 = vpop.eup %6092  ;;  %v5738_v39 = vld [vmem:[#allocation16 + $0x30] sm:$0xff]  }
 0x82c   : > { %2883 = vst.msk [vmem:[#allocation4] sm:$0xff] %vm2882_vm1, %v2835_v17  ;;  %v6095_v63 = vpop.eup %6094  ;;  %5440 = vmatprep.subr.bf16.mxu0 %v5738_v39  ;;  %5466 = vmatprep.subr.bf16.mxu1 %v5738_v39 }
 0x82d   : > { %v3508_v26 = vmul.f32 %v6083_v31, %v5175_v49  ;;  %3553 = vrot.lane.b32.xlu0 %v3506_v10, %s6476_s15  ;;  %5441 = vmatpush3.bf16.msra.mxu0 %v5738_v39  ;;  %v5739_v31 = vld [vmem:[#allocation16 + $0x38] sm:$0xff]  }
 0x82e   : > { %v2841_v37 = vpop.permute.xlu1 %2840  ;;  %5474 = vmatpush3.bf16.msra.mxu1 %v5738_v39  ;;  %5442 = vmatprep.subr.bf16.mxu0 %v5739_v31 }
 0x82f   : > { %v5176_v18 = vpop.f32.mrb[88].mxu1  ;;  %2886 = vst.msk [vmem:[#allocation4 + $0x18] sm:$0xff] %vm2882_vm1, %v2841_v37  ;;  %3555 = vrot.lane.b32.xlu1 %v3508_v26, %s6476_s15  ;;  %v2839_v61 = vpop.permute.xlu0 %2838  ;;  %5467 = vmatprep.subr.bf16.mxu1 %v5739_v31 }
 0x830   : > { %2885 = vst.msk [vmem:[#allocation4 + $0x10] sm:$0xff] %vm2882_vm1, %v2839_v61  ;;  %v5177_v57 = vpop.f32.mrb[89].mxu1 }
 0x831   : > { %v5178_v25 = vadd.f32 %v5177_v57, %v5176_v18  ;;  %v5179_v29 = vpop.f32.mrb[90].mxu1  ;;  %v6097_v18 = vpop.eup %6096  ;;  %5443 = vmatpush3.bf16.msra.mxu0 %v5739_v31 }
 0x832   : > { %v5180_v44 = vpop.f32.mrb[91].mxu1  ;;  %v2845_v59 = vpop.permute.xlu1 %2844  ;;  %5475 = vmatpush3.bf16.msra.mxu1 %v5739_v31 }
 0x833   : > { %v3510_v0 = vmul.f32 %v6085_v1, %v5178_v25  ;;  %v5181_v4 = vadd.f32 %v5180_v44, %v5179_v29  ;;  %2888 = vst.msk [vmem:[#allocation4 + $0x28] sm:$0xff] %vm2882_vm1, %v2845_v59  ;;  %v2843_v2 = vpop.permute.xlu0 %2842  ;;  %v6099_v25 = vpop.eup %6098 }
 0x834   : > { %2887 = vst.msk [vmem:[#allocation4 + $0x20] sm:$0xff] %vm2882_vm1, %v2843_v2  ;;  %v6101_v21 = vpop.eup %6100 }
 0x835   : > { %v3512_v11 = vmul.f32 %v6087_v60, %v5181_v4  ;;  %3557 = vrot.lane.b32.xlu0 %v3510_v0, %s6476_s15  ;;  %v6103_v2 = vpop.eup %6102 }
 0x836   : > { %v2849_v28 = vpop.permute.xlu1 %2848 }
 0x837   : > { %v5182_v48 = vpop.f32.mrb[92].mxu1  ;;  %2890 = vst.msk [vmem:[#allocation4 + $0x38] sm:$0xff] %vm2882_vm1, %v2849_v28  ;;  %3559 = vrot.lane.b32.xlu1 %v3512_v11, %s6476_s15  ;;  %v2847_v38 = vpop.permute.xlu0 %2846 }
 0x838   : > { %2889 = vst.msk [vmem:[#allocation4 + $0x30] sm:$0xff] %vm2882_vm1, %v2847_v38  ;;  %v5183_v53 = vpop.f32.mrb[93].mxu1  ;;  %v6105_v38 = vpop.eup %6104 }
 0x839   : > { %v5184_v12 = vadd.f32 %v5183_v53, %v5182_v48  ;;  %v5185_v8 = vpop.f32.mrb[94].mxu1 }
 0x83a   : > { %v5186_v5 = vpop.f32.mrb[95].mxu1  ;;  %v2851_v54 = vpop.permute.xlu1 %2850 }
 0x83b   : > { %v3514_v13 = vmul.f32 %v6089_v40, %v5184_v12  ;;  %v5187_v22 = vadd.f32 %v5186_v5, %v5185_v8  ;;  %2891 = vst.msk [vmem:[#allocation4 + $0x40] sm:$0xff] %vm2882_vm1, %v2851_v54  ;;  %v2855_v19 = vpop.permute.xlu0 %2854  ;;  %v6107_v12 = vpop.eup %6106 }
 0x83c   : > { %2893 = vst.msk [vmem:[#allocation4 + $0x50] sm:$0xff] %vm2882_vm1, %v2855_v19  ;;  %v6109_v41 = vpop.eup %6108 }
 0x83d   : > { %v3516_v35 = vmul.f32 %v6091_v43, %v5187_v22  ;;  %3561 = vrot.lane.b32.xlu0 %v3514_v13, %s6476_s15  ;;  %v6111_v19 = vpop.eup %6110 }
 0x83e   : > { %v2853_v16 = vpop.permute.xlu1 %2852 }
 0x83f   : > { %v5236_v47 = vpop.f32.mrb[96].mxu1  ;;  %3563 = vrot.lane.b32.xlu1 %v3516_v35, %s6476_s15  ;;  %2892 = vst.msk [vmem:[#allocation4 + $0x48] sm:$0xff] %vm2882_vm1, %v2853_v16  ;;  %v2859_v55 = vpop.permute.xlu0 %2858  ;;  %s6478_s15 = smov [#allocation17]  }
 0x840   : > { %2895 = vst.msk [vmem:[#allocation4 + $0x60] sm:$0xff] %vm2882_vm1, %v2859_v55  ;;  %v5237_v46 = vpop.f32.mrb[97].mxu1  ;;  %v6113_v55 = vpop.eup %6112  ;;  %s6334_s29 = sshll.u32 %s6478_s15, 4  ;;  %s6335_s29 = int_to_ptr.vmem [resolvable:$false] %s6334_s29 }
 0x841   : > { %v5238_v27 = vadd.f32 %v5237_v46, %v5236_v47  ;;  %v5239_v24 = vpop.f32.mrb[98].mxu1  ;;  %s6336_s4 = scalar_lea.vmem %s6335_s29, 4096  ;;  %p6337_p9 = scmp.lt.s32.totalorder %s8827_s5, %s6335_s29 }
 0x842   : > { %v5240_v42 = vpop.f32.mrb[99].mxu1  ;;  %v2857_v50 = vpop.permute.xlu1 %2856  ;;  %p6338_p7 = scmp.lt.s32.totalorder %s6336_s4, %s6330_s10 }
 0x843   : > { %v4185_v6 = vmul.f32 %v6093_v20, %v5238_v27  ;;  %v5241_v15 = vadd.f32 %v5240_v42, %v5239_v24  ;;  %2894 = vst.msk [vmem:[#allocation4 + $0x58] sm:$0xff] %vm2882_vm1, %v2857_v50  ;;  %v6115_v24 = vpop.eup %6114 }
 0x844   : > { %p6339_p2 = por %p6338_p7, %p6337_p9 }
 0x845   : > { %v4187_v10 = vmul.f32 %v6095_v63, %v5241_v15  ;;  %4232 = vrot.lane.b32.xlu0 %v4185_v6, %s6475_s3  ;;  %v6117_v6 = vpop.eup %6116 }
 0x846   : > { %v2861_v49 = vpop.permute.xlu1 %2860  ;;  %p6340_p10 = pnand %p6339_p2, %p6333_p8 }
 0x847   : > { %v5242_v17 = vpop.f32.mrb[100].mxu1  ;;  %4234 = vrot.lane.b32.xlu1 %v4187_v10, %s6475_s3  ;;  %2896 = vst.msk [vmem:[#allocation4 + $0x68] sm:$0xff] %vm2882_vm1, %v2861_v49 }
 0x848   : > { %v5243_v9 = vpop.f32.mrb[101].mxu1 }
 0x849   : > { %v5244_v26 = vadd.f32 %v5243_v9, %v5242_v17  ;;  %v5245_v37 = vpop.f32.mrb[102].mxu1  ;;  %v6119_v17 = vpop.eup %6118 }
 0x84a   : > { %v5246_v61 = vpop.f32.mrb[103].mxu1  ;;  %v6121_v58 = vpop.eup %6120 }
 0x84b   : > { %v4189_v57 = vmul.f32 %v6097_v18, %v5244_v26  ;;  %v5247_v7 = vadd.f32 %v5246_v61, %v5245_v37 }
 0x84d   : > { %v4191_v29 = vmul.f32 %v6099_v25, %v5247_v7  ;;  %4236 = vrot.lane.b32.xlu0 %v4189_v57, %s6475_s3  ;;  %v6123_v25 = vpop.eup %6122 }
 0x84f   : > { %v5248_v33 = vpop.f32.mrb[104].mxu1  ;;  %4238 = vrot.lane.b32.xlu1 %v4191_v29, %s6475_s3 }
 0x850   : > { %v5249_v1 = vpop.f32.mrb[105].mxu1 }
 0x851   : > { %v5250_v44 = vadd.f32 %v5249_v1, %v5248_v33  ;;  %v5251_v59 = vpop.f32.mrb[106].mxu1 }
 0x852   : > { %v5252_v52 = vpop.f32.mrb[107].mxu1 }
 0x853   : > { %v4193_v0 = vmul.f32 %v6101_v21, %v5250_v44  ;;  %v5253_v4 = vadd.f32 %v5252_v52, %v5251_v59 }
 0x855   : > { %v4195_v60 = vmul.f32 %v6103_v2, %v5253_v4  ;;  %4240 = vrot.lane.b32.xlu0 %v4193_v0, %s6475_s3 }
 0x857   : > { %v5254_v11 = vpop.f32.mrb[108].mxu1  ;;  %4242 = vrot.lane.b32.xlu1 %v4195_v60, %s6475_s3 }
 0x858   : > { %v5255_v28 = vpop.f32.mrb[109].mxu1 }
 0x859   : > { %v5256_v3 = vadd.f32 %v5255_v28, %v5254_v11  ;;  %v5257_v48 = vpop.f32.mrb[110].mxu1 }
 0x85a   : > { %v5258_v53 = vpop.f32.mrb[111].mxu1 }
 0x85b   : > { %v4197_v56 = vmul.f32 %v6105_v38, %v5256_v3  ;;  %v5259_v32 = vadd.f32 %v5258_v53, %v5257_v48 }
 0x85d   : > { %v4199_v8 = vmul.f32 %v6107_v12, %v5259_v32  ;;  %4244 = vrot.lane.b32.xlu0 %v4197_v56, %s6475_s3 }
 0x85f   : > { %4246 = vrot.lane.b32.xlu1 %v4199_v8, %s6475_s3  ;;  %v5260_v40 = vpop.f32.mrb[112].mxu1 }
 0x860   : > { %v5261_v5 = vpop.f32.mrb[113].mxu1 }
 0x861   : > { %v5262_v54 = vadd.f32 %v5261_v5, %v5260_v40  ;;  %v5263_v30 = vpop.f32.mrb[114].mxu1 }
 0x862   : > { %v5264_v13 = vpop.f32.mrb[115].mxu1 }
 0x863   : > { %v4201_v22 = vmul.f32 %v6109_v41, %v5262_v54  ;;  %v5265_v23 = vadd.f32 %v5264_v13, %v5263_v30 }
 0x865   : > { %v4203_v43 = vmul.f32 %v6111_v19, %v5265_v23  ;;  %4248 = vrot.lane.b32.xlu0 %v4201_v22, %s6475_s3 }
 0x867   : > { %v5266_v35 = vpop.f32.mrb[116].mxu1  ;;  %4250 = vrot.lane.b32.xlu1 %v4203_v43, %s6475_s3 }
 0x868   : > { %v5267_v16 = vpop.f32.mrb[117].mxu1 }
 0x869   : > { %v5268_v14 = vadd.f32 %v5267_v16, %v5266_v35  ;;  %v5269_v47 = vpop.f32.mrb[118].mxu1 }
 0x86a   : > { %v5270_v46 = vpop.f32.mrb[119].mxu1 }
 0x86b   : > { %v4205_v36 = vmul.f32 %v6113_v55, %v5268_v14  ;;  %v5271_v51 = vadd.f32 %v5270_v46, %v5269_v47 }
 0x86c   : > { %v2863_v27 = vpop.permute.xlu0 %2862 }
 0x86d   : > { %2897 = vst.msk [vmem:[#allocation4 + $0x70] sm:$0xff] %vm2882_vm1, %v2863_v27  ;;  %v4207_v20 = vmul.f32 %v6115_v24, %v5271_v51  ;;  %4252 = vrot.lane.b32.xlu0 %v4205_v36, %s6475_s3 }
 0x86e   : > { %v2865_v42 = vpop.permute.xlu1 %2864 }
 0x86f   : > { %2898 = vst.msk [vmem:[#allocation4 + $0x78] sm:$0xff] %vm2882_vm1, %v2865_v42  ;;  %v5272_v45 = vpop.f32.mrb[120].mxu1  ;;  %4254 = vrot.lane.b32.xlu1 %v4207_v20, %s6475_s3 }
 0x870   : > { %v5273_v50 = vpop.f32.mrb[121].mxu1 }
 0x871   : > { %v5274_v34 = vadd.f32 %v5273_v50, %v5272_v45  ;;  %v5275_v39 = vpop.f32.mrb[122].mxu1 }
 0x872   : > { %v5276_v15 = vpop.f32.mrb[123].mxu1 }
 0x873   : > { %v4209_v63 = vmul.f32 %v6117_v6, %v5274_v34  ;;  %v5277_v10 = vadd.f32 %v5276_v15, %v5275_v39 }
 0x874   : > { %v3534_v49 = vpop.permute.xlu0 %3533 }
 0x875   : > { %3582 = vst.msk [vmem:[#allocation4] sm:$0xff] %vm3581_vm2, %v3534_v49  ;;  %v4211_v9 = vmul.f32 %v6119_v17, %v5277_v10  ;;  %4256 = vrot.lane.b32.xlu0 %v4209_v63, %s6475_s3 }
 0x876   : > { %v3536_v31 = vpop.permute.xlu1 %3535 }
 0x877   : > { %3583 = vst.msk [vmem:[#allocation4 + $0x8] sm:$0xff] %vm3581_vm2, %v3536_v31  ;;  %v5278_v62 = vpop.f32.mrb[124].mxu1  ;;  %4258 = vrot.lane.b32.xlu1 %v4211_v9, %s6475_s3 }
 0x878   : > { %v5279_v26 = vpop.f32.mrb[125].mxu1 }
 0x879   : > { %v5280_v37 = vadd.f32 %v5279_v26, %v5278_v62  ;;  %v5281_v18 = vpop.f32.mrb[126].mxu1  ;;  %v4819_v62 = vld [vmem:[%s9321_s14] ss:$0 sm:$0xff] }
 0x87a   : > { %v5282_v61 = vpop.f32.mrb[127].mxu1 }
 0x87b   : > { %v4213_v57 = vmul.f32 %v6121_v58, %v5280_v37  ;;  %v5283_v7 = vadd.f32 %v5282_v61, %v5281_v18 }
 0x87d   : > { %v4215_v29 = vmul.f32 %v6123_v25, %v5283_v7  ;;  %4260 = vrot.lane.b32.xlu0 %v4213_v57, %s6475_s3 }
 0x87f   : > { %v3538_v33 = vpop.permute.xlu0 %3537  ;;  %4262 = vrot.lane.b32.xlu1 %v4215_v29, %s6475_s3  ;;  %s9324_s3 = sld [smem:[#allocation131_spill]] }
 0x880   : > { %3584 = vst.msk [vmem:[#allocation4 + $0x10] sm:$0xff] %vm3581_vm2, %v3538_v33 }
 0x881   : > { %v3540_v1 = vpop.permute.xlu1 %3539 }
 0x882   : > { %3585 = vst.msk [vmem:[#allocation4 + $0x18] sm:$0xff] %vm3581_vm2, %v3540_v1 }
 0x885   : > { %s8833_s8 = scalar_lea.hbm %s9324_s3, %s4831_s1 }
 0x887   : > { %v3542_v44 = vpop.permute.xlu0 %3541 }
 0x888   : > { %3586 = vst.msk [vmem:[#allocation4 + $0x20] sm:$0xff] %vm3581_vm2, %v3542_v44 }
 0x889   : > { %v3544_v59 = vpop.permute.xlu1 %3543 }
 0x88a   : > { %3587 = vst.msk [vmem:[#allocation4 + $0x28] sm:$0xff] %vm3581_vm2, %v3544_v59 }
 0x88f   : > { %v3546_v21 = vpop.permute.xlu0 %3545 }
 0x890   : > { %3588 = vst.msk [vmem:[#allocation4 + $0x30] sm:$0xff] %vm3581_vm2, %v3546_v21 }
 0x891   : > { %v3548_v52 = vpop.permute.xlu1 %3547 }
 0x892   : > { %3589 = vst.msk [vmem:[#allocation4 + $0x38] sm:$0xff] %vm3581_vm2, %v3548_v52 }
 0x897   : > { %v3550_v0 = vpop.permute.xlu0 %3549 }
 0x898   : > { %3590 = vst.msk [vmem:[#allocation4 + $0x40] sm:$0xff] %vm3581_vm2, %v3550_v0 }
 0x899   : > { %v3552_v4 = vpop.permute.xlu1 %3551 }
 0x89a   : > { %3591 = vst.msk [vmem:[#allocation4 + $0x48] sm:$0xff] %vm3581_vm2, %v3552_v4 }
 0x89f   : > { %v3554_v2 = vpop.permute.xlu0 %3553 }
 0x8a0   : > { %3592 = vst.msk [vmem:[#allocation4 + $0x50] sm:$0xff] %vm3581_vm2, %v3554_v2 }
 0x8a1   : > { %v3556_v60 = vpop.permute.xlu1 %3555 }
 0x8a2   : > { %3593 = vst.msk [vmem:[#allocation4 + $0x58] sm:$0xff] %vm3581_vm2, %v3556_v60 }
 0x8a7   : > { %v3558_v11 = vpop.permute.xlu0 %3557 }
 0x8a8   : > { %3594 = vst.msk [vmem:[#allocation4 + $0x60] sm:$0xff] %vm3581_vm2, %v3558_v11 }
 0x8a9   : > { %v3560_v28 = vpop.permute.xlu1 %3559 }
 0x8aa   : > { %3595 = vst.msk [vmem:[#allocation4 + $0x68] sm:$0xff] %vm3581_vm2, %v3560_v28 }
 0x8af   : > { %v3562_v3 = vpop.permute.xlu0 %3561 }
 0x8b0   : > { %3596 = vst.msk [vmem:[#allocation4 + $0x70] sm:$0xff] %vm3581_vm2, %v3562_v3 }
 0x8b1   : > { %v3564_v48 = vpop.permute.xlu1 %3563 }
 0x8b2   : > { %3597 = vst.msk [vmem:[#allocation4 + $0x78] sm:$0xff] %vm3581_vm2, %v3564_v48 }
 0x8b7   : > { %v4233_v38 = vpop.permute.xlu0 %4232 }
 0x8b8   : > { %4281 = vst.msk [vmem:[#allocation4] sm:$0xff] %vm4280_vm3, %v4233_v38 }
 0x8b9   : > { %v4235_v53 = vpop.permute.xlu1 %4234 }
 0x8ba   : > { %4282 = vst.msk [vmem:[#allocation4 + $0x8] sm:$0xff] %vm4280_vm3, %v4235_v53 }
 0x8bf   : > { %v4237_v56 = vpop.permute.xlu0 %4236  ;;  %v4297_v12 = vld [vmem:[#allocation4] sm:$0xff] }
 0x8c0   : > { %4283 = vst.msk [vmem:[#allocation4 + $0x10] sm:$0xff] %vm4280_vm3, %v4237_v56 }
 0x8c1   : > { %v4239_v32 = vpop.permute.xlu1 %4238  ;;  %v4298_v8 = vld [vmem:[#allocation4 + $0x8] sm:$0xff] }
 0x8c2   : > { %4284 = vst.msk [vmem:[#allocation4 + $0x18] sm:$0xff] %vm4280_vm3, %v4239_v32  ;;  %v4313_v40 = vpack.c.bf16 %v4298_v8, %v4297_v12 }
 0x8c4   : > { %5444 = vmatprep.mubr.bf16.mxu0 %v4313_v40 }
 0x8c7   : > { %v4241_v5 = vpop.permute.xlu0 %4240  ;;  %v4299_v30 = vld [vmem:[#allocation4 + $0x10] sm:$0xff] }
 0x8c8   : > { %4285 = vst.msk [vmem:[#allocation4 + $0x20] sm:$0xff] %vm4280_vm3, %v4241_v5 }
 0x8c9   : > { %v4243_v54 = vpop.permute.xlu1 %4242  ;;  %v4300_v41 = vld [vmem:[#allocation4 + $0x18] sm:$0xff] }
 0x8ca   : > { %4286 = vst.msk [vmem:[#allocation4 + $0x28] sm:$0xff] %vm4280_vm3, %v4243_v54  ;;  %v4314_v13 = vpack.c.bf16 %v4300_v41, %v4299_v30 }
 0x8cc   : > { %5445 = vmatmul.mubr.bf16.vlgmr.msra.gmra.mrb[144].mxu0 %v4314_v13 }
 0x8cf   : > { %v4245_v22 = vpop.permute.xlu0 %4244  ;;  %v4301_v19 = vld [vmem:[#allocation4 + $0x20] sm:$0xff] }
 0x8d0   : > { %4287 = vst.msk [vmem:[#allocation4 + $0x30] sm:$0xff] %vm4280_vm3, %v4245_v22 }
 0x8d1   : > { %v4247_v23 = vpop.permute.xlu1 %4246  ;;  %v4302_v43 = vld [vmem:[#allocation4 + $0x28] sm:$0xff] }
 0x8d2   : > { %4288 = vst.msk [vmem:[#allocation4 + $0x38] sm:$0xff] %vm4280_vm3, %v4247_v23  ;;  %v4315_v35 = vpack.c.bf16 %v4302_v43, %v4301_v19 }
 0x8d4   : > { %5448 = vmatprep.mubr.bf16.mxu0 %v4315_v35 }
 0x8d7   : > { %v4249_v16 = vpop.permute.xlu0 %4248  ;;  %v4303_v14 = vld [vmem:[#allocation4 + $0x30] sm:$0xff] }
 0x8d8   : > { %4289 = vst.msk [vmem:[#allocation4 + $0x40] sm:$0xff] %vm4280_vm3, %v4249_v16 }
 0x8d9   : > { %v4304_v47 = vld [vmem:[#allocation4 + $0x38] sm:$0xff]  ;;  %v4251_v55 = vpop.permute.xlu1 %4250 }
 0x8da   : > { %v4316_v46 = vpack.c.bf16 %v4304_v47, %v4303_v14  ;;  %4290 = vst.msk [vmem:[#allocation4 + $0x48] sm:$0xff] %vm4280_vm3, %v4251_v55 }
 0x8dc   : > { %5449 = vmatmul.mubr.bf16.gmra.mrb[148].mxu0 %v4316_v46 }
 0x8df   : > { %v4253_v36 = vpop.permute.xlu0 %4252  ;;  %v4305_v27 = vld [vmem:[#allocation4 + $0x40] sm:$0xff] }
 0x8e0   : > { %4291 = vst.msk [vmem:[#allocation4 + $0x50] sm:$0xff] %vm4280_vm3, %v4253_v36 }
 0x8e1   : > { %v4255_v51 = vpop.permute.xlu1 %4254  ;;  %v4306_v24 = vld [vmem:[#allocation4 + $0x48] sm:$0xff] }
 0x8e2   : > { %4292 = vst.msk [vmem:[#allocation4 + $0x58] sm:$0xff] %vm4280_vm3, %v4255_v51  ;;  %v4317_v20 = vpack.c.bf16 %v4306_v24, %v4305_v27 }
 0x8e4   : > { %5452 = vmatprep.mubr.bf16.mxu1 %v4317_v20 }
 0x8e7   : > { %v4257_v42 = vpop.permute.xlu0 %4256  ;;  %v4307_v50 = vld [vmem:[#allocation4 + $0x50] sm:$0xff] }
 0x8e8   : > { %4293 = vst.msk [vmem:[#allocation4 + $0x60] sm:$0xff] %vm4280_vm3, %v4257_v42 }
 0x8e9   : > { %v4259_v45 = vpop.permute.xlu1 %4258  ;;  %v4308_v34 = vld [vmem:[#allocation4 + $0x58] sm:$0xff] }
 0x8ea   : > { %4294 = vst.msk [vmem:[#allocation4 + $0x68] sm:$0xff] %vm4280_vm3, %v4259_v45  ;;  %v4318_v39 = vpack.c.bf16 %v4308_v34, %v4307_v50 }
 0x8ec   : > { %5453 = vmatmul.mubr.bf16.vlgmr.msra.gmra.mrb[128].mxu1 %v4318_v39 }
 0x8ef   : > { %v4261_v6 = vpop.permute.xlu0 %4260  ;;  %v4309_v63 = vld [vmem:[#allocation4 + $0x60] sm:$0xff] }
 0x8f0   : > { %4295 = vst.msk [vmem:[#allocation4 + $0x70] sm:$0xff] %vm4280_vm3, %v4261_v6 }
 0x8f1   : > { %v4263_v15 = vpop.permute.xlu1 %4262  ;;  %v4310_v10 = vld [vmem:[#allocation4 + $0x68] sm:$0xff] }
 0x8f2   : > { %4296 = vst.msk [vmem:[#allocation4 + $0x78] sm:$0xff] %vm4280_vm3, %v4263_v15  ;;  %v4319_v49 = vpack.c.bf16 %v4310_v10, %v4309_v63 }
 0x8f4   : > { %5456 = vmatprep.mubr.bf16.mxu1 %v4319_v49 }
 0x8f7   : > { %v4311_v17 = vld [vmem:[#allocation4 + $0x70] sm:$0xff] }
 0x8f9   : > { %v4312_v9 = vld [vmem:[#allocation4 + $0x78] sm:$0xff] }
 0x8fa   : > { %v4320_v31 = vpack.c.bf16 %v4312_v9, %v4311_v17 }
 0x8fc   : > { %5457 = vmatmul.mubr.bf16.gmra.mrb[132].mxu1 %v4320_v31 }
 0x99f   : > { %v5446_v26 = vpop.f32.mrb[144].mxu0 }
 0x9a0   : > { %v4435_v37 = vadd.f32 %v5446_v26, %v4819_v62  ;;  %v4426_v18 = vpop.f32.mrb[145].mxu0 }
 0x9a1   : > { %v4427_v58 = vadd.f32 %v4819_v62, %v4426_v18  ;;  %v5447_v61 = vpop.f32.mrb[146].mxu0 }
 0x9a2   : > { %4491 = vst [vmem:[%s6949_s11 + $0x10] sm:$0xff] %v4435_v37  ;;  %v4438_v57 = vadd.f32 %v5447_v61, %v4819_v62  ;;  %v4429_v7 = vpop.f32.mrb[147].mxu0 }
 0x9a3   : > { %4489 = vst [vmem:[%s6949_s11] sm:$0xff] %v4427_v58  ;;  %v4430_v25 = vadd.f32 %v4819_v62, %v4429_v7 }
 0x9a4   : > { %4492 = vst [vmem:[%s6949_s11 + $0x18] sm:$0xff] %v4438_v57 }
 0x9a5   : > { %4490 = vst [vmem:[%s6949_s11 + $0x8] sm:$0xff] %v4430_v25 }
 0x9af   : > { %v5450_v29 = vpop.f32.mrb[148].mxu0 }
 0x9b0   : > { %v4451_v33 = vadd.f32 %v5450_v29, %v4819_v62  ;;  %v4442_v1 = vpop.f32.mrb[149].mxu0 }
 0x9b1   : > { %v4443_v44 = vadd.f32 %v4819_v62, %v4442_v1  ;;  %v5451_v59 = vpop.f32.mrb[150].mxu0 }
 0x9b2   : > { %4495 = vst [vmem:[%s6949_s11 + $0x30] sm:$0xff] %v4451_v33  ;;  %v4454_v21 = vadd.f32 %v5451_v59, %v4819_v62  ;;  %v4445_v52 = vpop.f32.mrb[151].mxu0 }
 0x9b3   : > { %4493 = vst [vmem:[%s6949_s11 + $0x20] sm:$0xff] %v4443_v44  ;;  %v4446_v0 = vadd.f32 %v4819_v62, %v4445_v52 }
 0x9b4   : > { %4496 = vst [vmem:[%s6949_s11 + $0x38] sm:$0xff] %v4454_v21 }
 0x9b5   : > { %4494 = vst [vmem:[%s6949_s11 + $0x28] sm:$0xff] %v4446_v0 }
 0x9bf   : > { %v5454_v4 = vpop.f32.mrb[128].mxu1 }
 0x9c0   : > { %v4467_v2 = vadd.f32 %v5454_v4, %v4819_v62  ;;  %v4458_v60 = vpop.f32.mrb[129].mxu1 }
 0x9c1   : > { %v4459_v11 = vadd.f32 %v4819_v62, %v4458_v60  ;;  %v5455_v28 = vpop.f32.mrb[130].mxu1 }
 0x9c2   : > { %4499 = vst [vmem:[%s6949_s11 + $0x50] sm:$0xff] %v4467_v2  ;;  %v4470_v3 = vadd.f32 %v5455_v28, %v4819_v62  ;;  %v4461_v48 = vpop.f32.mrb[131].mxu1 }
 0x9c3   : > { %4497 = vst [vmem:[%s6949_s11 + $0x40] sm:$0xff] %v4459_v11  ;;  %v4462_v38 = vadd.f32 %v4819_v62, %v4461_v48 }
 0x9c4   : > { %4500 = vst [vmem:[%s6949_s11 + $0x58] sm:$0xff] %v4470_v3 }
 0x9c5   : > { %4498 = vst [vmem:[%s6949_s11 + $0x48] sm:$0xff] %v4462_v38 }
 0x9cf   : > { %v5458_v53 = vpop.f32.mrb[132].mxu1 }
 0x9d0   : > { %v4483_v56 = vadd.f32 %v5458_v53, %v4819_v62  ;;  %v4474_v32 = vpop.f32.mrb[133].mxu1 }
 0x9d1   : > { %v4475_v12 = vadd.f32 %v4819_v62, %v4474_v32  ;;  %v5459_v8 = vpop.f32.mrb[134].mxu1 }
 0x9d2   : > { %4503 = vst [vmem:[%s6949_s11 + $0x70] sm:$0xff] %v4483_v56  ;;  %v4486_v40 = vadd.f32 %v5459_v8, %v4819_v62  ;;  %v4477_v5 = vpop.f32.mrb[135].mxu1 }
 0x9d3   : > { %4501 = vst [vmem:[%s6949_s11 + $0x60] sm:$0xff] %v4475_v12  ;;  %v4478_v54 = vadd.f32 %v4819_v62, %v4477_v5 }
 0x9d4   : > { %4504 = vst [vmem:[%s6949_s11 + $0x78] sm:$0xff] %v4486_v40 }
 0x9d5   : > { %4502 = vst [vmem:[%s6949_s11 + $0x68] sm:$0xff] %v4478_v54 }
 0x9d6   : > { %6343 = shalt.err (!%p6340_p10)
}
 0x9d7   : > { %s6344_s11 = scalar_lea.hbm %s8833_s8, 2048  ;;  %s6348_s13 = scalar_lea.hbm %s9324_s3, 8192 }
 0x9d8   : > { %p6345_p3 = scmp.ne.s32.totalorder %s8833_s8, %s6344_s11  ;;  %p6349_p12 = scmp.lt.u32.totalorder %s8833_s8, %s9324_s3 }
 0x9d9   : > { %p6350_p11 = scmp.lt.u32.totalorder %s6348_s13, %s6344_s11  ;;  %p6352_p4 = scmp.lt.u32.totalorder %s6344_s11, %s8833_s8 }
 0x9da   : > { %p6346_p5 = pnand %p6345_p3, %p9325_p1 }
 0x9db   : > { %p6351_p13 = por %p6350_p11, %p6349_p12 }
 0x9dc   : > { %p6347_p6 = pneg %p6346_p5 }
 0x9dd   : > { %p6353_p0 = por %p6352_p4, %p6351_p13 }
 0x9df   : > { %p6354_p8 = pnand %p6353_p0, %p6347_p6 }
 0x9e1   : > { %6357 = shalt.err (!%p6354_p8)
}
 0x9e2   : > { %s6479_s28 = smov 128   ;;  %s6480_s0 = smov 8  }
 0x9e3   : > { %5530 = dma.vmem_to_hbm [thread:$0]  (%p9325_p1), %s8827_s5, 2048, %s8833_s8, %s4506_s23, %s6479_s28, %s6479_s28, %s6480_s0  }
 0x9e4 PF: > { %s9326_s1 = sld [smem:[#allocation25_spill]]  ;;  %s9327_s17 = sld [smem:[#allocation32_spill]] }
 0x9e5   : > { %p5568_p9 = scmp.ge.s32.totalorder %s6464_s27, 2 }
 0x9ea   : > { %s4536_s19 = sand.u32 1, %s9326_s1   ;;  %p9328_p7 = scmp.ne.s32.totalorder %s9327_s17, 0 }
 0x9eb   : > { %s4537_s10 = scalar_lea.sflag [#allocation7], %s4536_s19 }
 0x9ec   : > { %p5556_p2 = pnand %p5568_p9, %p9328_p7 }
 0x9ee   : > { %6419 = dma.done.wait (!%p5556_p2), %s4537_s10, 2048  }
 0x9ef   : > { %6421 = vsyncadd (!%p5556_p2), %s4537_s10, 4294965248  ;;  %s32_s27 = sadd.s32 1, %s6464_s27   ;;  %s9329_s17 = sld [smem:[#allocation23_spill]] }
 0x9f0   : > { %p29_p10 = scmp.ge.s32.totalorder %s32_s27, 6   ;;  %s9330_s15 = sld [smem:[#allocation24_spill]] }
 0x9f1   : > { %s9331_s29 = smov %s9349_s18  ;;  %s9332_s5 = sld [smem:[#allocation31_spill]] }
 0x9f2   : > { %s9334_s19 = smov %s9331_s29  ;;  %s9335_s20 = smov %s6440_s21 }
 0x9f3   : > { %s9336_s21 = smov %s6444_s22  ;;  %s9337_s22 = smov %s6837_s16 }
 0x9f4   : > { %s9338_s23 = smov %s6456_s25  ;;  %s9339_s24 = smov %s6460_s26 }
 0x9f5   : > { %s9341_s26 = smov %s9347_s7  ;;  %31 = sbr.rel (!%p29_p10) target bundleno = 25 (0x19), region = 153 }
 0x9f6   : > { %s9333_s18 = smov %s9330_s15 }
 0x9f7   : > { %s9340_s25 = smov %s9332_s5 }
 0x9fc   :  { %4542 = vsyncpa [#allocation6], 1 }
 0x9fd   :  { %4544 = vsyncpa [#allocation6 + $0x1], 1 }
 0x9fe   :  { %4545 = vsyncpa [#allocation9], 1 }
 0x9ff   :  { %4547 = vsyncpa [#allocation9 + $0x1], 1 }
 0xa00   :  { %4548 = vsyncpa [#allocation12], 1 }
 0xa01   :  { %4549 = vsyncpa [#allocation15], 1 }
 0xa02   :  { %4550 = vsyncpa [#allocation7], 1 }
 0xa03   :  { %4552 = vsyncpa [#allocation7 + $0x1], 1 }

</bundles_post_ra>
